<compile_context>
chip_gen: v7x
topology: tpu7x:2x2x1
jax: 0.10.0
libtpu: 0.0.40
codegen_flags: <defaults>
</compile_context>

<pallas_src>
import functools

import jax
import jax.numpy as jnp
from jax import lax
from jax.experimental import pallas as pl
from jax.experimental.pallas import tpu as pltpu

# ----------------------------- model config ---------------------------------
INCLUDE_LABEL = 5
NUM_CLASSES = 10
STEM_W = 16          # stem output width
BLOCK_W = 32         # stage output width (== hidden, regnet.fc.in_features)
GROUP_W = 8          # RegNet group width
GROUPS = BLOCK_W // GROUP_W
SE_W = 4             # round(0.25 * w_in)
HIDDEN = BLOCK_W     # features fed to the final fc (regnet.fc = Identity)
KH = KW = 3          # 3x3 convs (stem + grouped conv), stride 2, pad 1
STRIDE = 2
PAD = 1

LAB_PAD = 8          # one-hot contraction padded 5 -> 8
FC_K = HIDDEN + LAB_PAD            # 40
FC_PAD = 128         # lane-dense logits; host slices [:, :NUM_CLASSES]

# row offsets of the individual weight matrices inside the packed bf16 bank
OFF_STEM = 0
OFF_A = OFF_STEM + BLOCK_W
OFF_B = OFF_A + BLOCK_W
OFF_SE1 = OFF_B + KH * KW * BLOCK_W
OFF_SE2 = OFF_SE1 + BLOCK_W
OFF_C = OFF_SE2 + BLOCK_W
OFF_PROJ = OFF_C + BLOCK_W
W32_ROWS = OFF_PROJ + BLOCK_W      # 480


def _conv_out(size, k=3, stride=2, pad=1):
    return (size + 2 * pad - k) // stride + 1


# ----------------------- the single fused Pallas kernel ----------------------
def _regnet_fused_kernel(xp_ref, onehot_ref, w32_ref, wfc_ref, b32_ref, bfc_ref,
                         out_ref, hapad_ref, *, batch, h1, w1, hw2, margin):
    """Whole _regnet_base.forward, VMEM-resident.

    All matmuls are bf16 -> f32.  The grouped 3x3/s2 conv, the projection
    shortcut and the pools are evaluated at stride 1 on the full stem grid;
    the stride-2 subsampling only enters through the masked means (wsub)."""
    nrows = batch * h1 * w1
    hw1 = h1 * w1
    w_shift = w1.bit_length() - 1      # h1, w1 asserted powers of two

    def mm(a, b):
        return jnp.dot(a.astype(jnp.bfloat16), b,
                       preferred_element_type=jnp.float32)

    b32 = b32_ref[...]
    bstem, ba, bb = b32[0:1, :], b32[1:2, :], b32[2:3, :]
    bse1, bse2, bc, bproj = b32[3:4, :], b32[4:5, :], b32[5:6, :], b32[6:7, :]

    # per-row (h, w) coordinates inside each image (iota + bit ops, VPU-only)
    row = lax.broadcasted_iota(jnp.int32, (nrows, 1), 0)
    w_pos = jnp.bitwise_and(row, w1 - 1)
    h_pos = jnp.bitwise_and(jnp.right_shift(row, w_shift), h1 - 1)

    # --- stem: 3x3/s2 conv (BN folded) + ReLU (im2col done at the boundary) --
    s = jnp.maximum(mm(xp_ref[...], w32_ref[OFF_STEM:OFF_STEM + BLOCK_W, :])
                    + bstem, 0.0)

    # --- block conv a: 1x1 conv + BN + ReLU ----------------------------------
    ha = jnp.maximum(mm(s, w32_ref[OFF_A:OFF_A + BLOCK_W, :]) + ba, 0.0)

    # --- block conv b: grouped 3x3 conv via shifted-window im2col ------------
    # ha goes through a zero-padded VMEM scratch so each of the nine taps is a
    # plain static row-window read; boundary zero-padding is an iota mask.
    hapad_ref[...] = jnp.zeros(hapad_ref.shape, hapad_ref.dtype)
    hapad_ref[margin:margin + nrows, :] = ha.astype(jnp.bfloat16)
    cols = []
    for k in range(KH * KW):
        di, dj = k // KW, k % KW
        start = margin + (di - 1) * w1 + (dj - 1)
        win = hapad_ref[start:start + nrows, :]
        hh = h_pos + (di - 1)
        ww = w_pos + (dj - 1)
        valid = (hh >= 0) & (hh < h1) & (ww >= 0) & (ww < w1)
        mask = jnp.where(valid, 1.0, 0.0).astype(win.dtype)
        cols.append(win * mask)
    im2col = jnp.concatenate(cols, axis=1)                  # (nrows, 9*C) bf16
    hb = jnp.maximum(
        jnp.dot(im2col, w32_ref[OFF_B:OFF_B + KH * KW * BLOCK_W, :],
                preferred_element_type=jnp.float32) + bb, 0.0)

    # --- stride-2 output positions mask (also carries the 1/hw2 GAP weight) --
    keep = (jnp.bitwise_and(h_pos, 1) == 0) & (jnp.bitwise_and(w_pos, 1) == 0)
    wsub = jnp.where(keep, 1.0 / hw2, 0.0).reshape(batch, hw1, 1)

    # --- squeeze-excite (pool over the stride-2 positions only) --------------
    hb3 = hb.reshape(batch, hw1, BLOCK_W)
    pooled = jnp.sum(hb3 * wsub, axis=1)                    # (batch, C)
    z = jnp.maximum(mm(pooled, w32_ref[OFF_SE1:OFF_SE1 + BLOCK_W, :]) + bse1,
                    0.0)
    gate = jax.nn.sigmoid(mm(z, w32_ref[OFF_SE2:OFF_SE2 + BLOCK_W, :]) + bse2)
    hse = (hb3 * gate[:, None, :]).reshape(nrows, BLOCK_W)

    # --- block conv c (1x1 + BN), projection shortcut (1x1 + BN), residual ---
    hc = mm(hse, w32_ref[OFF_C:OFF_C + BLOCK_W, :]) + bc
    shortcut = mm(s, w32_ref[OFF_PROJ:OFF_PROJ + BLOCK_W, :]) + bproj
    res = jnp.maximum(hc + shortcut, 0.0)

    # --- GAP over the stride-2 positions, [feat, onehot] concat + final fc ---
    feat = jnp.sum(res.reshape(batch, hw1, BLOCK_W) * wsub, axis=1)
    fo = jnp.concatenate([feat.astype(jnp.bfloat16), onehot_ref[...]], axis=1)
    logits = jnp.dot(fo, wfc_ref[...],
                     preferred_element_type=jnp.float32) + bfc_ref[...]
    out_ref[...] = logits.astype(out_ref.dtype)


# ------------------------- host-side constant builders -----------------------
def _im2col(x, kh, kw, stride, pad):
    """x: (N,H,W,C) NHWC -> (N*Ho*Wo, kh*kw*C) patches (tap-major columns)."""
    n, h, w, c = x.shape
    xp = jnp.pad(x, ((0, 0), (pad, pad), (pad, pad), (0, 0)))
    ho = _conv_out(h, kh, stride, pad)
    wo = _conv_out(w, kw, stride, pad)
    cols = []
    for i in range(kh):
        for j in range(kw):
            cols.append(xp[:, i:i + stride * ho:stride,
                           j:j + stride * wo:stride, :])
    return jnp.concatenate(cols, axis=-1).reshape(n * ho * wo, kh * kw * c)


# ------------------------------ parameters -----------------------------------
def init_params(seed=0):
    key = jax.random.PRNGKey(seed)
    keys = iter(jax.random.split(key, 32))

    def randn(shape, s=0.1):
        return s * jax.random.normal(next(keys), shape, jnp.float32)

    def bn(c):
        # folded BN: scale = gamma/sqrt(var+eps), bias = beta - mean*scale
        return 1.0 + randn((c,), 0.05), randn((c,), 0.05)

    p = {}
    p["stem_w"] = randn((3, 3, 3, STEM_W))
    p["stem_s"], p["stem_b"] = bn(STEM_W)

    p["a_w"] = randn((1, 1, STEM_W, BLOCK_W))
    p["a_s"], p["a_b"] = bn(BLOCK_W)

    p["b_w"] = randn((3, 3, GROUP_W, BLOCK_W))
    p["b_s"], p["b_b"] = bn(BLOCK_W)

    p["se1_w"] = randn((BLOCK_W, SE_W))
    p["se1_b"] = randn((SE_W,))
    p["se2_w"] = randn((SE_W, BLOCK_W))
    p["se2_b"] = randn((BLOCK_W,))

    p["c_w"] = randn((1, 1, BLOCK_W, BLOCK_W))
    p["c_s"], p["c_b"] = bn(BLOCK_W)

    p["proj_w"] = randn((1, 1, STEM_W, BLOCK_W))
    p["proj_s"], p["proj_b"] = bn(BLOCK_W)

    p["fc_w"] = randn((HIDDEN + INCLUDE_LABEL, NUM_CLASSES))
    p["fc_b"] = randn((NUM_CLASSES,))
    return p


def prepare_operands(params):
    """Fold BN scales into the conv weights and pack everything into a single
    (480, 32) bf16 weight bank + (8, 32) f32 bias bank + fc weight/bias."""
    W = BLOCK_W

    def fold(w2d, scale):
        return (w2d * scale[None, :]).astype(jnp.float32)

    def pad_to(m, rows=W, cols=W):
        return jnp.zeros((rows, cols), jnp.float32).at[
            :m.shape[0], :m.shape[1]].set(m.astype(jnp.float32))

    wstem = pad_to(fold(params["stem_w"].reshape(KH * KW * 3, STEM_W),
                        params["stem_s"]))
    wa = pad_to(fold(params["a_w"].reshape(STEM_W, W), params["a_s"]))
    wse1 = pad_to(params["se1_w"])
    wse2 = pad_to(params["se2_w"])
    wc = fold(params["c_w"].reshape(W, W), params["c_s"])
    wproj = pad_to(fold(params["proj_w"].reshape(STEM_W, W), params["proj_s"]))

    # grouped 3x3 conv -> per-tap dense (W, W) weights, block-diagonal over
    # the channel groups, BN scale folded in; stacked tap-major -> (9*W, W).
    wb = (params["b_w"] * params["b_s"][None, None, None, :]).reshape(
        KH * KW, GROUP_W, W)
    wb = jnp.tile(wb, (1, GROUPS, 1))                       # row cin -> cin % GROUP_W
    gmask = jnp.kron(jnp.eye(GROUPS, dtype=jnp.float32),
                     jnp.ones((GROUP_W, W // GROUPS), jnp.float32))
    wb = (wb * gmask[None, :, :]).reshape(KH * KW * W, W)

    w32 = jnp.concatenate([wstem, wa, wb, wse1, wse2, wc, wproj],
                          axis=0).astype(jnp.bfloat16)
    assert w32.shape == (W32_ROWS, W)

    def brow(b):
        return jnp.zeros((1, W), jnp.float32).at[0, :b.shape[0]].set(b)

    b32 = jnp.concatenate(
        [brow(params["stem_b"]), brow(params["a_b"]), brow(params["b_b"]),
         brow(params["se1_b"]), brow(params["se2_b"]), brow(params["c_b"]),
         brow(params["proj_b"]), jnp.zeros((1, W), jnp.float32)], axis=0)

    wfc = jnp.zeros((FC_K, FC_PAD), jnp.float32)
    wfc = wfc.at[:HIDDEN, :NUM_CLASSES].set(params["fc_w"][:HIDDEN])
    wfc = wfc.at[HIDDEN:HIDDEN + INCLUDE_LABEL, :NUM_CLASSES].set(
        params["fc_w"][HIDDEN:])
    bfc = jnp.zeros((1, FC_PAD), jnp.float32).at[0, :NUM_CLASSES].set(
        params["fc_b"])

    return {"w32": w32, "b32": b32, "wfc": wfc.astype(jnp.bfloat16),
            "bfc": bfc}


# -------------------------------- forward ------------------------------------
def regnet_base_forward(operands, x_nchw, y):
    """Mirrors _regnet_base.forward(x, y). x_nchw: (N,3,H,W) f32, y: (N,) int."""
    batch, _, height, width = x_nchw.shape
    h1, w1 = _conv_out(height), _conv_out(width)   # stem output spatial (8x8)
    h2, w2 = _conv_out(h1), _conv_out(w1)          # stage output spatial (4x4)
    assert h1 & (h1 - 1) == 0 and w1 & (w1 - 1) == 0, "stem grid must be pow2"
    assert h2 == h1 // 2 and w2 == w1 // 2
    nrows = batch * h1 * w1
    margin = ((w1 + 1 + 15) // 16) * 16            # bf16-tile-aligned margin

    x = jnp.transpose(x_nchw, (0, 2, 3, 1)).astype(jnp.float32)  # NCHW -> NHWC
    xp = _im2col(x, KH, KW, STRIDE, PAD)                         # (nrows, 27)
    xp = jnp.pad(xp, ((0, 0), (0, BLOCK_W - xp.shape[1]))).astype(jnp.bfloat16)

    onehot = jax.nn.one_hot(y, INCLUDE_LABEL, dtype=jnp.float32)
    onehot = jnp.pad(onehot,
                     ((0, 0), (0, LAB_PAD - INCLUDE_LABEL))).astype(jnp.bfloat16)

    kernel = functools.partial(_regnet_fused_kernel, batch=batch, h1=h1, w1=w1,
                               hw2=h2 * w2, margin=margin)
    out = pl.pallas_call(
        kernel,
        out_shape=jax.ShapeDtypeStruct((batch, FC_PAD), jnp.float32),
        in_specs=[pl.BlockSpec(memory_space=pltpu.MemorySpace.VMEM)] * 6,
        out_specs=pl.BlockSpec(memory_space=pltpu.MemorySpace.VMEM),
        scratch_shapes=[pltpu.VMEM((nrows + 2 * margin, BLOCK_W),
                                   jnp.bfloat16)],
    )(xp, onehot, operands["w32"], operands["wfc"], operands["b32"],
      operands["bfc"])
    return out[:, :NUM_CLASSES]


# --------------------------- pure-JAX reference -------------------------------
def _reference_forward(params, x_nchw, y):
    """Independent XLA reference (lax.conv, f32 HIGHEST) for a cross-check."""
    hp = lax.Precision.HIGHEST
    dn = ("NHWC", "HWIO", "NHWC")

    def conv(x, w, stride, pad, groups=1):
        return lax.conv_general_dilated(
            x, w, (stride, stride), [(pad, pad), (pad, pad)],
            dimension_numbers=dn, feature_group_count=groups, precision=hp)

    def bn(x, scale, bias):
        return x * scale + bias

    x = jnp.transpose(x_nchw, (0, 2, 3, 1)).astype(jnp.float32)
    x = jax.nn.relu(bn(conv(x, params["stem_w"], 2, 1),
                       params["stem_s"], params["stem_b"]))
    shortcut = bn(conv(x, params["proj_w"], 2, 0),
                  params["proj_s"], params["proj_b"])
    h = jax.nn.relu(bn(conv(x, params["a_w"], 1, 0),
                       params["a_s"], params["a_b"]))
    h = jax.nn.relu(bn(conv(h, params["b_w"], 2, 1, groups=GROUPS),
                       params["b_s"], params["b_b"]))
    pooled = h.mean(axis=(1, 2))
    z = jax.nn.relu(jnp.dot(pooled, params["se1_w"], precision=hp)
                    + params["se1_b"])
    gate = jax.nn.sigmoid(jnp.dot(z, params["se2_w"], precision=hp)
                          + params["se2_b"])
    h = h * gate[:, None, None, :]
    h = bn(conv(h, params["c_w"], 1, 0), params["c_s"], params["c_b"])
    x = jax.nn.relu(h + shortcut)
    feat = x.mean(axis=(1, 2))
    onehot = jax.nn.one_hot(y, INCLUDE_LABEL, dtype=jnp.float32)
    feat = jnp.concatenate([feat, onehot], axis=1)
    return jnp.dot(feat, params["fc_w"], precision=hp) + params["fc_b"]


# ---------------------------------- main --------------------------------------
if __name__ == "__main__":
    batch, height, width = 2, 16, 16
    params = init_params(seed=0)
    operands = prepare_operands(params)

    key = jax.random.PRNGKey(0)
    kx, ky = jax.random.split(key)
    x = jax.random.normal(kx, (batch, 3, height, width), jnp.float32)  # NCHW
    y = jax.random.randint(ky, (batch,), 0, INCLUDE_LABEL)

    fwd = jax.jit(functools.partial(regnet_base_forward, operands))
    out = jax.block_until_ready(fwd(x, y))

    assert out.shape == (batch, NUM_CLASSES), out.shape
    assert out.dtype == jnp.float32

    ref = jax.jit(functools.partial(_reference_forward, params))(x, y)
    err = float(jnp.max(jnp.abs(out - ref)))
    # bf16 matmul operands vs a HIGHEST-precision f32 reference -> loosened tol
    assert err < 5e-2, f"kernel vs reference mismatch: max abs err {err}"

    print("KERNEL_OK")
</pallas_src>

<mosaic_0001>
module attributes {stable_mosaic.version = 11 : i64} {
  func.func @_regnet_fused_kernel(%arg0: memref<128x32xbf16, #tpu.memory_space<vmem>>, %arg1: memref<2x8xbf16, #tpu.memory_space<vmem>>, %arg2: memref<480x32xbf16, #tpu.memory_space<vmem>>, %arg3: memref<40x128xbf16, #tpu.memory_space<vmem>>, %arg4: memref<8x32xf32, #tpu.memory_space<vmem>>, %arg5: memref<1x128xf32, #tpu.memory_space<vmem>>, %arg6: memref<2x128xf32, #tpu.memory_space<vmem>>, %arg7: memref<160x32xbf16, #tpu.memory_space<vmem>>) attributes {dimension_semantics = [], scalar_prefetch = 0 : i64, scratch_operands = 1 : i64, tpu.core_type = #tpu.core_type<tc>} {
    %c0 = arith.constant 0 : index
    %c0_0 = arith.constant 0 : index
    %0 = vector.load %arg4[%c0, %c0_0] : memref<8x32xf32, #tpu.memory_space<vmem>>, vector<8x32xf32>
    %1 = vector.extract_strided_slice %0 {offsets = [0, 0], sizes = [1, 32], strides = [1, 1]} : vector<8x32xf32> to vector<1x32xf32>
    %2 = vector.extract_strided_slice %0 {offsets = [1, 0], sizes = [1, 32], strides = [1, 1]} : vector<8x32xf32> to vector<1x32xf32>
    %3 = vector.extract_strided_slice %0 {offsets = [2, 0], sizes = [1, 32], strides = [1, 1]} : vector<8x32xf32> to vector<1x32xf32>
    %4 = vector.extract_strided_slice %0 {offsets = [3, 0], sizes = [1, 32], strides = [1, 1]} : vector<8x32xf32> to vector<1x32xf32>
    %5 = vector.extract_strided_slice %0 {offsets = [4, 0], sizes = [1, 32], strides = [1, 1]} : vector<8x32xf32> to vector<1x32xf32>
    %6 = vector.extract_strided_slice %0 {offsets = [5, 0], sizes = [1, 32], strides = [1, 1]} : vector<8x32xf32> to vector<1x32xf32>
    %7 = vector.extract_strided_slice %0 {offsets = [6, 0], sizes = [1, 32], strides = [1, 1]} : vector<8x32xf32> to vector<1x32xf32>
    %8 = tpu.iota {dimensions = array<i32: 0>} : vector<128x1xi32>
    %c7_i32 = arith.constant 7 : i32
    %9 = vector.broadcast %c7_i32 : i32 to vector<128x1xi32>
    %10 = arith.andi %8, %9 : vector<128x1xi32>
    %c3_i32 = arith.constant 3 : i32
    %11 = vector.broadcast %c3_i32 : i32 to vector<128x1xi32>
    %12 = arith.shrsi %8, %11 : vector<128x1xi32>
    %c7_i32_1 = arith.constant 7 : i32
    %13 = vector.broadcast %c7_i32_1 : i32 to vector<128x1xi32>
    %14 = arith.andi %12, %13 : vector<128x1xi32>
    %c0_2 = arith.constant 0 : index
    %c0_3 = arith.constant 0 : index
    %15 = vector.load %arg0[%c0_2, %c0_3] : memref<128x32xbf16, #tpu.memory_space<vmem>>, vector<128x32xbf16>
    %c0_4 = arith.constant 0 : index
    %c0_5 = arith.constant 0 : index
    %16 = vector.load %arg2[%c0_4, %c0_5] : memref<480x32xbf16, #tpu.memory_space<vmem>>, vector<32x32xbf16>
    %cst = arith.constant dense<0.000000e+00> : vector<128x32xf32>
    %17 = tpu.matmul %15, %16, %cst {dimension_numbers = #tpu.dot_dimension_numbers<[1], [0], [0], [1], [0, 0, 1, 1], [], []>} : vector<128x32xbf16>, vector<32x32xbf16>, vector<128x32xf32> -> vector<128x32xf32>
    %18 = vector.broadcast %1 : vector<1x32xf32> to vector<128x32xf32>
    %19 = arith.addf %17, %18 : vector<128x32xf32>
    %cst_6 = arith.constant 0.000000e+00 : f32
    %20 = vector.broadcast %cst_6 : f32 to vector<128x32xf32>
    %21 = arith.maximumf %19, %20 : vector<128x32xf32>
    %c32 = arith.constant 32 : index
    %c0_7 = arith.constant 0 : index
    %22 = vector.load %arg2[%c32, %c0_7] : memref<480x32xbf16, #tpu.memory_space<vmem>>, vector<32x32xbf16>
    %23 = arith.truncf %21 : vector<128x32xf32> to vector<128x32xbf16>
    %cst_8 = arith.constant dense<0.000000e+00> : vector<128x32xf32>
    %24 = tpu.matmul %23, %22, %cst_8 {dimension_numbers = #tpu.dot_dimension_numbers<[1], [0], [0], [1], [0, 0, 1, 1], [], []>} : vector<128x32xbf16>, vector<32x32xbf16>, vector<128x32xf32> -> vector<128x32xf32>
    %25 = vector.broadcast %2 : vector<1x32xf32> to vector<128x32xf32>
    %26 = arith.addf %24, %25 : vector<128x32xf32>
    %cst_9 = arith.constant 0.000000e+00 : f32
    %27 = vector.broadcast %cst_9 : f32 to vector<128x32xf32>
    %28 = arith.maximumf %26, %27 : vector<128x32xf32>
    %cst_10 = arith.constant 0.000000e+00 : bf16
    %29 = vector.broadcast %cst_10 : bf16 to vector<160x32xbf16>
    %c0_11 = arith.constant 0 : index
    %c0_12 = arith.constant 0 : index
    %30 = vector.load %arg7[%c0_11, %c0_12] : memref<160x32xbf16, #tpu.memory_space<vmem>>, vector<160x32xbf16>
    tpu.vector_store %arg7[%c0_11, %c0_12], %29 {strides = array<i32>} : memref<160x32xbf16, #tpu.memory_space<vmem>>, vector<160x32xbf16>,
    %31 = arith.truncf %28 : vector<128x32xf32> to vector<128x32xbf16>
    %c16 = arith.constant 16 : index
    %c0_13 = arith.constant 0 : index
    %32 = vector.load %arg7[%c16, %c0_13] : memref<160x32xbf16, #tpu.memory_space<vmem>>, vector<128x32xbf16>
    tpu.vector_store %arg7[%c16, %c0_13], %31 {strides = array<i32>} : memref<160x32xbf16, #tpu.memory_space<vmem>>, vector<128x32xbf16>,
    %c7 = arith.constant 7 : index
    %c0_14 = arith.constant 0 : index
    %33 = vector.load %arg7[%c7, %c0_14] : memref<160x32xbf16, #tpu.memory_space<vmem>>, vector<128x32xbf16>
    %c-1_i32 = arith.constant -1 : i32
    %34 = vector.broadcast %c-1_i32 : i32 to vector<128x1xi32>
    %35 = arith.addi %14, %34 : vector<128x1xi32>
    %c-1_i32_15 = arith.constant -1 : i32
    %36 = vector.broadcast %c-1_i32_15 : i32 to vector<128x1xi32>
    %37 = arith.addi %10, %36 : vector<128x1xi32>
    %c0_i32 = arith.constant 0 : i32
    %38 = vector.broadcast %c0_i32 : i32 to vector<128x1xi32>
    %39 = arith.cmpi sge, %35, %38 : vector<128x1xi32>
    %c8_i32 = arith.constant 8 : i32
    %40 = vector.broadcast %c8_i32 : i32 to vector<128x1xi32>
    %41 = arith.cmpi slt, %35, %40 : vector<128x1xi32>
    %42 = arith.andi %39, %41 : vector<128x1xi1>
    %c0_i32_16 = arith.constant 0 : i32
    %43 = vector.broadcast %c0_i32_16 : i32 to vector<128x1xi32>
    %44 = arith.cmpi sge, %37, %43 : vector<128x1xi32>
    %45 = arith.andi %42, %44 : vector<128x1xi1>
    %c8_i32_17 = arith.constant 8 : i32
    %46 = vector.broadcast %c8_i32_17 : i32 to vector<128x1xi32>
    %47 = arith.cmpi slt, %37, %46 : vector<128x1xi32>
    %48 = arith.andi %45, %47 : vector<128x1xi1>
    %cst_18 = arith.constant 1.000000e+00 : f32
    %cst_19 = arith.constant 0.000000e+00 : f32
    %49 = vector.broadcast %cst_18 : f32 to vector<128x1xf32>
    %50 = vector.broadcast %cst_19 : f32 to vector<128x1xf32>
    %51 = arith.select %48, %49, %50 : vector<128x1xi1>, vector<128x1xf32>
    %52 = arith.truncf %51 : vector<128x1xf32> to vector<128x1xbf16>
    %53 = vector.broadcast %52 : vector<128x1xbf16> to vector<128x32xbf16>
    %54 = arith.mulf %33, %53 : vector<128x32xbf16>
    %c8 = arith.constant 8 : index
    %c0_20 = arith.constant 0 : index
    %55 = vector.load %arg7[%c8, %c0_20] : memref<160x32xbf16, #tpu.memory_space<vmem>>, vector<128x32xbf16>
    %c-1_i32_21 = arith.constant -1 : i32
    %56 = vector.broadcast %c-1_i32_21 : i32 to vector<128x1xi32>
    %57 = arith.addi %14, %56 : vector<128x1xi32>
    %c0_i32_22 = arith.constant 0 : i32
    %58 = vector.broadcast %c0_i32_22 : i32 to vector<128x1xi32>
    %59 = arith.addi %10, %58 : vector<128x1xi32>
    %c0_i32_23 = arith.constant 0 : i32
    %60 = vector.broadcast %c0_i32_23 : i32 to vector<128x1xi32>
    %61 = arith.cmpi sge, %57, %60 : vector<128x1xi32>
    %c8_i32_24 = arith.constant 8 : i32
    %62 = vector.broadcast %c8_i32_24 : i32 to vector<128x1xi32>
    %63 = arith.cmpi slt, %57, %62 : vector<128x1xi32>
    %64 = arith.andi %61, %63 : vector<128x1xi1>
    %c0_i32_25 = arith.constant 0 : i32
    %65 = vector.broadcast %c0_i32_25 : i32 to vector<128x1xi32>
    %66 = arith.cmpi sge, %59, %65 : vector<128x1xi32>
    %67 = arith.andi %64, %66 : vector<128x1xi1>
    %c8_i32_26 = arith.constant 8 : i32
    %68 = vector.broadcast %c8_i32_26 : i32 to vector<128x1xi32>
    %69 = arith.cmpi slt, %59, %68 : vector<128x1xi32>
    %70 = arith.andi %67, %69 : vector<128x1xi1>
    %cst_27 = arith.constant 1.000000e+00 : f32
    %cst_28 = arith.constant 0.000000e+00 : f32
    %71 = vector.broadcast %cst_27 : f32 to vector<128x1xf32>
    %72 = vector.broadcast %cst_28 : f32 to vector<128x1xf32>
    %73 = arith.select %70, %71, %72 : vector<128x1xi1>, vector<128x1xf32>
    %74 = arith.truncf %73 : vector<128x1xf32> to vector<128x1xbf16>
    %75 = vector.broadcast %74 : vector<128x1xbf16> to vector<128x32xbf16>
    %76 = arith.mulf %55, %75 : vector<128x32xbf16>
    %c9 = arith.constant 9 : index
    %c0_29 = arith.constant 0 : index
    %77 = vector.load %arg7[%c9, %c0_29] : memref<160x32xbf16, #tpu.memory_space<vmem>>, vector<128x32xbf16>
    %c-1_i32_30 = arith.constant -1 : i32
    %78 = vector.broadcast %c-1_i32_30 : i32 to vector<128x1xi32>
    %79 = arith.addi %14, %78 : vector<128x1xi32>
    %c1_i32 = arith.constant 1 : i32
    %80 = vector.broadcast %c1_i32 : i32 to vector<128x1xi32>
    %81 = arith.addi %10, %80 : vector<128x1xi32>
    %c0_i32_31 = arith.constant 0 : i32
    %82 = vector.broadcast %c0_i32_31 : i32 to vector<128x1xi32>
    %83 = arith.cmpi sge, %79, %82 : vector<128x1xi32>
    %c8_i32_32 = arith.constant 8 : i32
    %84 = vector.broadcast %c8_i32_32 : i32 to vector<128x1xi32>
    %85 = arith.cmpi slt, %79, %84 : vector<128x1xi32>
    %86 = arith.andi %83, %85 : vector<128x1xi1>
    %c0_i32_33 = arith.constant 0 : i32
    %87 = vector.broadcast %c0_i32_33 : i32 to vector<128x1xi32>
    %88 = arith.cmpi sge, %81, %87 : vector<128x1xi32>
    %89 = arith.andi %86, %88 : vector<128x1xi1>
    %c8_i32_34 = arith.constant 8 : i32
    %90 = vector.broadcast %c8_i32_34 : i32 to vector<128x1xi32>
    %91 = arith.cmpi slt, %81, %90 : vector<128x1xi32>
    %92 = arith.andi %89, %91 : vector<128x1xi1>
    %cst_35 = arith.constant 1.000000e+00 : f32
    %cst_36 = arith.constant 0.000000e+00 : f32
    %93 = vector.broadcast %cst_35 : f32 to vector<128x1xf32>
    %94 = vector.broadcast %cst_36 : f32 to vector<128x1xf32>
    %95 = arith.select %92, %93, %94 : vector<128x1xi1>, vector<128x1xf32>
    %96 = arith.truncf %95 : vector<128x1xf32> to vector<128x1xbf16>
    %97 = vector.broadcast %96 : vector<128x1xbf16> to vector<128x32xbf16>
    %98 = arith.mulf %77, %97 : vector<128x32xbf16>
    %c15 = arith.constant 15 : index
    %c0_37 = arith.constant 0 : index
    %99 = vector.load %arg7[%c15, %c0_37] : memref<160x32xbf16, #tpu.memory_space<vmem>>, vector<128x32xbf16>
    %c0_i32_38 = arith.constant 0 : i32
    %100 = vector.broadcast %c0_i32_38 : i32 to vector<128x1xi32>
    %101 = arith.addi %14, %100 : vector<128x1xi32>
    %c-1_i32_39 = arith.constant -1 : i32
    %102 = vector.broadcast %c-1_i32_39 : i32 to vector<128x1xi32>
    %103 = arith.addi %10, %102 : vector<128x1xi32>
    %c0_i32_40 = arith.constant 0 : i32
    %104 = vector.broadcast %c0_i32_40 : i32 to vector<128x1xi32>
    %105 = arith.cmpi sge, %101, %104 : vector<128x1xi32>
    %c8_i32_41 = arith.constant 8 : i32
    %106 = vector.broadcast %c8_i32_41 : i32 to vector<128x1xi32>
    %107 = arith.cmpi slt, %101, %106 : vector<128x1xi32>
    %108 = arith.andi %105, %107 : vector<128x1xi1>
    %c0_i32_42 = arith.constant 0 : i32
    %109 = vector.broadcast %c0_i32_42 : i32 to vector<128x1xi32>
    %110 = arith.cmpi sge, %103, %109 : vector<128x1xi32>
    %111 = arith.andi %108, %110 : vector<128x1xi1>
    %c8_i32_43 = arith.constant 8 : i32
    %112 = vector.broadcast %c8_i32_43 : i32 to vector<128x1xi32>
    %113 = arith.cmpi slt, %103, %112 : vector<128x1xi32>
    %114 = arith.andi %111, %113 : vector<128x1xi1>
    %cst_44 = arith.constant 1.000000e+00 : f32
    %cst_45 = arith.constant 0.000000e+00 : f32
    %115 = vector.broadcast %cst_44 : f32 to vector<128x1xf32>
    %116 = vector.broadcast %cst_45 : f32 to vector<128x1xf32>
    %117 = arith.select %114, %115, %116 : vector<128x1xi1>, vector<128x1xf32>
    %118 = arith.truncf %117 : vector<128x1xf32> to vector<128x1xbf16>
    %119 = vector.broadcast %118 : vector<128x1xbf16> to vector<128x32xbf16>
    %120 = arith.mulf %99, %119 : vector<128x32xbf16>
    %c16_46 = arith.constant 16 : index
    %c0_47 = arith.constant 0 : index
    %121 = vector.load %arg7[%c16_46, %c0_47] : memref<160x32xbf16, #tpu.memory_space<vmem>>, vector<128x32xbf16>
    %c0_i32_48 = arith.constant 0 : i32
    %122 = vector.broadcast %c0_i32_48 : i32 to vector<128x1xi32>
    %123 = arith.addi %14, %122 : vector<128x1xi32>
    %c0_i32_49 = arith.constant 0 : i32
    %124 = vector.broadcast %c0_i32_49 : i32 to vector<128x1xi32>
    %125 = arith.addi %10, %124 : vector<128x1xi32>
    %c0_i32_50 = arith.constant 0 : i32
    %126 = vector.broadcast %c0_i32_50 : i32 to vector<128x1xi32>
    %127 = arith.cmpi sge, %123, %126 : vector<128x1xi32>
    %c8_i32_51 = arith.constant 8 : i32
    %128 = vector.broadcast %c8_i32_51 : i32 to vector<128x1xi32>
    %129 = arith.cmpi slt, %123, %128 : vector<128x1xi32>
    %130 = arith.andi %127, %129 : vector<128x1xi1>
    %c0_i32_52 = arith.constant 0 : i32
    %131 = vector.broadcast %c0_i32_52 : i32 to vector<128x1xi32>
    %132 = arith.cmpi sge, %125, %131 : vector<128x1xi32>
    %133 = arith.andi %130, %132 : vector<128x1xi1>
    %c8_i32_53 = arith.constant 8 : i32
    %134 = vector.broadcast %c8_i32_53 : i32 to vector<128x1xi32>
    %135 = arith.cmpi slt, %125, %134 : vector<128x1xi32>
    %136 = arith.andi %133, %135 : vector<128x1xi1>
    %cst_54 = arith.constant 1.000000e+00 : f32
    %cst_55 = arith.constant 0.000000e+00 : f32
    %137 = vector.broadcast %cst_54 : f32 to vector<128x1xf32>
    %138 = vector.broadcast %cst_55 : f32 to vector<128x1xf32>
    %139 = arith.select %136, %137, %138 : vector<128x1xi1>, vector<128x1xf32>
    %140 = arith.truncf %139 : vector<128x1xf32> to vector<128x1xbf16>
    %141 = vector.broadcast %140 : vector<128x1xbf16> to vector<128x32xbf16>
    %142 = arith.mulf %121, %141 : vector<128x32xbf16>
    %c17 = arith.constant 17 : index
    %c0_56 = arith.constant 0 : index
    %143 = vector.load %arg7[%c17, %c0_56] : memref<160x32xbf16, #tpu.memory_space<vmem>>, vector<128x32xbf16>
    %c0_i32_57 = arith.constant 0 : i32
    %144 = vector.broadcast %c0_i32_57 : i32 to vector<128x1xi32>
    %145 = arith.addi %14, %144 : vector<128x1xi32>
    %c1_i32_58 = arith.constant 1 : i32
    %146 = vector.broadcast %c1_i32_58 : i32 to vector<128x1xi32>
    %147 = arith.addi %10, %146 : vector<128x1xi32>
    %c0_i32_59 = arith.constant 0 : i32
    %148 = vector.broadcast %c0_i32_59 : i32 to vector<128x1xi32>
    %149 = arith.cmpi sge, %145, %148 : vector<128x1xi32>
    %c8_i32_60 = arith.constant 8 : i32
    %150 = vector.broadcast %c8_i32_60 : i32 to vector<128x1xi32>
    %151 = arith.cmpi slt, %145, %150 : vector<128x1xi32>
    %152 = arith.andi %149, %151 : vector<128x1xi1>
    %c0_i32_61 = arith.constant 0 : i32
    %153 = vector.broadcast %c0_i32_61 : i32 to vector<128x1xi32>
    %154 = arith.cmpi sge, %147, %153 : vector<128x1xi32>
    %155 = arith.andi %152, %154 : vector<128x1xi1>
    %c8_i32_62 = arith.constant 8 : i32
    %156 = vector.broadcast %c8_i32_62 : i32 to vector<128x1xi32>
    %157 = arith.cmpi slt, %147, %156 : vector<128x1xi32>
    %158 = arith.andi %155, %157 : vector<128x1xi1>
    %cst_63 = arith.constant 1.000000e+00 : f32
    %cst_64 = arith.constant 0.000000e+00 : f32
    %159 = vector.broadcast %cst_63 : f32 to vector<128x1xf32>
    %160 = vector.broadcast %cst_64 : f32 to vector<128x1xf32>
    %161 = arith.select %158, %159, %160 : vector<128x1xi1>, vector<128x1xf32>
    %162 = arith.truncf %161 : vector<128x1xf32> to vector<128x1xbf16>
    %163 = vector.broadcast %162 : vector<128x1xbf16> to vector<128x32xbf16>
    %164 = arith.mulf %143, %163 : vector<128x32xbf16>
    %c23 = arith.constant 23 : index
    %c0_65 = arith.constant 0 : index
    %165 = vector.load %arg7[%c23, %c0_65] : memref<160x32xbf16, #tpu.memory_space<vmem>>, vector<128x32xbf16>
    %c1_i32_66 = arith.constant 1 : i32
    %166 = vector.broadcast %c1_i32_66 : i32 to vector<128x1xi32>
    %167 = arith.addi %14, %166 : vector<128x1xi32>
    %c-1_i32_67 = arith.constant -1 : i32
    %168 = vector.broadcast %c-1_i32_67 : i32 to vector<128x1xi32>
    %169 = arith.addi %10, %168 : vector<128x1xi32>
    %c0_i32_68 = arith.constant 0 : i32
    %170 = vector.broadcast %c0_i32_68 : i32 to vector<128x1xi32>
    %171 = arith.cmpi sge, %167, %170 : vector<128x1xi32>
    %c8_i32_69 = arith.constant 8 : i32
    %172 = vector.broadcast %c8_i32_69 : i32 to vector<128x1xi32>
    %173 = arith.cmpi slt, %167, %172 : vector<128x1xi32>
    %174 = arith.andi %171, %173 : vector<128x1xi1>
    %c0_i32_70 = arith.constant 0 : i32
    %175 = vector.broadcast %c0_i32_70 : i32 to vector<128x1xi32>
    %176 = arith.cmpi sge, %169, %175 : vector<128x1xi32>
    %177 = arith.andi %174, %176 : vector<128x1xi1>
    %c8_i32_71 = arith.constant 8 : i32
    %178 = vector.broadcast %c8_i32_71 : i32 to vector<128x1xi32>
    %179 = arith.cmpi slt, %169, %178 : vector<128x1xi32>
    %180 = arith.andi %177, %179 : vector<128x1xi1>
    %cst_72 = arith.constant 1.000000e+00 : f32
    %cst_73 = arith.constant 0.000000e+00 : f32
    %181 = vector.broadcast %cst_72 : f32 to vector<128x1xf32>
    %182 = vector.broadcast %cst_73 : f32 to vector<128x1xf32>
    %183 = arith.select %180, %181, %182 : vector<128x1xi1>, vector<128x1xf32>
    %184 = arith.truncf %183 : vector<128x1xf32> to vector<128x1xbf16>
    %185 = vector.broadcast %184 : vector<128x1xbf16> to vector<128x32xbf16>
    %186 = arith.mulf %165, %185 : vector<128x32xbf16>
    %c24 = arith.constant 24 : index
    %c0_74 = arith.constant 0 : index
    %187 = vector.load %arg7[%c24, %c0_74] : memref<160x32xbf16, #tpu.memory_space<vmem>>, vector<128x32xbf16>
    %c1_i32_75 = arith.constant 1 : i32
    %188 = vector.broadcast %c1_i32_75 : i32 to vector<128x1xi32>
    %189 = arith.addi %14, %188 : vector<128x1xi32>
    %c0_i32_76 = arith.constant 0 : i32
    %190 = vector.broadcast %c0_i32_76 : i32 to vector<128x1xi32>
    %191 = arith.addi %10, %190 : vector<128x1xi32>
    %c0_i32_77 = arith.constant 0 : i32
    %192 = vector.broadcast %c0_i32_77 : i32 to vector<128x1xi32>
    %193 = arith.cmpi sge, %189, %192 : vector<128x1xi32>
    %c8_i32_78 = arith.constant 8 : i32
    %194 = vector.broadcast %c8_i32_78 : i32 to vector<128x1xi32>
    %195 = arith.cmpi slt, %189, %194 : vector<128x1xi32>
    %196 = arith.andi %193, %195 : vector<128x1xi1>
    %c0_i32_79 = arith.constant 0 : i32
    %197 = vector.broadcast %c0_i32_79 : i32 to vector<128x1xi32>
    %198 = arith.cmpi sge, %191, %197 : vector<128x1xi32>
    %199 = arith.andi %196, %198 : vector<128x1xi1>
    %c8_i32_80 = arith.constant 8 : i32
    %200 = vector.broadcast %c8_i32_80 : i32 to vector<128x1xi32>
    %201 = arith.cmpi slt, %191, %200 : vector<128x1xi32>
    %202 = arith.andi %199, %201 : vector<128x1xi1>
    %cst_81 = arith.constant 1.000000e+00 : f32
    %cst_82 = arith.constant 0.000000e+00 : f32
    %203 = vector.broadcast %cst_81 : f32 to vector<128x1xf32>
    %204 = vector.broadcast %cst_82 : f32 to vector<128x1xf32>
    %205 = arith.select %202, %203, %204 : vector<128x1xi1>, vector<128x1xf32>
    %206 = arith.truncf %205 : vector<128x1xf32> to vector<128x1xbf16>
    %207 = vector.broadcast %206 : vector<128x1xbf16> to vector<128x32xbf16>
    %208 = arith.mulf %187, %207 : vector<128x32xbf16>
    %c25 = arith.constant 25 : index
    %c0_83 = arith.constant 0 : index
    %209 = vector.load %arg7[%c25, %c0_83] : memref<160x32xbf16, #tpu.memory_space<vmem>>, vector<128x32xbf16>
    %c1_i32_84 = arith.constant 1 : i32
    %210 = vector.broadcast %c1_i32_84 : i32 to vector<128x1xi32>
    %211 = arith.addi %14, %210 : vector<128x1xi32>
    %c1_i32_85 = arith.constant 1 : i32
    %212 = vector.broadcast %c1_i32_85 : i32 to vector<128x1xi32>
    %213 = arith.addi %10, %212 : vector<128x1xi32>
    %c0_i32_86 = arith.constant 0 : i32
    %214 = vector.broadcast %c0_i32_86 : i32 to vector<128x1xi32>
    %215 = arith.cmpi sge, %211, %214 : vector<128x1xi32>
    %c8_i32_87 = arith.constant 8 : i32
    %216 = vector.broadcast %c8_i32_87 : i32 to vector<128x1xi32>
    %217 = arith.cmpi slt, %211, %216 : vector<128x1xi32>
    %218 = arith.andi %215, %217 : vector<128x1xi1>
    %c0_i32_88 = arith.constant 0 : i32
    %219 = vector.broadcast %c0_i32_88 : i32 to vector<128x1xi32>
    %220 = arith.cmpi sge, %213, %219 : vector<128x1xi32>
    %221 = arith.andi %218, %220 : vector<128x1xi1>
    %c8_i32_89 = arith.constant 8 : i32
    %222 = vector.broadcast %c8_i32_89 : i32 to vector<128x1xi32>
    %223 = arith.cmpi slt, %213, %222 : vector<128x1xi32>
    %224 = arith.andi %221, %223 : vector<128x1xi1>
    %cst_90 = arith.constant 1.000000e+00 : f32
    %cst_91 = arith.constant 0.000000e+00 : f32
    %225 = vector.broadcast %cst_90 : f32 to vector<128x1xf32>
    %226 = vector.broadcast %cst_91 : f32 to vector<128x1xf32>
    %227 = arith.select %224, %225, %226 : vector<128x1xi1>, vector<128x1xf32>
    %228 = arith.truncf %227 : vector<128x1xf32> to vector<128x1xbf16>
    %229 = vector.broadcast %228 : vector<128x1xbf16> to vector<128x32xbf16>
    %230 = arith.mulf %209, %229 : vector<128x32xbf16>
    %231 = tpu.concatenate %54, %76, %98, %120, %142, %164, %186, %208, %230 in 1 : vector<128x32xbf16>, vector<128x32xbf16>, vector<128x32xbf16>, vector<128x32xbf16>, vector<128x32xbf16>, vector<128x32xbf16>, vector<128x32xbf16>, vector<128x32xbf16>, vector<128x32xbf16> -> vector<128x288xbf16>
    %c64 = arith.constant 64 : index
    %c0_92 = arith.constant 0 : index
    %232 = vector.load %arg2[%c64, %c0_92] : memref<480x32xbf16, #tpu.memory_space<vmem>>, vector<288x32xbf16>
    %cst_93 = arith.constant dense<0.000000e+00> : vector<128x32xf32>
    %233 = tpu.matmul %231, %232, %cst_93 {dimension_numbers = #tpu.dot_dimension_numbers<[1], [0], [0], [1], [0, 0, 1, 1], [], []>} : vector<128x288xbf16>, vector<288x32xbf16>, vector<128x32xf32> -> vector<128x32xf32>
    %234 = vector.broadcast %3 : vector<1x32xf32> to vector<128x32xf32>
    %235 = arith.addf %233, %234 : vector<128x32xf32>
    %cst_94 = arith.constant 0.000000e+00 : f32
    %236 = vector.broadcast %cst_94 : f32 to vector<128x32xf32>
    %237 = arith.maximumf %235, %236 : vector<128x32xf32>
    %c1_i32_95 = arith.constant 1 : i32
    %238 = vector.broadcast %c1_i32_95 : i32 to vector<128x1xi32>
    %239 = arith.andi %14, %238 : vector<128x1xi32>
    %c0_i32_96 = arith.constant 0 : i32
    %240 = vector.broadcast %c0_i32_96 : i32 to vector<128x1xi32>
    %241 = arith.cmpi eq, %239, %240 : vector<128x1xi32>
    %c1_i32_97 = arith.constant 1 : i32
    %242 = vector.broadcast %c1_i32_97 : i32 to vector<128x1xi32>
    %243 = arith.andi %10, %242 : vector<128x1xi32>
    %c0_i32_98 = arith.constant 0 : i32
    %244 = vector.broadcast %c0_i32_98 : i32 to vector<128x1xi32>
    %245 = arith.cmpi eq, %243, %244 : vector<128x1xi32>
    %246 = arith.andi %241, %245 : vector<128x1xi1>
    %cst_99 = arith.constant 6.250000e-02 : f32
    %cst_100 = arith.constant 0.000000e+00 : f32
    %247 = vector.broadcast %cst_99 : f32 to vector<128x1xf32>
    %248 = vector.broadcast %cst_100 : f32 to vector<128x1xf32>
    %249 = arith.select %246, %247, %248 : vector<128x1xi1>, vector<128x1xf32>
    %250 = vector.shape_cast %249 : vector<128x1xf32> to vector<2x64x1xf32>
    %251 = vector.shape_cast %237 : vector<128x32xf32> to vector<2x64x32xf32>
    %252 = vector.broadcast %250 : vector<2x64x1xf32> to vector<2x64x32xf32>
    %253 = arith.mulf %251, %252 : vector<2x64x32xf32>
    %cst_101 = arith.constant dense<0.000000e+00> : vector<2x32xf32>
    %254 = vector.multi_reduction <add>, %253, %cst_101 [1] : vector<2x64x32xf32> to vector<2x32xf32>
    %c352 = arith.constant 352 : index
    %c0_102 = arith.constant 0 : index
    %255 = vector.load %arg2[%c352, %c0_102] : memref<480x32xbf16, #tpu.memory_space<vmem>>, vector<32x32xbf16>
    %256 = arith.truncf %254 : vector<2x32xf32> to vector<2x32xbf16>
    %cst_103 = arith.constant dense<0.000000e+00> : vector<2x32xf32>
    %257 = tpu.matmul %256, %255, %cst_103 {dimension_numbers = #tpu.dot_dimension_numbers<[1], [0], [0], [1], [0, 0, 1, 1], [], []>} : vector<2x32xbf16>, vector<32x32xbf16>, vector<2x32xf32> -> vector<2x32xf32>
    %258 = vector.broadcast %4 : vector<1x32xf32> to vector<2x32xf32>
    %259 = arith.addf %257, %258 : vector<2x32xf32>
    %cst_104 = arith.constant 0.000000e+00 : f32
    %260 = vector.broadcast %cst_104 : f32 to vector<2x32xf32>
    %261 = arith.maximumf %259, %260 : vector<2x32xf32>
    %c384 = arith.constant 384 : index
    %c0_105 = arith.constant 0 : index
    %262 = vector.load %arg2[%c384, %c0_105] : memref<480x32xbf16, #tpu.memory_space<vmem>>, vector<32x32xbf16>
    %263 = arith.truncf %261 : vector<2x32xf32> to vector<2x32xbf16>
    %cst_106 = arith.constant dense<0.000000e+00> : vector<2x32xf32>
    %264 = tpu.matmul %263, %262, %cst_106 {dimension_numbers = #tpu.dot_dimension_numbers<[1], [0], [0], [1], [0, 0, 1, 1], [], []>} : vector<2x32xbf16>, vector<32x32xbf16>, vector<2x32xf32> -> vector<2x32xf32>
    %265 = vector.broadcast %5 : vector<1x32xf32> to vector<2x32xf32>
    %266 = arith.addf %264, %265 : vector<2x32xf32>
    %267 = arith.negf %266 : vector<2x32xf32>
    %268 = math.exp %267 : vector<2x32xf32>
    %cst_107 = arith.constant 1.000000e+00 : f32
    %269 = vector.broadcast %cst_107 : f32 to vector<2x32xf32>
    %270 = arith.addf %269, %268 : vector<2x32xf32>
    %271 = arith.divf %269, %270 : vector<2x32xf32>
    %272 = vector.shape_cast %271 : vector<2x32xf32> to vector<2x1x32xf32>
    %273 = vector.broadcast %272 : vector<2x1x32xf32> to vector<2x64x32xf32>
    %274 = arith.mulf %251, %273 : vector<2x64x32xf32>
    %275 = vector.shape_cast %274 : vector<2x64x32xf32> to vector<128x32xf32>
    %c416 = arith.constant 416 : index
    %c0_108 = arith.constant 0 : index
    %276 = vector.load %arg2[%c416, %c0_108] : memref<480x32xbf16, #tpu.memory_space<vmem>>, vector<32x32xbf16>
    %277 = arith.truncf %275 : vector<128x32xf32> to vector<128x32xbf16>
    %cst_109 = arith.constant dense<0.000000e+00> : vector<128x32xf32>
    %278 = tpu.matmul %277, %276, %cst_109 {dimension_numbers = #tpu.dot_dimension_numbers<[1], [0], [0], [1], [0, 0, 1, 1], [], []>} : vector<128x32xbf16>, vector<32x32xbf16>, vector<128x32xf32> -> vector<128x32xf32>
    %279 = vector.broadcast %6 : vector<1x32xf32> to vector<128x32xf32>
    %280 = arith.addf %278, %279 : vector<128x32xf32>
    %c448 = arith.constant 448 : index
    %c0_110 = arith.constant 0 : index
    %281 = vector.load %arg2[%c448, %c0_110] : memref<480x32xbf16, #tpu.memory_space<vmem>>, vector<32x32xbf16>
    %282 = arith.truncf %21 : vector<128x32xf32> to vector<128x32xbf16>
    %cst_111 = arith.constant dense<0.000000e+00> : vector<128x32xf32>
    %283 = tpu.matmul %282, %281, %cst_111 {dimension_numbers = #tpu.dot_dimension_numbers<[1], [0], [0], [1], [0, 0, 1, 1], [], []>} : vector<128x32xbf16>, vector<32x32xbf16>, vector<128x32xf32> -> vector<128x32xf32>
    %284 = vector.broadcast %7 : vector<1x32xf32> to vector<128x32xf32>
    %285 = arith.addf %283, %284 : vector<128x32xf32>
    %286 = arith.addf %280, %285 : vector<128x32xf32>
    %cst_112 = arith.constant 0.000000e+00 : f32
    %287 = vector.broadcast %cst_112 : f32 to vector<128x32xf32>
    %288 = arith.maximumf %286, %287 : vector<128x32xf32>
    %289 = vector.shape_cast %288 : vector<128x32xf32> to vector<2x64x32xf32>
    %290 = vector.broadcast %250 : vector<2x64x1xf32> to vector<2x64x32xf32>
    %291 = arith.mulf %289, %290 : vector<2x64x32xf32>
    %cst_113 = arith.constant dense<0.000000e+00> : vector<2x32xf32>
    %292 = vector.multi_reduction <add>, %291, %cst_113 [1] : vector<2x64x32xf32> to vector<2x32xf32>
    %293 = arith.truncf %292 : vector<2x32xf32> to vector<2x32xbf16>
    %c0_114 = arith.constant 0 : index
    %c0_115 = arith.constant 0 : index
    %294 = vector.load %arg1[%c0_114, %c0_115] : memref<2x8xbf16, #tpu.memory_space<vmem>>, vector<2x8xbf16>
    %295 = tpu.concatenate %293, %294 in 1 : vector<2x32xbf16>, vector<2x8xbf16> -> vector<2x40xbf16>
    %c0_116 = arith.constant 0 : index
    %c0_117 = arith.constant 0 : index
    %296 = vector.load %arg3[%c0_116, %c0_117] : memref<40x128xbf16, #tpu.memory_space<vmem>>, vector<40x128xbf16>
    %cst_118 = arith.constant dense<0.000000e+00> : vector<2x128xf32>
    %297 = tpu.matmul %295, %296, %cst_118 {dimension_numbers = #tpu.dot_dimension_numbers<[1], [0], [0], [1], [0, 0, 1, 1], [], []>} : vector<2x40xbf16>, vector<40x128xbf16>, vector<2x128xf32> -> vector<2x128xf32>
    %c0_119 = arith.constant 0 : index
    %c0_120 = arith.constant 0 : index
    %298 = vector.load %arg5[%c0_119, %c0_120] : memref<1x128xf32, #tpu.memory_space<vmem>>, vector<1x128xf32>
    %299 = vector.broadcast %298 : vector<1x128xf32> to vector<2x128xf32>
    %300 = arith.addf %297, %299 : vector<2x128xf32>
    %c0_121 = arith.constant 0 : index
    %c0_122 = arith.constant 0 : index
    %301 = vector.load %arg6[%c0_121, %c0_122] : memref<2x128xf32, #tpu.memory_space<vmem>>, vector<2x128xf32>
    tpu.vector_store %arg6[%c0_121, %c0_122], %300 {strides = array<i32>} : memref<2x128xf32, #tpu.memory_space<vmem>>, vector<2x128xf32>,
    return
  }
}

</mosaic_0001>

<bundles_post_ra>
// kernel: regnet_base_forward.1
= control target key start
LH: loop header
LB: loop body
LE: loop exit
PB: predicated region body
PF: predicated region fallthrough
CT: control target
= control target key end

     0   :  { %vm7853_vm0 = vcmask 261120   ;;  %s7846_s0 = inlined_call_operand.vmem [shape: bf16[128,32], index: 0, kind: input, shape index: {}]   ;;  %s7847_s1 = inlined_call_operand.vmem [shape: bf16[2,8], index: 1, kind: input, shape index: {}]   ;;  %s7848_s2 = inlined_call_operand.vmem [shape: bf16[480,32], index: 2, kind: input, shape index: {}]   ;;  %s7849_s3 = inlined_call_operand.vmem [shape: bf16[40,128], index: 3, kind: input, shape index: {}]   ;;  %s7850_s4 = inlined_call_operand.vmem [shape: f32[8,32], index: 4, kind: input, shape index: {}]   ;;  %s7851_s5 = inlined_call_operand.vmem [shape: f32[1,128], index: 5, kind: input, shape index: {}]   ;;  %s7852_s6 = inlined_call_operand.hbm [shape: f32[2,128], index: 6, kind: output, shape index: {}]  }
   0x1   :  { %v4336_v0 = vld [vmem:[%s7848_s2] sm:$0xff]   ;;  %v4337_v1 = vld [vmem:[%s7848_s2 + $0x8] sm:$0xff]   ;;  %v4340_v4 = vld [vmem:[%s7846_s0 + $0x10] sm:$0xff]  }
   0x2   :  { %4150 = vmatprep.subr.bf16.mxu0 %v4336_v0  ;;  %v4338_v2 = vld [vmem:[%s7846_s0] sm:$0xff]   ;;  %v4339_v3 = vld [vmem:[%s7846_s0 + $0x8] sm:$0xff]   ;;  %v4341_v5 = vld [vmem:[%s7846_s0 + $0x18] sm:$0xff]  }
   0x3   :  { %4151 = vmatpush3.bf16.msra.mxu0 %v4336_v0  ;;  %4154 = vmatprep.mubr.msk.bf16.mxu0 %vm7853_vm0, %v4338_v2  ;;  %v4342_v6 = vld [vmem:[%s7846_s0 + $0x20] sm:$0xff]   ;;  %v4343_v7 = vld [vmem:[%s7846_s0 + $0x28] sm:$0xff]   ;;  %v4344_v8 = vld [vmem:[%s7846_s0 + $0x30] sm:$0xff]  }
   0x4   :  { %4152 = vmatprep.subr.bf16.mxu0 %v4337_v1  ;;  %v4345_v9 = vld [vmem:[%s7846_s0 + $0x38] sm:$0xff]  }
   0x7   :  { %4153 = vmatpush3.bf16.msra.mxu0 %v4337_v1 }
   0xa   :  { %4155 = vmatmul.mubr.msk.bf16.vlgmr.msra.gmra.mrb[0].mxu0 %vm7853_vm0, %v4339_v3 }
   0xb   :  { %4158 = vmatprep.mubr.msk.bf16.mxu0 %vm7853_vm0, %v4340_v4 }
  0x12   :  { %4159 = vmatmul.mubr.msk.bf16.gmra.mrb[4].mxu0 %vm7853_vm0, %v4341_v5 }
  0x13   :  { %4162 = vmatprep.mubr.msk.bf16.mxu0 %vm7853_vm0, %v4342_v6 }
  0x1a   :  { %4163 = vmatmul.mubr.msk.bf16.gmra.mrb[8].mxu0 %vm7853_vm0, %v4343_v7 }
  0x1b   :  { %4166 = vmatprep.mubr.msk.bf16.mxu0 %vm7853_vm0, %v4344_v8 }
  0x1c   :  { %11 = vsyncpa [#allocation4], 0  ;;  %v4346_v10 = vld [vmem:[%s7848_s2 + $0x10] sm:$0xff]   ;;  %v4347_v11 = vld [vmem:[%s7848_s2 + $0x18] sm:$0xff]   ;;  %v26_v12 = vlaneseq  ;;  %s4419_s26 = smov 64   ;;  %s4420_s7 = smov 32  }
  0x1d   :  { %4170 = vmatprep.subr.bf16.mxu1 %v4346_v10  ;;  %v4512_v15 = vld [vmem:[%s7850_s4] sm:$0xff]  ;;  %s4421_s8 = smov 96   ;;  %s4424_s18 = smov [#allocation3]  }
  0x1e   :  { %4171 = vmatpush3.bf16.msra.mxu1 %v4346_v10  ;;  %v4504_v13 = vshrl.u32 %v26_v12, 7  ;;  %s3931_s19 = sshll.u32 %s4424_s18, 4  ;;  %s3932_s19 = int_to_ptr.vmem [resolvable:$true] %s3931_s19 }
  0x1f   :  { %4172 = vmatprep.subr.bf16.mxu1 %v4347_v11  ;;  %s4393_s20 = scalar_lea.vmem %s3932_s19, 32  ;;  %p4398_p1 = scmp.lt.s32.totalorder %s3932_s19, %s3932_s19 }
  0x20   :  { %8019 = vst [vmem:[#allocation6_spill] sm:$0xff] %v4504_v13  ;;  %v4507_v14 = vsub.s32 0, %v4504_v13  ;;  %v29_v10 = vadd.s32 16, %v4504_v13  ;;  %v59_v12 = vshra.s32 %v4504_v13, 3  ;;  %p4394_p0 = scmp.ne.s32.totalorder %s3932_s19, %s4393_s20  ;;  %p4399_p2 = scmp.lt.s32.totalorder %s4393_s20, %s4393_s20 }
  0x22   :  { %4167 = vmatmul.mubr.msk.bf16.gmra.mrb[12].mxu0 %vm7853_vm0, %v4345_v9  ;;  %4173 = vmatpush3.bf16.msra.mxu1 %v4347_v11  ;;  %8020 = vst [vmem:[#allocation7_spill] sm:$0xff] %v4507_v14  ;;  %v114_v16 = vrot.slane %v4512_v15, %v4507_v14  ;;  %v28_v9 = vadd.s32 8, %v4504_v13  ;;  %v30_v11 = vadd.s32 24, %v4504_v13  ;;  %p4400_p3 = por %p4399_p2, %p4398_p1 }
  0x24   :  { %p4401_p4 = pnand %p4400_p3, %p4394_p0 }
  0xdd   :  { %v4156_v17 = vpop.f32.mrb[0].mxu0 }
  0xde   :  { %v235_v18 = vadd.f32 %v4156_v17, %v114_v16  ;;  %v226_v19 = vpop.f32.mrb[1].mxu0  ;;  %v61_v17 = vshra.s32 %v29_v10, 3 }
  0xdf   :  { %v227_v20 = vadd.f32 %v226_v19, %v114_v16  ;;  %v4157_v21 = vpop.f32.mrb[2].mxu0  ;;  %v4552_v19 = vand.u32 7, %v59_v12  ;;  %v8069_v12 = vmov 0 }
  0xe0   :  { %v238_v22 = vadd.f32 %v4157_v21, %v114_v16  ;;  %v229_v23 = vpop.f32.mrb[3].mxu0  ;;  %v291_v25 = vmax.f32 %v235_v18, 0.0  ;;  %v62_v18 = vshra.s32 %v30_v11, 3 }
  0xe1   :  { %v230_v24 = vadd.f32 %v229_v23, %v114_v16  ;;  %v289_v27 = vmax.f32 %v227_v20, 0.0  ;;  %8029 = vst [vmem:[#allocation16_spill] sm:$0xff] %v4552_v19  ;;  %v4554_v20 = vand.u32 7, %v61_v17  ;;  %v4560_v23 = vand.u32 7, %v30_v11 }
  0xe2   :  { %v292_v26 = vmax.f32 %v238_v22, 0.0  ;;  %v4556_v21 = vand.u32 7, %v62_v18  ;;  %v4558_v22 = vand.u32 7, %v29_v10  ;;  %v8071_v18 = vmov 0 }
  0xe3   :  { %v290_v28 = vmax.f32 %v230_v24, 0.0  ;;  %8030 = vst [vmem:[#allocation17_spill] sm:$0xff] %v4554_v20  ;;  %8033 = vst [vmem:[#allocation20_spill] sm:$0xff] %v4560_v23 }
  0xe4   :  { %v4516_v29 = vpack.c.bf16 %v292_v26, %v291_v25  ;;  %8031 = vst [vmem:[#allocation18_spill] sm:$0xff] %v4556_v21  ;;  %8032 = vst [vmem:[#allocation19_spill] sm:$0xff] %v4558_v22  ;;  %v507_v25 = vadd.s32 4294967295, %v4554_v20  ;;  %v508_v26 = vadd.s32 4294967295, %v4556_v21 }
  0xe5   :  { %v4160_v30 = vpop.f32.mrb[4].mxu0  ;;  %v4518_v31 = vpack.c.bf16 %v290_v28, %v289_v27  ;;  %v31_v27 = vadd.s32 32, %v4504_v13  ;;  %v4568_v28 = vadd.s32 40, %v4504_v13 }
  0xe6   :  { %8021 = vst [vmem:[#allocation8_spill] sm:$0xff] %v4516_v29  ;;  %v251_v32 = vadd.f32 %v4160_v30, %v114_v16  ;;  %v242_v33 = vpop.f32.mrb[5].mxu0  ;;  %v4571_v30 = vand.u32 7, %v4504_v13  ;;  %vm539_vm1 = vcmp.ge.s32.totalorder %v507_v25, 0  ;;  %vm540_vm2 = vcmp.ge.s32.totalorder %v508_v26, 0 }
  0xe7   :  { %8022 = vst [vmem:[#allocation9_spill] sm:$0xff] %v4518_v31  ;;  %v243_v34 = vadd.f32 %v242_v33, %v114_v16  ;;  %v4161_v35 = vpop.f32.mrb[6].mxu0  ;;  %4174 = vmatprep.mubr.msk.bf16.mxu1 %vm7853_vm0, %v4518_v31  ;;  %v4577_v33 = vadd.s32 4294967295, %v4560_v23  ;;  %vm555_vm3 = vcmp.lt.s32.totalorder %v507_v25, 8  ;;  %vm556_vm4 = vcmp.lt.s32.totalorder %v508_v26, 8 }
  0xe8   :  { %v295_v36 = vmax.f32 %v251_v32, 0.0  ;;  %v254_v37 = vadd.f32 %v4161_v35, %v114_v16  ;;  %v245_v38 = vpop.f32.mrb[7].mxu0  ;;  %4175 = vmatmul.mubr.msk.bf16.vlgmr.msra.gmra.mrb[0].mxu1 %vm7853_vm0, %v4516_v29  ;;  %8035 = vst [vmem:[#allocation22_spill] sm:$0xff] %v4571_v30  ;;  %v4574_v32 = vadd.s32 4294967295, %v4558_v22  ;;  %v4580_v35 = vand.u32 7, %v28_v9  ;;  %vm4582_vm5 = vmand %vm539_vm1, %vm555_vm3 }
  0xe9   :  { %v293_v39 = vmax.f32 %v243_v34, 0.0  ;;  %v246_v40 = vadd.f32 %v245_v38, %v114_v16  ;;  %v1482_v34 = vadd.s32 1, %v4552_v19  ;;  %v4417_v38 = vmov 0   ;;  %vm4600_vm7 = vmand %vm540_vm2, %vm556_vm4 }
  0xea   :  { %v296_v41 = vmax.f32 %v254_v37, 0.0  ;;  %8036 = vst [vmem:[#allocation23_spill] sm:$0xff] %v4580_v35  ;;  %vm7855_vm6 = vcmp.ge.s32.totalorder %v4574_v32, 0  ;;  %472 = vst.msk [vmem:[#allocation2 + $0x10] sm:$0xff] %vm7853_vm0, %v4417_v38  ;;  %vm7854_vm8 = vcmp.ge.s32.totalorder %v4577_v33, 0  ;;  %v8128_v29 = vmov 0 }
  0xeb   :  { %v294_v42 = vmax.f32 %v246_v40, 0.0  ;;  %470 = vst.msk [vmem:[#allocation2] sm:$0xff] %vm7853_vm0, %v4417_v38  ;;  %471 = vst.msk [vmem:[#allocation2 + $0x8] sm:$0xff] %vm7853_vm0, %v4417_v38  ;;  %v8041_v40 = vmov 0  ;;  %vm1498_vm11 = vcmp.ge.s32.totalorder %v1482_v34, 0  ;;  %vm1514_vm14 = vcmp.lt.s32.totalorder %v1482_v34, 8 }
  0xec   :  { %v4524_v43 = vpack.c.bf16 %v296_v41, %v295_v36  ;;  %v8037_v36 = vmov 0  ;;  %473 = vst.msk [vmem:[#allocation2 + $0x18] sm:$0xff] %vm7853_vm0, %v4417_v38  ;;  %474 = vst.msk [vmem:[#allocation2 + $0x20] sm:$0xff] %vm7853_vm0, %v4417_v38  ;;  %v1484_v41 = vadd.s32 1, %v4554_v20 }
  0xed   :  { %v4526_v44 = vpack.c.bf16 %v294_v42, %v293_v39  ;;  %v4164_v45 = vpop.f32.mrb[8].mxu0  ;;  %v8038_v36 = vsel %vm4582_vm5, 4294967295, %v8037_v36  ;;  %475 = vst.msk [vmem:[#allocation2 + $0x28] sm:$0xff] %vm7853_vm0, %v4417_v38  ;;  %476 = vst.msk [vmem:[#allocation2 + $0x30] sm:$0xff] %vm7853_vm0, %v4417_v38  ;;  %v1485_v42 = vadd.s32 1, %v4556_v21 }
  0xee   :  { %8023 = vst [vmem:[#allocation10_spill] sm:$0xff] %v4524_v43  ;;  %v267_v46 = vadd.f32 %v4164_v45, %v114_v16  ;;  %v258_v47 = vpop.f32.mrb[9].mxu0  ;;  %477 = vst.msk [vmem:[#allocation2 + $0x38] sm:$0xff] %vm7853_vm0, %v4417_v38  ;;  %v4616_v45 = vadd.s32 4294967295, %v4571_v30  ;;  %vm1500_vm13 = vcmp.ge.s32.totalorder %v1484_v41, 0  ;;  %vm1516_vm1 = vcmp.lt.s32.totalorder %v1484_v41, 8 }
  0xef   :  { %8024 = vst [vmem:[#allocation11_spill] sm:$0xff] %v4526_v44  ;;  %v259_v48 = vadd.f32 %v258_v47, %v114_v16  ;;  %v4165_v49 = vpop.f32.mrb[10].mxu0  ;;  %4178 = vmatprep.mubr.msk.bf16.mxu1 %vm7853_vm0, %v4526_v44  ;;  %478 = vst.msk [vmem:[#allocation2 + $0x40] sm:$0xff] %vm7853_vm0, %v4417_v38  ;;  %v4627_v47 = vadd.s32 1, %v4558_v22  ;;  %vm1501_vm2 = vcmp.ge.s32.totalorder %v1485_v42, 0  ;;  %vm1517_vm3 = vcmp.lt.s32.totalorder %v1485_v42, 8 }
  0xf0   :  { %v299_v50 = vmax.f32 %v267_v46, 0.0  ;;  %v270_v51 = vadd.f32 %v4165_v49, %v114_v16  ;;  %v261_v52 = vpop.f32.mrb[11].mxu0  ;;  %4179 = vmatmul.mubr.msk.bf16.gmra.mrb[4].mxu1 %vm7853_vm0, %v4524_v43  ;;  %479 = vst.msk [vmem:[#allocation2 + $0x48] sm:$0xff] %vm7853_vm0, %v4417_v38  ;;  %vm4609_vm9 = vmand %vm4582_vm5, %vm7855_vm6  ;;  %v8045_v46 = vmov 0  ;;  %v63_v49 = vshra.s32 %v31_v27, 3 }
  0xf1   :  { %v297_v53 = vmax.f32 %v259_v48, 0.0  ;;  %v262_v54 = vadd.f32 %v261_v52, %v114_v16  ;;  %v8042_v40 = vsel %vm4609_vm9, 4294967295, %v8041_v40  ;;  %8044 = vst [vmem:[#allocation25_spill] sm:$0xff] %v4616_v45  ;;  %vm4622_vm10 = vmand %vm4600_vm7, %vm7854_vm8  ;;  %v4630_v48 = vadd.s32 4294967295, %v4580_v35 }
  0xf2   :  { %v300_v55 = vmax.f32 %v270_v51, 0.0  ;;  %8043 = vst [vmem:[#allocation24_spill] sm:$0xff] %v8042_v40  ;;  %v8046_v46 = vsel %vm4622_vm10, 4294967295, %v8045_v46  ;;  %vm4633_vm4 = vmand %vm1498_vm11, %vm1514_vm14  ;;  %v8049_v51 = vmov 0  ;;  %v4639_v52 = vadd.s32 1, %v4571_v30 }
  0xf3   :  { %v298_v56 = vmax.f32 %v262_v54, 0.0  ;;  %8047 = vst [vmem:[#allocation26_spill] sm:$0xff] %v8046_v46  ;;  %8048 = vst [vmem:[#allocation27_spill] sm:$0xff] %v4630_v48  ;;  %v8050_v51 = vsel %vm4633_vm4, 4294967295, %v8049_v51  ;;  %vm7858_vm8 = vcmp.lt.s32.totalorder %v4627_v47, 8  ;;  %v8051_v54 = vmov 0 }
  0xf4   :  { %v4532_v57 = vpack.c.bf16 %v300_v55, %v299_v50  ;;  %v64_v50 = vshra.s32 %v4568_v28, 3  ;;  %vm7857_vm10 = vcmp.ge.s32.totalorder %v4630_v48, 0  ;;  %vm4650_vm11 = vmand %vm1500_vm13, %vm1516_vm1  ;;  %vm8073_vm9 = vcmp.lt.s32.totalorder %v4627_v47, 8 }
  0xf5   :  { %v4534_v58 = vpack.c.bf16 %v298_v56, %v297_v53  ;;  %v4168_v59 = vpop.f32.mrb[12].mxu0  ;;  %v4642_v53 = vadd.s32 1, %v4580_v35  ;;  %vm4654_vm14 = vmand %vm1501_vm2, %vm1517_vm3  ;;  %vm8062_vm3 = vcmp.ge.s32.totalorder %v4574_v32, 0  ;;  %v8077_v38 = vmov 0 }
  0xf6   :  { %8025 = vst [vmem:[#allocation12_spill] sm:$0xff] %v4532_v57  ;;  %v283_v60 = vadd.f32 %v4168_v59, %v114_v16  ;;  %v274_v61 = vpop.f32.mrb[13].mxu0  ;;  %v4658_v59 = vand.u32 7, %v63_v49  ;;  %vm4673_vm13 = vmand %vm4582_vm5, %vm7858_vm8  ;;  %v8083_v49 = vmov 0  ;;  %v8178_v55 = vmov 0 }
  0xf7   :  { %8026 = vst [vmem:[#allocation13_spill] sm:$0xff] %v4534_v58  ;;  %4182 = vmatprep.mubr.msk.bf16.mxu1 %vm7853_vm0, %v4534_v58  ;;  %v275_v62 = vadd.f32 %v274_v61, %v114_v16  ;;  %v4169_v63 = vpop.f32.mrb[14].mxu0  ;;  %v4663_v61 = vadd.s32 1, %v4560_v23  ;;  %vm7862_vm1 = vcmp.lt.s32.totalorder %v4642_v53, 8  ;;  %v8181_v56 = vmov 0 }
  0xf8   :  { %4183 = vmatmul.mubr.msk.bf16.gmra.mrb[8].mxu1 %vm7853_vm0, %v4532_v57  ;;  %v303_v0 = vmax.f32 %v283_v60, 0.0  ;;  %v286_v1 = vadd.f32 %v4169_v63, %v114_v16  ;;  %v277_v2 = vpop.f32.mrb[15].mxu0  ;;  %8057 = vst [vmem:[#allocation28_spill] sm:$0xff] %v4658_v59  ;;  %v4660_v60 = vand.u32 7, %v64_v50  ;;  %v4683_v63 = vand.u32 7, %v31_v27 }
  0xf9   :  { %v301_v3 = vmax.f32 %v275_v62, 0.0  ;;  %v278_v4 = vadd.f32 %v277_v2, %v114_v16  ;;  %v60_v16 = vshra.s32 %v28_v9, 3  ;;  %v7869_v2 = vmov 0.0  }
  0xfa   :  { %v304_v5 = vmax.f32 %v286_v1, 0.0  ;;  %8058 = vst [vmem:[#allocation29_spill] sm:$0xff] %v4660_v60  ;;  %8061 = vst [vmem:[#allocation30_spill] sm:$0xff] %v4683_v63  ;;  %v509_v10 = vadd.s32 4294967295, %v4658_v59  ;;  %v510_v11 = vadd.s32 4294967295, %v4660_v60  ;;  %v4733_v25 = vadd.s32 1, %v4683_v63 }
  0xfb   :  { %v302_v6 = vmax.f32 %v278_v4, 0.0  ;;  %v4562_v24 = vand.u32 7, %v60_v16  ;;  %v319_v16 = vsub.s32 1, %v4504_v13  ;;  %v4795_v9 = vadd.s32 4294967295, %v4683_v63 }
  0xfc   :  { %v4540_v7 = vpack.c.bf16 %v304_v5, %v303_v0  ;;  %v505_v0 = vadd.s32 4294967295, %v4552_v19  ;;  %v4697_v5 = vand.u32 7, %v4568_v28  ;;  %v8101_v57 = vmov 0 }
  0xfd   :  { %v4542_v8 = vpack.c.bf16 %v302_v6, %v301_v3  ;;  %8034 = vst [vmem:[#allocation21_spill] sm:$0xff] %v4562_v24  ;;  %v1483_v37 = vadd.s32 1, %v4562_v24  ;;  %v506_v6 = vadd.s32 4294967295, %v4562_v24  ;;  %v4765_v50 = vrot.slane %v4512_v15, %v319_v16  ;;  %8095 = vst [vmem:[#allocation37_spill] sm:$0xff] %v4795_v9 }
  0xfe   :  { %8027 = vst [vmem:[#allocation14_spill] sm:$0xff] %v4540_v7  ;;  %8065 = vst [vmem:[#allocation31_spill] sm:$0xff] %v4697_v5  ;;  %v4736_v26 = vadd.s32 1, %v4697_v5  ;;  %v831_v58 = vsel %vm4600_vm7, 1.0, %v7869_v2 }
  0xff   :  { %8028 = vst [vmem:[#allocation15_spill] sm:$0xff] %v4542_v8  ;;  %4186 = vmatprep.mubr.msk.bf16.mxu1 %vm7853_vm0, %v4542_v8  ;;  %vm1499_vm12 = vcmp.ge.s32.totalorder %v1483_v37, 0  ;;  %vm1515_vm15 = vcmp.lt.s32.totalorder %v1483_v37, 8 }
 0x100   :  { %4187 = vmatmul.mubr.msk.bf16.gmra.mrb[12].mxu1 %vm7853_vm0, %v4540_v7  ;;  %vm7856_vm0 = vcmp.ge.s32.totalorder %v4616_v45, 0  ;;  %vm4645_vm6 = vmand %vm1499_vm12, %vm1515_vm15  ;;  %vm7859_vm15 = vcmp.lt.s32.totalorder %v4639_v52, 8 }
 0x101   :  { %v8052_v54 = vsel %vm4645_vm6, 4294967295, %v8051_v54  ;;  %vm1546_vm12 = vmand %vm4633_vm4, %vm7856_vm0 }
 0x102   :  { %vm1547_vm2 = vmand %vm4645_vm6, %vm7857_vm10  ;;  %v1578_v3 = vsel %vm1546_vm12, 1.0, %v7869_v2  ;;  %vm8066_vm10 = vcmp.ge.s32.totalorder %v4577_v33, 0  ;;  %vm8082_vm12 = vcmp.ge.s32.totalorder %v506_v6, 0 }
 0x103   :  { %vm4690_vm0 = vmand %vm4650_vm11, %vm8062_vm3  ;;  %v1579_v4 = vsel %vm1547_vm2, 1.0, %v7869_v2  ;;  %vm541_vm3 = vcmp.ge.s32.totalorder %v509_v10, 0 }
 0x104   :  { %vm4704_vm8 = vmand %vm4654_vm14, %vm8066_vm10  ;;  %v1594_v17 = vpack.c.bf16 %v1579_v4, %v1578_v3  ;;  %v1580_v27 = vsel %vm4690_vm0, 1.0, %v7869_v2  ;;  %v8086_v3 = vmov 0  ;;  %v8090_v4 = vmov 0 }
 0x105   :  { %vm4715_vm2 = vmand %vm4633_vm4, %vm7859_vm15  ;;  %v1581_v28 = vsel %vm4704_vm8, 1.0, %v7869_v2  ;;  %vm8076_vm4 = vcmp.ge.s32.totalorder %v505_v0, 0  ;;  %vm8089_vm8 = vcmp.ge.s32.totalorder %v510_v11, 0 }
 0x106   :  { %v8070_v12 = vsel %vm4715_vm2, 4294967295, %v8069_v12  ;;  %vm4724_vm10 = vmand %vm4645_vm6, %vm7862_vm1  ;;  %vm8074_vm1 = vcmp.lt.s32.totalorder %v4663_v61, 8  ;;  %vm558_vm2 = vcmp.lt.s32.totalorder %v510_v11, 8  ;;  %v1603_v41 = vshrl.u32 %v1594_v17, 16 }
 0x107   :  { %v8072_v18 = vsel %vm4724_vm10, 4294967295, %v8071_v18  ;;  %vm1808_vm15 = vmand %vm4650_vm11, %vm8073_vm9  ;;  %vm557_vm10 = vcmp.lt.s32.totalorder %v509_v10, 8  ;;  %vm8075_vm9 = vcmp.lt.s32.totalorder %v505_v0, 8  ;;  %v1606_v1 = vshll.u32 %v1594_v17, 16 }
 0x108   :  { %vm1809_vm6 = vmand %vm4654_vm14, %vm8074_vm1  ;;  %v1824_v34 = vsel %vm1808_vm15, 1.0, %v7869_v2  ;;  %vm8081_vm1 = vcmp.lt.s32.totalorder %v506_v6, 8  ;;  %v1595_v0 = vpack.c.bf16 %v1581_v28, %v1580_v27  ;;  %v977_v6 = vsel %vm4673_vm13, 1.0, %v7869_v2 }
 0x109   :  { %v1825_v37 = vsel %vm1809_vm6, 1.0, %v7869_v2  ;;  %vm4752_vm5 = vmand %vm8076_vm4, %vm8075_vm9  ;;  %vm7868_vm9 = vcmp.lt.s32.totalorder %v4736_v26, 8  ;;  %v1605_v15 = vrot.slane %v1603_v41, 4  ;;  %vm8094_vm15 = vcmp.lt.s32.totalorder %v4642_v53, 8 }
 0x10a   :  { %v8078_v38 = vsel %vm4752_vm5, 4294967295, %v8077_v38  ;;  %v4756_v42 = vpack.c.bf16 %v1825_v37, %v1824_v34  ;;  %vm4760_vm0 = vmand %vm8082_vm12, %vm8081_vm1  ;;  %vm1107_vm1 = vcmp.lt.s32.totalorder %v4552_v19, 8  ;;  %v4798_v10 = vadd.s32 4294967295, %v4697_v5 }
 0x10b   :  { %8079 = vst [vmem:[#allocation32_spill] sm:$0xff] %v8078_v38  ;;  %v8084_v49 = vsel %vm4760_vm0, 4294967295, %v8083_v49  ;;  %vm4767_vm6 = vmand %vm541_vm3, %vm557_vm10  ;;  %vm8093_vm10 = vcmp.lt.s32.totalorder %v4639_v52, 8  ;;  %v1608_v11 = vrot.slane %v1606_v1, 5  ;;  %v828_v17 = vsel %vm4752_vm5, 1.0, %v7869_v2 }
 0x10c   :  { %8080 = vst [vmem:[#allocation33_spill] sm:$0xff] %v4756_v42  ;;  %8085 = vst [vmem:[#allocation34_spill] sm:$0xff] %v8084_v49  ;;  %v8087_v3 = vsel %vm4767_vm6, 4294967295, %v8086_v3  ;;  %v829_v27 = vsel %vm4760_vm0, 1.0, %v7869_v2  ;;  %v1611_v28 = vshrl.u32 %v1595_v0, 16  ;;  %v1614_v34 = vshll.u32 %v1595_v0, 16 }
 0x10d   :  { %8088 = vst [vmem:[#allocation35_spill] sm:$0xff] %v8087_v3  ;;  %vm4772_vm4 = vmand %vm8089_vm8, %vm558_vm2  ;;  %vm8099_vm8 = vnez %v8070_v12 }
 0x10e   :  { %v8091_v4 = vsel %vm4772_vm4, 4294967295, %v8090_v4  ;;  %vm959_vm3 = vmand %vm4752_vm5, %vm8093_vm10  ;;  %8096 = vst [vmem:[#allocation38_spill] sm:$0xff] %v4798_v10  ;;  %vm8097_vm10 = vcmp.lt.s32.totalorder %v4663_v61, 8  ;;  %v4820_v41 = vsel %vm8099_vm8, 1.0, %v7869_v2  ;;  %vm8104_vm8 = vnez %v8038_v36 }
 0x10f   :  { %8092 = vst [vmem:[#allocation36_spill] sm:$0xff] %v8091_v4  ;;  %vm960_vm13 = vmand %vm4760_vm0, %vm8094_vm15  ;;  %v975_v62 = vsel %vm959_vm3, 1.0, %v7869_v2  ;;  %vm8098_vm15 = vcmp.lt.s32.totalorder %v4733_v25, 8  ;;  %v830_v12 = vsel %vm8104_vm8, 1.0, %v7869_v2  ;;  %v1613_v36 = vrot.slane %v1611_v28, 4 }
 0x110   :  { %vm962_vm2 = vmand %vm4600_vm7, %vm8097_vm10  ;;  %v976_v16 = vsel %vm960_vm13, 1.0, %v7869_v2  ;;  %v1616_v39 = vrot.slane %v1614_v34, 5  ;;  %vm8110_vm7 = vcmp.ge.s32.totalorder %v4616_v45, 0  ;;  %vm8121_vm10 = vcmp.lt.s32.totalorder %v4554_v20, 8 }
 0x111   :  { %vm963_vm3 = vmand %vm4767_vm6, %vm8098_vm15  ;;  %v978_v37 = vsel %vm962_vm2, 1.0, %v7869_v2  ;;  %v991_v0 = vpack.c.bf16 %v976_v16, %v975_v62  ;;  %vm8100_vm2 = vcmp.ge.s32.totalorder %v4552_v19, 0  ;;  %v844_v62 = vpack.c.bf16 %v829_v27, %v828_v17 }
 0x112   :  { %vm964_vm12 = vmand %vm4772_vm4, %vm7868_vm9  ;;  %v979_v1 = vsel %vm963_vm3, 1.0, %v7869_v2  ;;  %v992_v7 = vpack.c.bf16 %v978_v37, %v977_v6  ;;  %v4842_v6 = vor.u32 %v1608_v11, %v1605_v15  ;;  %vm8106_vm3 = vcmp.ge.s32.totalorder %v4562_v24, 0 }
 0x113   :  { %v980_v8 = vsel %vm964_vm12, 1.0, %v7869_v2  ;;  %vm4832_vm15 = vmand %vm8100_vm2, %vm1107_vm1  ;;  %vm8105_vm12 = vcmp.lt.s32.totalorder %v4562_v24, 8  ;;  %v8107_v37 = vmov 0  ;;  %v1001_v15 = vshrl.u32 %v991_v0, 16 }
 0x114   :  { %v8102_v57 = vsel %vm4832_vm15, 4294967295, %v8101_v57  ;;  %v993_v16 = vpack.c.bf16 %v980_v8, %v979_v1  ;;  %vm4848_vm1 = vmand %vm8106_vm3, %vm8105_vm12  ;;  %v1004_v11 = vshll.u32 %v991_v0, 16  ;;  %v1009_v17 = vshrl.u32 %v992_v7, 16 }
 0x115   :  { %8103 = vst [vmem:[#allocation39_spill] sm:$0xff] %v8102_v57  ;;  %v8108_v37 = vsel %vm4848_vm1, 4294967295, %v8107_v37  ;;  %vm4858_vm13 = vmand %vm4832_vm15, %vm8110_vm7  ;;  %vm8113_vm2 = vcmp.ge.s32.totalorder %v4630_v48, 0  ;;  %v845_v27 = vpack.c.bf16 %v831_v58, %v830_v12  ;;  %v1012_v28 = vshll.u32 %v992_v7, 16 }
 0x116   :  { %8109 = vst [vmem:[#allocation40_spill] sm:$0xff] %v8108_v37  ;;  %vm1140_vm8 = vmand %vm4848_vm1, %vm8113_vm2  ;;  %vm8114_vm9 = vcmp.lt.s32.totalorder %v4639_v52, 8  ;;  %v861_v1 = vrot.slane %v844_v62, 4  ;;  %v1018_v0 = vshrl.u32 %v993_v16, 16  ;;  %v1021_v2 = vshll.u32 %v993_v16, 16 }
 0x117   :  { %vm4872_vm7 = vmand %vm4832_vm15, %vm8114_vm9  ;;  %vm8117_vm3 = vcmp.lt.s32.totalorder %v4642_v53, 8  ;;  %v8120_v7 = vmov 0.0   ;;  %v4890_v43 = vor.u32 %v1616_v39, %v1613_v36  ;;  %vm8122_vm12 = vcmp.ge.s32.totalorder %v4554_v20, 0  ;;  %v4901_v62 = vld [vmem:[#allocation2] sm:$0xf0] }
 0x118   :  { %vm4882_vm2 = vmand %vm4848_vm1, %vm8117_vm3  ;;  %v1171_v52 = vsel %vm4858_vm13, 1.0, %v8120_v7  ;;  %v1172_v12 = vsel %vm1140_vm8, 1.0, %v8120_v7  ;;  %v8123_v53 = vmov 0  ;;  %v4906_v16 = vsel %vm4767_vm6, 1.0, %v8120_v7 }
 0x119   :  { %vm4897_vm0 = vmand %vm8122_vm12, %vm8121_vm10  ;;  %v4911_v36 = vsel %vm4772_vm4, 1.0, %v8120_v7  ;;  %v1003_v39 = vrot.slane %v1001_v15, 3  ;;  %v1006_v8 = vrot.slane %v1004_v11, 4  ;;  %v1011_v44 = vrot.slane %v1009_v17, 3 }
 0x11a   :  { %v8124_v53 = vsel %vm4897_vm0, 4294967295, %v8123_v53  ;;  %vm8126_vm10 = vcmp.lt.s32.totalorder %v4556_v21, 8  ;;  %vm8127_vm13 = vcmp.ge.s32.totalorder %v4556_v21, 0  ;;  %v4921_v31 = vrot.slane %v845_v27, 4 }
 0x11b   :  { %8125 = vst [vmem:[#allocation41_spill] sm:$0xff] %v8124_v53  ;;  %vm4917_vm8 = vmand %vm8127_vm13, %vm8126_vm10  ;;  %v1014_v14 = vrot.slane %v1012_v28, 4  ;;  %v1374_v5 = vsel %vm4872_vm7, 1.0, %v8120_v7  ;;  %v1375_v15 = vsel %vm4882_vm2, 1.0, %v8120_v7  ;;  %vm8131_vm12 = vcmp.lt.s32.totalorder %v4658_v59, 8 }
 0x11c   :  { %v8129_v29 = vsel %vm4917_vm8, 4294967295, %v8128_v29  ;;  %vm8132_vm3 = vcmp.ge.s32.totalorder %v4658_v59, 0  ;;  %v8133_v11 = vmov 0  ;;  %v4937_v17 = vpack.c.bf16 %v1172_v12, %v1171_v52 }
 0x11d   :  { %8130 = vst [vmem:[#allocation42_spill] sm:$0xff] %v8129_v29  ;;  %vm4933_vm9 = vmand %vm8132_vm3, %vm8131_vm12  ;;  %vm8136_vm10 = vnez %v8072_v18  ;;  %v1020_v28 = vrot.slane %v1018_v0, 3  ;;  %v1023_v34 = vrot.slane %v1021_v2, 4  ;;  %vm8137_vm7 = vcmp.lt.s32.totalorder %v4660_v60, 8 }
 0x11e   :  { %v8134_v11 = vsel %vm4933_vm9, 4294967295, %v8133_v11  ;;  %v4942_v27 = vsel %vm8136_vm10, 1.0, %v8120_v7  ;;  %vm8138_vm2 = vcmp.ge.s32.totalorder %v4660_v60, 0  ;;  %v8139_v58 = vmov 0 }
 0x11f   :  { %8135 = vst [vmem:[#allocation43_spill] sm:$0xff] %v8134_v11  ;;  %vm4948_vm13 = vmand %vm8138_vm2, %vm8137_vm7  ;;  %v4953_v63 = vmul.bf16 %v861_v1, %v4901_v62  ;;  %vm8142_vm12 = vsmask.f32 3328  ;;  %vm8143_vm4 = vcmp.ge.s32.totalorder %v4574_v32, 0  ;;  %v33_v18 = vadd.s32 48, %v4504_v13 }
 0x120   :  { %v8140_v58 = vsel %vm4948_vm13, 4294967295, %v8139_v58  ;;  %v4958_v52 = vsel %vm8142_vm12, %v4842_v6, %v4890_v43  ;;  %vm4966_vm7 = vmand %vm4897_vm0, %vm8143_vm4  ;;  %v1007_v0 = vor.u32 %v1006_v8, %v1003_v39  ;;  %v1390_v12 = vpack.c.bf16 %v1375_v15, %v1374_v5 }
 0x121   :  { %8141 = vst [vmem:[#allocation44_spill] sm:$0xff] %v8140_v58  ;;  %vm8146_vm12 = vcmp.ge.s32.totalorder %v4577_v33, 0  ;;  %v846_v35 = vpack.c.bf16 %v4911_v36, %v4906_v16  ;;  %v34_v32 = vadd.s32 56, %v4504_v13  ;;  %v1015_v24 = vor.u32 %v1014_v14, %v1011_v44 }
 0x122   :  { %vm1142_vm3 = vmand %vm4917_vm8, %vm8146_vm12  ;;  %vm8147_vm4 = vcmp.ge.s32.totalorder %v4795_v9, 0  ;;  %v1197_v5 = vshll.u32 %v4937_v17, 16  ;;  %vm8150_vm2 = vcmask 1043456   ;;  %v1936_v39 = vshrl.u32 %v4953_v63, 16 }
 0x123   :  { %vm4982_vm10 = vmand %vm4933_vm9, %vm8147_vm4  ;;  %v4989_v33 = vsel %vm8150_vm2, %v861_v1, %v4921_v31  ;;  %v4992_v16 = vor.u32 %v1023_v34, %v1020_v28  ;;  %vm8151_vm12 = vcmp.ge.s32.totalorder %v4798_v10, 0  ;;  %v1173_v44 = vsel %vm4966_vm7, 1.0, %v8120_v7 }
 0x124   :  { %vm4998_vm6 = vmand %vm4948_vm13, %vm8151_vm12  ;;  %v1938_v36 = vshll.u32 %v4953_v63, 16  ;;  %v5006_v1 = vand.u32 7, %v33_v18  ;;  %v1174_v8 = vsel %vm1142_vm3, 1.0, %v8120_v7  ;;  %vm8155_vm2 = vcmp.lt.s32.totalorder %v4627_v47, 8 }
 0x125   :  { %vm1360_vm4 = vmand %vm4897_vm0, %vm8155_vm2  ;;  %v5013_v15 = vand.u32 7, %v34_v32  ;;  %v65_v28 = vshra.s32 %v33_v18, 3  ;;  %v66_v34 = vshra.s32 %v34_v32, 3  ;;  %v1400_v21 = vshrl.u32 %v1390_v12, 16  ;;  %v1089_v32 = vld [vmem:[#allocation2] sm:$0x80] }
 0x126   :  { %8154 = vst [vmem:[#allocation45_spill] sm:$0xff] %v5006_v1  ;;  %v1200_v30 = vshrl.u32 %v4937_v17, 16  ;;  %vm8157_vm7 = vcmp.lt.s32.totalorder %v4663_v61, 8  ;;  %v1376_v63 = vsel %vm1360_vm4, 1.0, %v8120_v7  ;;  %v1080_v2 = vmul.bf16 %v1007_v0, %v4901_v62 }
 0x127   :  { %8156 = vst [vmem:[#allocation46_spill] sm:$0xff] %v5013_v15  ;;  %vm1361_vm12 = vmand %vm4917_vm8, %vm8157_vm7  ;;  %v1199_v47 = vrot.slane %v1197_v5, 1  ;;  %v5023_v22 = vand.u32 7, %v65_v28  ;;  %v5025_v20 = vand.u32 7, %v66_v34  ;;  %v1175_v17 = vsel %vm4982_vm10, 1.0, %v8120_v7 }
 0x128   :  { %v1377_v19 = vsel %vm1361_vm12, 1.0, %v8120_v7  ;;  %v1176_v61 = vsel %vm4998_vm6, 1.0, %v8120_v7  ;;  %v1188_v18 = vpack.c.bf16 %v1174_v8, %v1173_v44  ;;  %v5034_v4 = vadd.s32 1, %v5006_v1 }
 0x129   :  { %8158 = vst [vmem:[#allocation47_spill] sm:$0xff] %v5023_v22  ;;  %8159 = vst [vmem:[#allocation48_spill] sm:$0xff] %v5025_v20  ;;  %v1391_v62 = vpack.c.bf16 %v1377_v19, %v1376_v63  ;;  %v511_v5 = vadd.s32 4294967295, %v5023_v22  ;;  %v512_v28 = vadd.s32 4294967295, %v5025_v20  ;;  %v5039_v34 = vadd.s32 1, %v5013_v15 }
 0x12a   :  { %v5041_v3 = vrot.slane %v1400_v21, 7  ;;  %v1403_v23 = vshll.u32 %v1390_v12, 16  ;;  %v1940_v42 = vrot.slane %v1938_v36, 1  ;;  %v5043_v29 = vrot.slane %v846_v35, 4 }
 0x12b   :  { %v1268_v14 = vmul.bf16 %v1199_v47, %v1089_v32  ;;  %vm543_vm6 = vcmp.ge.s32.totalorder %v511_v5, 0  ;;  %vm544_vm3 = vcmp.ge.s32.totalorder %v512_v28, 0  ;;  %vm559_vm10 = vcmp.lt.s32.totalorder %v511_v5, 8 }
 0x12c   :  { %v5045_v44 = vpack.c.bf16 %v1176_v61, %v1175_v17  ;;  %v1204_v19 = vshll.u32 %v1188_v18, 16  ;;  %vm560_vm2 = vcmp.lt.s32.totalorder %v512_v28, 8  ;;  %vm5047_vm4 = vmand %vm543_vm6, %vm559_vm10  ;;  %v8160_v8 = vmov 0 }
 0x12d   :  { %v8161_v8 = vsel %vm5047_vm4, 4294967295, %v8160_v8  ;;  %vm7896_vm7 = vcmp.lt.s32.totalorder %v5034_v4, 8  ;;  %vm8163_vm12 = vsmask.f32 4352  ;;  %v1407_v12 = vshrl.u32 %v1391_v62, 16  ;;  %vm5055_vm8 = vmand %vm544_vm3, %vm560_vm2 }
 0x12e   :  { %8162 = vst [vmem:[#allocation49_spill] sm:$0xff] %v8161_v8  ;;  %v5053_v21 = vsel %vm8163_vm12, %v1007_v0, %v1015_v24  ;;  %v8164_v35 = vmov 0  ;;  %vm7897_vm0 = vcmp.lt.s32.totalorder %v5039_v34, 8  ;;  %v5062_v36 = vpack.c.bf16 %v4942_v27, %v4820_v41  ;;  %vm8167_vm6 = vmmov %vm8163_vm12 }
 0x12f   :  { %v8165_v35 = vsel %vm5055_vm8, 4294967295, %v8164_v35  ;;  %v5066_v63 = vsel %vm8167_vm6, %v1015_v24, %v4992_v16  ;;  %v5068_v17 = vor.u32 %v1940_v42, %v1936_v39  ;;  %v5070_v61 = vrot.slane %v1080_v2, 1  ;;  %vm5086_vm2 = vmand %vm5047_vm4, %vm7896_vm7 }
 0x130   :  { %8166 = vst [vmem:[#allocation50_spill] sm:$0xff] %v8165_v35  ;;  %vm8170_vm3 = vcmask 1043456   ;;  %v5078_v32 = vor.u32 %v1403_v23, %v5041_v3  ;;  %v1202_v5 = vor.u32 %v1200_v30, %v1199_v47  ;;  %v5080_v41 = vrot.slane %v1268_v14, 4 }
 0x131   :  { %8168 = vst [vmem:[#allocation51_spill] sm:$0xff] %v5068_v17  ;;  %8169 = vst [vmem:[#allocation52_spill] sm:$0xff] %v5070_v61  ;;  %v5075_v0 = vsel %vm8170_vm3, %v4921_v31, %v5043_v29  ;;  %vm8174_vm12 = vnez %v8050_v51  ;;  %v1206_v42 = vrot.slane %v1204_v19, 1  ;;  %v1208_v27 = vshrl.u32 %v1188_v18, 16 }
 0x132   :  { %8171 = vst [vmem:[#allocation53_spill] sm:$0xff] %v5080_v41  ;;  %v1724_v31 = vsel %vm8174_vm12, 1.0, %v8120_v7  ;;  %v1212_v39 = vshll.u32 %v5045_v44, 16  ;;  %vm966_vm3 = vmand %vm5055_vm8, %vm7897_vm0  ;;  %v5099_v30 = vadd.s32 4294967295, %v5006_v1  ;;  %v5101_v2 = vrot.slane %v1407_v12, 7 }
 0x133   :  { %v1410_v47 = vshll.u32 %v1391_v62, 16  ;;  %vm8176_vm7 = vnez %v8052_v54  ;;  %v5107_v18 = vadd.s32 4294967295, %v5013_v15  ;;  %v1726_v28 = vsel %vm4650_vm11, 1.0, %v8120_v7 }
 0x134   :  { %8175 = vst [vmem:[#allocation54_spill] sm:$0xff] %v5099_v30  ;;  %v1725_v51 = vsel %vm8176_vm7, 1.0, %v8120_v7  ;;  %vm1097_vm12 = vcmp.ge.s32.totalorder %v5023_v22, 0  ;;  %vm1098_vm0 = vcmp.ge.s32.totalorder %v5025_v20, 0  ;;  %vm1113_vm6 = vcmp.lt.s32.totalorder %v5023_v22, 8 }
 0x135   :  { %8177 = vst [vmem:[#allocation55_spill] sm:$0xff] %v5107_v18  ;;  %v981_v62 = vsel %vm5086_vm2, 1.0, %v8120_v7  ;;  %v982_v54 = vsel %vm966_vm3, 1.0, %v8120_v7  ;;  %v1727_v23 = vsel %vm4654_vm14, 1.0, %v8120_v7  ;;  %vm1114_vm7 = vcmp.lt.s32.totalorder %v5025_v20, 8  ;;  %vm5124_vm10 = vmand %vm1097_vm12, %vm1113_vm6 }
 0x136   :  { %vm7906_vm11 = vcmp.ge.s32.totalorder %v5099_v30, 0  ;;  %v8179_v55 = vsel %vm5124_vm10, 4294967295, %v8178_v55  ;;  %v1486_v14 = vadd.s32 1, %v4658_v59  ;;  %v1487_v19 = vadd.s32 1, %v4660_v60  ;;  %vm5134_vm14 = vmand %vm1098_vm0, %vm1114_vm7 }
 0x137   :  { %8180 = vst [vmem:[#allocation56_spill] sm:$0xff] %v8179_v55  ;;  %v1488_v12 = vadd.s32 1, %v5023_v22  ;;  %v1210_v24 = vor.u32 %v1208_v27, %v1206_v42  ;;  %v5131_v15 = vrot.slane %v1212_v39, 1  ;;  %vm7915_vm2 = vcmp.ge.s32.totalorder %v5107_v18, 0  ;;  %vm5154_vm0 = vmand %vm5124_vm10, %vm7906_vm11 }
 0x138   :  { %v8182_v56 = vsel %vm5134_vm14, 4294967295, %v8181_v56  ;;  %v1489_v1 = vadd.s32 1, %v5025_v20  ;;  %v1412_v53 = vor.u32 %v1410_v47, %v5101_v2  ;;  %v1740_v49 = vpack.c.bf16 %v1725_v51, %v1724_v31 }
 0x139   :  { %8183 = vst [vmem:[#allocation57_spill] sm:$0xff] %v8182_v56  ;;  %v35_v59 = vadd.s32 64, %v4504_v13  ;;  %vm8184_vm3 = vcmp.lt.s32.totalorder %v4733_v25, 8  ;;  %v994_v39 = vpack.c.bf16 %v982_v54, %v981_v62  ;;  %v1741_v60 = vpack.c.bf16 %v1727_v23, %v1726_v28 }
 0x13a   :  { %vm5145_vm12 = vmand %vm4933_vm9, %vm8184_vm3  ;;  %v1847_v22 = vshrl.u32 %v5062_v36, 16  ;;  %vm8189_vm6 = vcmp.lt.s32.totalorder %v4736_v26, 8  ;;  %v8190_v47 = vmov 0  ;;  %vm1518_vm5 = vcmp.lt.s32.totalorder %v1486_v14, 8 }
 0x13b   :  { %vm5162_vm3 = vmand %vm4948_vm13, %vm8189_vm6  ;;  %vm1519_vm1 = vcmp.lt.s32.totalorder %v1487_v19, 8  ;;  %vm1520_vm7 = vcmp.lt.s32.totalorder %v1488_v12, 8  ;;  %v1850_v28 = vshll.u32 %v5062_v36, 16  ;;  %vm1505_vm15 = vcmp.ge.s32.totalorder %v1489_v1, 0 }
 0x13c   :  { %v8191_v47 = vsel %vm5162_vm3, 4294967295, %v8190_v47  ;;  %vm5170_vm9 = vmand %vm5134_vm14, %vm7915_vm2  ;;  %vm1521_vm8 = vcmp.lt.s32.totalorder %v1489_v1, 8  ;;  %vm8194_vm6 = vcmp.ge.s32.totalorder %v1486_v14, 0  ;;  %v36_v54 = vadd.s32 72, %v4504_v13 }
 0x13d   :  { %vm5176_vm13 = vmand %vm8194_vm6, %vm1518_vm5  ;;  %vm8197_vm4 = vsmask.f32 7424  ;;  %v5188_v58 = vrot.slane %v1740_v49, 4  ;;  %vm8200_vm11 = vcmp.ge.s32.totalorder %v1487_v19, 0  ;;  %v67_v14 = vshra.s32 %v35_v59, 3 }
 0x13e   :  { %v5182_v23 = vsel %vm8197_vm4, %v1202_v5, %v1206_v42  ;;  %vm8198_vm2 = vmmov %vm8197_vm4  ;;  %vm8203_vm5 = vsmask.f32 256  ;;  %v1027_v48 = vshrl.u32 %v994_v39, 16  ;;  %v1030_v38 = vshll.u32 %v994_v39, 16 }
 0x13f   :  { %v5186_v20 = vsel %vm8198_vm2, %v1210_v24, %v5131_v15  ;;  %8199 = vst [vmem:[#allocation58_spill] sm:$0xff] %v5188_v58  ;;  %vm5191_vm3 = vmand %vm8200_vm11, %vm1519_vm1  ;;  %v5197_v11 = vsel %vm8203_vm5, %v5041_v3, %v1412_v53  ;;  %vm8204_vm4 = vcmp.ge.s32.totalorder %v1488_v12, 0  ;;  %v68_v42 = vshra.s32 %v36_v54, 3 }
 0x140   :  { %vm5200_vm6 = vmand %vm8204_vm4, %vm1520_vm7  ;;  %v5204_v49 = vrot.slane %v1741_v60, 4  ;;  %v5211_v24 = vand.u32 7, %v35_v59  ;;  %v5213_v45 = vand.u32 7, %v36_v54  ;;  %v5215_v3 = vand.u32 7, %v67_v14 }
 0x141   :  { %vm5207_vm1 = vmand %vm1505_vm15, %vm1521_vm8  ;;  %v5217_v53 = vrot.slane %v1847_v22, 3  ;;  %v5219_v12 = vrot.slane %v1850_v28, 4  ;;  %vm8212_vm11 = vcmp.ge.s32.totalorder %v4795_v9, 0  ;;  %v5226_v60 = vand.u32 7, %v68_v42 }
 0x142   :  { %8209 = vst [vmem:[#allocation59_spill] sm:$0xff] %v5211_v24  ;;  %8210 = vst [vmem:[#allocation60_spill] sm:$0xff] %v5213_v45  ;;  %vm8214_vm8 = vcmp.lt.s32.totalorder %v5034_v4, 8  ;;  %vm8217_vm7 = vcmp.lt.s32.totalorder %v5039_v34, 8  ;;  %v1177_v1 = vsel %vm5154_vm0, 1.0, %v8120_v7  ;;  %v1178_v28 = vsel %vm5170_vm9, 1.0, %v8120_v7 }
 0x143   :  { %8211 = vst [vmem:[#allocation61_spill] sm:$0xff] %v5215_v3  ;;  %vm1550_vm15 = vmand %vm5176_vm13, %vm8212_vm11  ;;  %vm8220_vm4 = vcmp.ge.s32.totalorder %v4798_v10, 0  ;;  %v513_v14 = vadd.s32 4294967295, %v5215_v3  ;;  %v5256_v42 = vrot.slane %v1027_v48, 3  ;;  %v5258_v39 = vrot.slane %v1030_v38, 4 }
 0x144   :  { %8213 = vst [vmem:[#allocation62_spill] sm:$0xff] %v5226_v60  ;;  %vm5232_vm2 = vmand %vm5124_vm10, %vm8214_vm8  ;;  %v1582_v54 = vsel %vm1550_vm15, 1.0, %v8120_v7  ;;  %vm8221_vm8 = vcmp.ge.s32.totalorder %v5099_v30, 0  ;;  %v514_v51 = vadd.s32 4294967295, %v5226_v60  ;;  %vm8222_vm9 = vcmp.ge.s32.totalorder %v5107_v18, 0 }
 0x145   :  { %vm5240_vm5 = vmand %vm5134_vm14, %vm8217_vm7  ;;  %v5272_v38 = vadd.s32 1, %v5211_v24  ;;  %v5275_v30 = vadd.s32 1, %v5213_v45  ;;  %v5277_v56 = vpack.c.bf16 %v1178_v28, %v1177_v1  ;;  %vm8223_vm7 = vcmp.lt.s32.totalorder %v4733_v25, 8 }
 0x146   :  { %vm1551_vm11 = vmand %vm5191_vm3, %vm8220_vm4  ;;  %v5285_v18 = vadd.s32 4294967295, %v5211_v24  ;;  %vm562_vm10 = vcmp.lt.s32.totalorder %v514_v51, 8  ;;  %v8233_v24 = vmov 0  ;;  %v8236_v55 = vmov 0 }
 0x147   :  { %vm1552_vm0 = vmand %vm5200_vm6, %vm8221_vm8  ;;  %v1583_v31 = vsel %vm1551_vm11, 1.0, %v8120_v7  ;;  %vm8224_vm11 = vcmp.lt.s32.totalorder %v4736_v26, 8  ;;  %v8239_v22 = vmov 0  ;;  %v5389_v36 = vor.u32 %v5258_v39, %v5256_v42 }
 0x148   :  { %vm1553_vm15 = vmand %vm5207_vm1, %vm8222_vm9  ;;  %v1584_v10 = vsel %vm1552_vm0, 1.0, %v8120_v7  ;;  %v1596_v48 = vpack.c.bf16 %v1583_v31, %v1582_v54  ;;  %v1378_v54 = vsel %vm5145_vm12, 1.0, %v8120_v7  ;;  %vm561_vm9 = vcmp.lt.s32.totalorder %v513_v14, 8 }
 0x149   :  { %v1585_v9 = vsel %vm1553_vm15, 1.0, %v8120_v7  ;;  %vm1810_vm4 = vmand %vm5176_vm13, %vm8223_vm7  ;;  %vm8225_vm15 = vnez %v8191_v47  ;;  %vm8226_vm7 = vcmp.lt.s32.totalorder %v5034_v4, 8  ;;  %vm546_vm12 = vcmp.ge.s32.totalorder %v514_v51, 0 }
 0x14a   :  { %vm1811_vm8 = vmand %vm5191_vm3, %vm8224_vm11  ;;  %v1826_v1 = vsel %vm1810_vm4, 1.0, %v8120_v7  ;;  %v1379_v25 = vsel %vm8225_vm15, 1.0, %v8120_v7  ;;  %v1597_v28 = vpack.c.bf16 %v1585_v9, %v1584_v10  ;;  %v1620_v26 = vshrl.u32 %v1596_v48, 16 }
 0x14b   :  { %vm1812_vm14 = vmand %vm5200_vm6, %vm8226_vm7  ;;  %v1827_v27 = vsel %vm1811_vm8, 1.0, %v8120_v7  ;;  %vm8227_vm11 = vcmp.lt.s32.totalorder %v5039_v34, 8  ;;  %vm7940_vm0 = vcmp.lt.s32.totalorder %v5272_v38, 8  ;;  %v5310_v9 = vadd.s32 4294967295, %v5213_v45 }
 0x14c   :  { %vm1813_vm4 = vmand %vm5207_vm1, %vm8227_vm11  ;;  %v1623_v4 = vshll.u32 %v1596_v48, 16  ;;  %v1828_v10 = vsel %vm1812_vm14, 1.0, %v8120_v7  ;;  %v5314_v31 = vpack.c.bf16 %v1827_v27, %v1826_v1  ;;  %vm8229_vm8 = vcmp.ge.s32.totalorder %v513_v14, 0  ;;  %v4348_v14 = vld [vmem:[%s7848_s2 + $0xa0] sm:$0xff]  }
 0x14d   :  { %v1829_v47 = vsel %vm1813_vm4, 1.0, %v8120_v7  ;;  %vm5318_vm7 = vmand %vm8229_vm8, %vm561_vm9  ;;  %v8230_v34 = vmov 0  ;;  %vm1099_vm15 = vcmp.ge.s32.totalorder %v5215_v3, 0  ;;  %vm1100_vm14 = vcmp.ge.s32.totalorder %v5226_v60, 0  ;;  %4276 = vmatprep.subr.bf16.mxu1 %v4348_v14 }
 0x14e   :  { %8228 = vst [vmem:[#allocation63_spill] sm:$0xff] %v5314_v31  ;;  %v8231_v34 = vsel %vm5318_vm7, 4294967295, %v8230_v34  ;;  %v5322_v51 = vpack.c.bf16 %v1829_v47, %v1828_v10  ;;  %vm5324_vm11 = vmand %vm546_vm12, %vm562_vm10  ;;  %vm1115_vm4 = vcmp.lt.s32.totalorder %v5215_v3, 8  ;;  %v1629_v48 = vshrl.u32 %v1597_v28, 16  ;;  %4278 = vmatpush3.bf16.msra.mxu1 %v4348_v14  ;;  %v4349_v14 = vld [vmem:[%s7848_s2 + $0xa8] sm:$0xff]  }
 0x14f   :  { %v8234_v24 = vsel %vm5324_vm11, 4294967295, %v8233_v24  ;;  %v1632_v1 = vshll.u32 %v1597_v28, 16  ;;  %vm967_vm10 = vmand %vm5318_vm7, %vm7940_vm0  ;;  %vm1116_vm9 = vcmp.lt.s32.totalorder %v5226_v60, 8  ;;  %v1392_v27 = vpack.c.bf16 %v1379_v25, %v1378_v54  ;;  %4277 = vmatprep.subr.bf16.mxu1 %v4349_v14 }
 0x150   :  { %8232 = vst [vmem:[#allocation64_spill] sm:$0xff] %v5322_v51  ;;  %v1220_v10 = vshll.u32 %v5277_v56, 16  ;;  %vm8235_vm12 = vcmp.lt.s32.totalorder %v5275_v30, 8  ;;  %v983_v47 = vsel %vm967_vm10, 1.0, %v8120_v7  ;;  %v1380_v28 = vsel %vm5232_vm2, 1.0, %v8120_v7 }
 0x151   :  { %vm968_vm8 = vmand %vm5324_vm11, %vm8235_vm12  ;;  %v1381_v45 = vsel %vm5240_vm5, 1.0, %v8120_v7  ;;  %v1622_v31 = vrot.slane %v1620_v26, 4  ;;  %v1625_v54 = vrot.slane %v1623_v4, 5  ;;  %v1415_v51 = vshrl.u32 %v1392_v27, 16 }
 0x152   :  { %v984_v25 = vsel %vm968_vm8, 1.0, %v8120_v7  ;;  %vm5356_vm12 = vmand %vm1099_vm15, %vm1115_vm4  ;;  %vm7942_vm2 = vcmp.ge.s32.totalorder %v5285_v18, 0  ;;  %v1728_v26 = vsel %vm5176_vm13, 1.0, %v8120_v7  ;;  %v1729_v4 = vsel %vm5191_vm3, 1.0, %v8120_v7  ;;  %4279 = vmatpush3.bf16.msra.mxu1 %v4349_v14 }
 0x153   :  { %v8237_v55 = vsel %vm5356_vm12, 4294967295, %v8236_v55  ;;  %v995_v59 = vpack.c.bf16 %v984_v25, %v983_v47  ;;  %vm5365_vm5 = vmand %vm1100_vm14, %vm1116_vm9  ;;  %v1631_v47 = vrot.slane %v1629_v48, 4  ;;  %v1634_v25 = vrot.slane %v1632_v1, 5  ;;  %4210 = vmatprep.subr.bf16.mxu1 %v8120_v7 }
 0x154   :  { %8238 = vst [vmem:[#allocation65_spill] sm:$0xff] %v8237_v55  ;;  %v8240_v22 = vsel %vm5365_vm5, 4294967295, %v8239_v22  ;;  %vm7941_vm15 = vcmp.ge.s32.totalorder %v5310_v9, 0  ;;  %vm5383_vm14 = vmand %vm5356_vm12, %vm7942_vm2  ;;  %v1393_v62 = vpack.c.bf16 %v1381_v45, %v1380_v28  ;;  %v8244_v57 = vshrl.u32 %v5045_v44, 16 }
 0x155   :  { %8241 = vst [vmem:[#allocation66_spill] sm:$0xff] %v8240_v22  ;;  %v1222_v1 = vrot.slane %v1220_v10, 1  ;;  %vm1148_vm13 = vmand %vm5365_vm5, %vm7941_vm15  ;;  %v1224_v46 = vshrl.u32 %v5277_v56, 16  ;;  %v1626_v40 = vor.u32 %v1625_v54, %v1622_v31  ;;  %v1417_v41 = vrot.slane %v1415_v51, 7 }
 0x156   :  { %v1218_v48 = vor.u32 %v8244_v57, %v5131_v15  ;;  %v1418_v45 = vshll.u32 %v1392_v27, 16  ;;  %v1742_v28 = vpack.c.bf16 %v1729_v4, %v1728_v26  ;;  %vm8245_vm3 = vcmask 1043456  }
 0x157   :  { %v5402_v39 = vsel %vm8245_vm3, %v5188_v58, %v5204_v49  ;;  %v5406_v57 = vor.u32 %v5219_v12, %v5217_v53  ;;  %v1036_v15 = vshrl.u32 %v995_v59, 16  ;;  %v1039_v44 = vshll.u32 %v995_v59, 16 }
 0x158   :  { %8246 = vst [vmem:[#allocation67_spill] sm:$0xff] %v5402_v39  ;;  %v5409_v56 = vor.u32 %v1634_v25, %v1631_v47  ;;  %v1179_v42 = vsel %vm5383_vm14, 1.0, %v8120_v7  ;;  %v1180_v31 = vsel %vm1148_vm13, 1.0, %v8120_v7  ;;  %v1423_v51 = vshrl.u32 %v1393_v62, 16 }
 0x159   :  { %8247 = vst [vmem:[#allocation68_spill] sm:$0xff] %v5406_v57  ;;  %vm8248_vm4 = vsmask.f32 4352  ;;  %vm8250_vm10 = vsmask.f32 7424  ;;  %vm8252_vm9 = vnez %v8161_v8  ;;  %vm8253_vm8 = vnez %v8165_v35 }
 0x15a   :  { %v5418_v27 = vsel %vm8248_vm4, %v4992_v16, %v5389_v36  ;;  %v5421_v53 = vsel %vm8250_vm10, %v1218_v48, %v1222_v1  ;;  %v834_v12 = vsel %vm8252_vm9, 1.0, %v8120_v7  ;;  %v835_v37 = vsel %vm8253_vm8, 1.0, %v8120_v7  ;;  %vm5483_vm10 = vmand %vm5356_vm12, %vm7940_vm0 }
 0x15b   :  { %8249 = vst [vmem:[#allocation69_spill] sm:$0xff] %v5418_v27  ;;  %8251 = vst [vmem:[#allocation70_spill] sm:$0xff] %v5421_v53  ;;  %vm8254_vm14 = vsmask.f32 3328  ;;  %v1226_v54 = vor.u32 %v1224_v46, %v1222_v1  ;;  %v1420_v59 = vor.u32 %v1418_v45, %v1417_v41  ;;  %v5433_v26 = vrot.slane %v1742_v28, 4 }
 0x15c   :  { %v5431_v10 = vsel %vm8254_vm14, %v4890_v43, %v1626_v40  ;;  %v1038_v16 = vrot.slane %v1036_v15, 3  ;;  %v1041_v4 = vrot.slane %v1039_v44, 4  ;;  %v5435_v14 = vpack.c.bf16 %v1180_v31, %v1179_v42  ;;  %vm8256_vm13 = vmmov %vm8254_vm14 }
 0x15d   :  { %8255 = vst [vmem:[#allocation71_spill] sm:$0xff] %v5431_v10  ;;  %v37_v47 = vadd.s32 80, %v4504_v13  ;;  %v5440_v25 = vsel %vm8256_vm13, %v1626_v40, %v5409_v56  ;;  %v5442_v48 = vrot.slane %v1423_v51, 7  ;;  %v1426_v35 = vshll.u32 %v1393_v62, 16 }
 0x15e   :  { %8257 = vst [vmem:[#allocation72_spill] sm:$0xff] %v5440_v25  ;;  %v847_v8 = vpack.c.bf16 %v835_v37, %v834_v12  ;;  %v1730_v43 = vsel %vm5200_vm6, 1.0, %v8120_v7  ;;  %v1731_v46 = vsel %vm5207_vm1, 1.0, %v8120_v7  ;;  %v38_v1 = vadd.s32 88, %v4504_v13 }
 0x15f   :  { %v69_v45 = vshra.s32 %v37_v47, 3  ;;  %vm8258_vm3 = vsmask.f32 256  ;;  %vm8260_vm4 = vcmask 1043456   ;;  %v1490_v62 = vadd.s32 1, %v5215_v3 }
 0x160   :  { %v5453_v28 = vsel %vm8258_vm3, %v5101_v2, %v1420_v59  ;;  %v5458_v40 = vsel %vm8260_vm4, %v5204_v49, %v5433_v26  ;;  %v1491_v5 = vadd.s32 1, %v5226_v60  ;;  %v5462_v15 = vor.u32 %v1041_v4, %v1038_v16 }
 0x161   :  { %8259 = vst [vmem:[#allocation73_spill] sm:$0xff] %v5453_v28  ;;  %8261 = vst [vmem:[#allocation74_spill] sm:$0xff] %v5458_v40  ;;  %v1228_v19 = vshll.u32 %v5435_v14, 16  ;;  %v70_v44 = vshra.s32 %v38_v1, 3  ;;  %v5465_v42 = vand.u32 7, %v69_v45  ;;  %v1428_v31 = vor.u32 %v1426_v35, %v5442_v48 }
 0x162   :  { %v5468_v2 = vrot.slane %v847_v8, 4  ;;  %v1743_v51 = vpack.c.bf16 %v1731_v46, %v1730_v43  ;;  %vm1506_vm6 = vcmp.ge.s32.totalorder %v1490_v62, 0  ;;  %v5473_v49 = vsel %vm5318_vm7, 1.0, %v8120_v7 }
 0x163   :  { %8262 = vst [vmem:[#allocation75_spill] sm:$0xff] %v5465_v42  ;;  %v5475_v12 = vand.u32 7, %v37_v47  ;;  %v5477_v37 = vand.u32 7, %v70_v44  ;;  %vm1507_vm1 = vcmp.ge.s32.totalorder %v1491_v5, 0  ;;  %v5487_v8 = vand.u32 7, %v38_v1 }
 0x164   :  { %v1492_v59 = vadd.s32 1, %v5465_v42  ;;  %vm1522_vm14 = vcmp.lt.s32.totalorder %v1490_v62, 8  ;;  %vm1523_vm13 = vcmp.lt.s32.totalorder %v1491_v5, 8  ;;  %vm8268_vm3 = vcmp.lt.s32.totalorder %v5275_v30, 8 }
 0x165   :  { %8263 = vst [vmem:[#allocation76_spill] sm:$0xff] %v5475_v12  ;;  %8264 = vst [vmem:[#allocation77_spill] sm:$0xff] %v5477_v37  ;;  %vm8271_vm0 = vsmask.f32 4352  ;;  %v5503_v47 = vrot.slane %v1228_v19, 1  ;;  %v837_v43 = vsel %vm5324_vm11, 1.0, %v8120_v7 }
 0x166   :  { %8267 = vst [vmem:[#allocation78_spill] sm:$0xff] %v5487_v8  ;;  %vm5494_vm4 = vmand %vm5365_vm5, %vm8268_vm3  ;;  %v5501_v4 = vsel %vm8271_vm0, %v5389_v36, %v5462_v15  ;;  %v1493_v46 = vadd.s32 1, %v5477_v37  ;;  %vm8275_vm3 = vsmask.f32 256  ;;  %v5518_v44 = vadd.s32 4294967295, %v5475_v12 }
 0x167   :  { %8272 = vst [vmem:[#allocation79_spill] sm:$0xff] %v5501_v4  ;;  %vm5510_vm15 = vmand %vm1506_vm6, %vm1522_vm14  ;;  %v5515_v45 = vsel %vm8275_vm3, %v1417_v41, %v1428_v31  ;;  %vm1508_vm0 = vcmp.ge.s32.totalorder %v1492_v59, 0  ;;  %vm1524_vm2 = vcmp.lt.s32.totalorder %v1492_v59, 8  ;;  %v5525_v19 = vrot.slane %v1743_v51, 4 }
 0x168   :  { %8276 = vst [vmem:[#allocation80_spill] sm:$0xff] %v5515_v45  ;;  %vm5521_vm5 = vmand %vm1507_vm1, %vm1523_vm13  ;;  %v5528_v62 = vadd.s32 4294967295, %v5487_v8  ;;  %vm1509_vm6 = vcmp.ge.s32.totalorder %v1493_v46, 0  ;;  %vm1525_vm14 = vcmp.lt.s32.totalorder %v1493_v46, 8  ;;  %v8280_v41 = vmov 0 }
 0x169   :  { %vm5530_vm12 = vmand %vm1508_vm0, %vm1524_vm2  ;;  %vm8282_vm3 = vcmask 1043456   ;;  %v848_v5 = vpack.c.bf16 %v837_v43, %v5473_v49  ;;  %v5541_v59 = vadd.s32 1, %v5475_v12  ;;  %v5544_v51 = vadd.s32 1, %v5487_v8 }
 0x16a   :  { %8279 = vst [vmem:[#allocation81_spill] sm:$0xff] %v5528_v62  ;;  %v8281_v41 = vsel %vm5530_vm12, 4294967295, %v8280_v41  ;;  %v5537_v31 = vsel %vm8282_vm3, %v5043_v29, %v5468_v2  ;;  %vm5546_vm1 = vmand %vm1509_vm6, %vm1525_vm14  ;;  %v8284_v60 = vmov 0  ;;  %vm8286_vm2 = vsmask.f32 7424 }
 0x16b   :  { %8283 = vst [vmem:[#allocation82_spill] sm:$0xff] %v5537_v31  ;;  %v8285_v60 = vsel %vm5546_vm1, 4294967295, %v8284_v60  ;;  %v5552_v46 = vsel %vm8286_vm2, %v1226_v54, %v5503_v47  ;;  %vm8288_vm13 = vcmp.ge.s32.totalorder %v5285_v18, 0  ;;  %v515_v29 = vadd.s32 4294967295, %v5465_v42 }
 0x16c   :  { %8287 = vst [vmem:[#allocation83_spill] sm:$0xff] %v5552_v46  ;;  %vm1554_vm0 = vmand %vm5510_vm15, %vm8288_vm13  ;;  %v1382_v49 = vsel %vm5483_vm10, 1.0, %v8120_v7  ;;  %v1383_v43 = vsel %vm5494_vm4, 1.0, %v8120_v7  ;;  %vm7951_vm6 = vcmp.ge.s32.totalorder %v5518_v44, 0  ;;  %vm8289_vm14 = vcmp.ge.s32.totalorder %v5310_v9, 0 }
 0x16d   :  { %vm1555_vm3 = vmand %vm5521_vm5, %vm8289_vm14  ;;  %v1586_v54 = vsel %vm1554_vm0, 1.0, %v8120_v7  ;;  %v516_v8 = vadd.s32 4294967295, %v5477_v37  ;;  %v39_v3 = vadd.s32 96, %v4504_v13  ;;  %vm8290_vm10 = vcmask 1043456  }
 0x16e   :  { %v5576_v35 = vsel %vm8290_vm10, %v5433_v26, %v5525_v19  ;;  %vm7952_vm4 = vcmp.ge.s32.totalorder %v5528_v62, 0  ;;  %vm1556_vm2 = vmand %vm5530_vm12, %vm7951_vm6  ;;  %v1587_v16 = vsel %vm1555_vm3, 1.0, %v8120_v7  ;;  %v40_v12 = vadd.s32 104, %v4504_v13 }
 0x16f   :  { %8291 = vst [vmem:[#allocation84_spill] sm:$0xff] %v5576_v35  ;;  %vm1557_vm14 = vmand %vm5546_vm1, %vm7952_vm4  ;;  %v1588_v26 = vsel %vm1556_vm2, 1.0, %v8120_v7  ;;  %v5592_v22 = vpack.c.bf16 %v1383_v43, %v1382_v49  ;;  %v1598_v35 = vpack.c.bf16 %v1587_v16, %v1586_v54  ;;  %vm8292_vm3 = vcmp.lt.s32.totalorder %v5272_v38, 8 }
 0x170   :  { %v1589_v55 = vsel %vm1557_vm14, 1.0, %v8120_v7  ;;  %vm1814_vm10 = vmand %vm5510_vm15, %vm8292_vm3  ;;  %vm547_vm6 = vcmp.ge.s32.totalorder %v515_v29, 0  ;;  %v71_v45 = vshra.s32 %v39_v3, 3  ;;  %vm8293_vm0 = vcmp.lt.s32.totalorder %v5275_v30, 8 }
 0x171   :  { %v1599_v31 = vpack.c.bf16 %v1589_v55, %v1588_v26  ;;  %vm1815_vm4 = vmand %vm5521_vm5, %vm8293_vm0  ;;  %v1830_v10 = vsel %vm1814_vm10, 1.0, %v8120_v7  ;;  %vm548_vm2 = vcmp.ge.s32.totalorder %v516_v8, 0  ;;  %vm563_vm13 = vcmp.lt.s32.totalorder %v515_v29, 8 }
 0x172   :  { %vm8294_vm14 = vcmp.lt.s32.totalorder %v5541_v59, 8  ;;  %v1831_v49 = vsel %vm1815_vm4, 1.0, %v8120_v7  ;;  %vm564_vm3 = vcmp.lt.s32.totalorder %v516_v8, 8  ;;  %v72_v55 = vshra.s32 %v40_v12, 3  ;;  %vm5633_vm4 = vmand %vm547_vm6, %vm563_vm13 }
 0x173   :  { %vm5608_vm8 = vmand %vm5530_vm12, %vm8294_vm14  ;;  %v5613_v30 = vand.u32 7, %v71_v45  ;;  %v5615_v43 = vrot.slane %v848_v5, 4  ;;  %vm8298_vm0 = vcmp.lt.s32.totalorder %v5544_v51, 8  ;;  %v1431_v16 = vshrl.u32 %v5592_v22, 16 }
 0x174   :  { %vm5621_vm10 = vmand %vm5546_vm1, %vm8298_vm0  ;;  %v5626_v26 = vand.u32 7, %v39_v3  ;;  %v5628_v25 = vand.u32 7, %v40_v12  ;;  %v1638_v28 = vshrl.u32 %v1598_v35, 16  ;;  %v1641_v40 = vshll.u32 %v1598_v35, 16 }
 0x175   :  { %8297 = vst [vmem:[#allocation85_spill] sm:$0xff] %v5613_v30  ;;  %v5630_v45 = vpack.c.bf16 %v1831_v49, %v1830_v10  ;;  %vm1101_vm14 = vcmp.ge.s32.totalorder %v5465_v42, 0  ;;  %v1647_v46 = vshrl.u32 %v1599_v31, 16  ;;  %vm5639_vm0 = vmand %vm548_vm2, %vm564_vm3  ;;  %v8306_v4 = vmov 0 }
 0x176   :  { %8301 = vst [vmem:[#allocation86_spill] sm:$0xff] %v5626_v26  ;;  %8302 = vst [vmem:[#allocation87_spill] sm:$0xff] %v5628_v25  ;;  %v8307_v4 = vsel %vm5639_vm0, 4294967295, %v8306_v4  ;;  %vm1102_vm9 = vcmp.ge.s32.totalorder %v5477_v37, 0  ;;  %vm1117_vm11 = vcmp.lt.s32.totalorder %v5465_v42, 8  ;;  %vm1118_vm7 = vcmp.lt.s32.totalorder %v5477_v37, 8 }
 0x177   :  { %8303 = vst [vmem:[#allocation88_spill] sm:$0xff] %v5630_v45  ;;  %v1650_v3 = vshll.u32 %v1599_v31, 16  ;;  %vm8308_vm6 = vcmp.lt.s32.totalorder %v5541_v59, 8  ;;  %v1434_v10 = vshll.u32 %v5592_v22, 16  ;;  %v5651_v12 = vand.u32 7, %v72_v55 }
 0x178   :  { %vm969_vm13 = vmand %vm5633_vm4, %vm8308_vm6  ;;  %v517_v8 = vadd.s32 4294967295, %v5613_v30  ;;  %vm8310_vm2 = vcmp.lt.s32.totalorder %v5544_v51, 8  ;;  %v5659_v35 = vrot.slane %v1431_v16, 7  ;;  %v5662_v31 = vadd.s32 1, %v5626_v26 }
 0x179   :  { %8309 = vst [vmem:[#allocation89_spill] sm:$0xff] %v5651_v12  ;;  %vm970_vm3 = vmand %vm5639_vm0, %vm8310_vm2  ;;  %v985_v29 = vsel %vm969_vm13, 1.0, %v8120_v7  ;;  %v5665_v49 = vadd.s32 1, %v5628_v25  ;;  %v1640_v22 = vrot.slane %v1638_v28, 4  ;;  %v1643_v55 = vrot.slane %v1641_v40, 5 }
 0x17a   :  { %v986_v45 = vsel %vm970_vm3, 1.0, %v8120_v7  ;;  %vm5672_vm6 = vmand %vm1101_vm14, %vm1117_vm11  ;;  %v8312_v53 = vmov 0  ;;  %v518_v16 = vadd.s32 4294967295, %v5651_v12  ;;  %v1649_v61 = vrot.slane %v1647_v46, 4 }
 0x17b   :  { %8311 = vst [vmem:[#allocation90_spill] sm:$0xff] %v5665_v49  ;;  %v8313_v53 = vsel %vm5672_vm6, 4294967295, %v8312_v53  ;;  %v996_v17 = vpack.c.bf16 %v986_v45, %v985_v29  ;;  %vm5681_vm13 = vmand %vm1102_vm9, %vm1118_vm7  ;;  %v8315_v28 = vmov 0  ;;  %v1652_v40 = vrot.slane %v1650_v3, 5 }
 0x17c   :  { %8314 = vst [vmem:[#allocation91_spill] sm:$0xff] %v8313_v53  ;;  %v8316_v28 = vsel %vm5681_vm13, 4294967295, %v8315_v28  ;;  %vm8318_vm11 = vcmp.ge.s32.totalorder %v5518_v44, 0  ;;  %vm566_vm12 = vcmp.lt.s32.totalorder %v518_v16, 8  ;;  %v1494_v46 = vadd.s32 1, %v5613_v30 }
 0x17d   :  { %8317 = vst [vmem:[#allocation92_spill] sm:$0xff] %v8316_v28  ;;  %vm1149_vm14 = vmand %vm5672_vm6, %vm8318_vm11  ;;  %vm8319_vm0 = vcmask 1043456   ;;  %vm8321_vm7 = vcmp.ge.s32.totalorder %v5528_v62, 0  ;;  %vm7966_vm2 = vcmp.lt.s32.totalorder %v5662_v31, 8  ;;  %vm7965_vm3 = vcmp.lt.s32.totalorder %v5665_v49, 8 }
 0x17e   :  { %v5693_v45 = vsel %vm8319_vm0, %v5468_v2, %v5615_v43  ;;  %vm1150_vm9 = vmand %vm5681_vm13, %vm8321_vm7  ;;  %v1495_v3 = vadd.s32 1, %v5651_v12  ;;  %v1045_v29 = vshrl.u32 %v996_v17, 16  ;;  %v1048_v37 = vshll.u32 %v996_v17, 16 }
 0x17f   :  { %8320 = vst [vmem:[#allocation93_spill] sm:$0xff] %v5693_v45  ;;  %v1181_v42 = vsel %vm1149_vm14, 1.0, %v8120_v7  ;;  %v1182_v27 = vsel %vm1150_vm9, 1.0, %v8120_v7  ;;  %vm8322_vm11 = vcmp.lt.s32.totalorder %v517_v8, 8  ;;  %vm8323_vm0 = vcmp.ge.s32.totalorder %v517_v8, 0 }
 0x180   :  { %vm5706_vm1 = vmand %vm8323_vm0, %vm8322_vm11  ;;  %v1832_v45 = vsel %vm5608_vm8, 1.0, %v8120_v7  ;;  %v1833_v39 = vsel %vm5621_vm10, 1.0, %v8120_v7  ;;  %v1232_v17 = vshrl.u32 %v5435_v14, 16  ;;  %v1436_v57 = vor.u32 %v1434_v10, %v5659_v35 }
 0x181   :  { %vm8326_vm14 = vcmp.ge.s32.totalorder %v518_v16, 0  ;;  %v1644_v58 = vor.u32 %v1643_v55, %v1640_v22  ;;  %v5724_v62 = vor.u32 %v1652_v40, %v1649_v61  ;;  %vm971_vm8 = vmand %vm5706_vm1, %vm7966_vm2  ;;  %vm1510_vm9 = vcmp.ge.s32.totalorder %v1494_v46, 0 }
 0x182   :  { %vm5720_vm7 = vmand %vm8326_vm14, %vm566_vm12  ;;  %v5731_v38 = vadd.s32 4294967295, %v5626_v26  ;;  %v5733_v14 = vpack.c.bf16 %v1182_v27, %v1181_v42  ;;  %v987_v54 = vsel %vm971_vm8, 1.0, %v8120_v7  ;;  %vm1511_vm10 = vcmp.ge.s32.totalorder %v1495_v3, 0 }
 0x183   :  { %8329 = vst [vmem:[#allocation94_spill] sm:$0xff] %v5724_v62  ;;  %vm972_vm12 = vmand %vm5720_vm7, %vm7965_vm3  ;;  %vm1526_vm11 = vcmp.lt.s32.totalorder %v1494_v46, 8  ;;  %v1047_v61 = vrot.slane %v1045_v29, 3  ;;  %v1050_v10 = vrot.slane %v1048_v37, 4  ;;  %vm1527_vm0 = vcmp.lt.s32.totalorder %v1495_v3, 8 }
 0x184   :  { %v988_v22 = vsel %vm972_vm12, 1.0, %v8120_v7  ;;  %v1234_v55 = vor.u32 %v1232_v17, %v5503_v47  ;;  %v5743_v27 = vadd.s32 4294967295, %v5628_v25  ;;  %v5748_v42 = vsel %vm5510_vm15, 1.0, %v8120_v7  ;;  %vm5761_vm12 = vmand %vm1510_vm9, %vm1526_vm11 }
 0x185   :  { %v997_v16 = vpack.c.bf16 %v988_v22, %v987_v54  ;;  %v5750_v40 = vpack.c.bf16 %v1833_v39, %v1832_v45  ;;  %vm8330_vm14 = vsmask.f32 3328  ;;  %vm8331_vm8 = vsmask.f32 256 }
 0x186   :  { %v5754_v29 = vsel %vm8330_vm14, %v5409_v56, %v1644_v58  ;;  %v5758_v37 = vsel %vm8331_vm8, %v5442_v48, %v1436_v57  ;;  %v5768_v1 = vsel %vm5521_vm5, 1.0, %v8120_v7  ;;  %vm8334_vm15 = vmmov %vm8330_vm14  ;;  %v1236_v56 = vshll.u32 %v5733_v14, 16 }
 0x187   :  { %v5772_v39 = vsel %vm8334_vm15, %v1644_v58, %v5724_v62  ;;  %vm5776_vm14 = vmand %vm1511_vm10, %vm1527_vm0  ;;  %vm1119_vm11 = vcmp.lt.s32.totalorder %v5613_v30, 8  ;;  %v5782_v48 = vor.u32 %v1050_v10, %v1047_v61  ;;  %vm8337_vm5 = vcmp.lt.s32.totalorder %v5541_v59, 8 }
 0x188   :  { %vm1368_vm8 = vmand %vm5672_vm6, %vm8337_vm5  ;;  %vm1104_vm3 = vcmp.ge.s32.totalorder %v5651_v12, 0  ;;  %vm1120_vm10 = vcmp.lt.s32.totalorder %v5651_v12, 8  ;;  %v1054_v36 = vshrl.u32 %v997_v16, 16  ;;  %vm8338_vm0 = vcmp.lt.s32.totalorder %v5544_v51, 8 }
 0x189   :  { %vm1369_vm2 = vmand %vm5681_vm13, %vm8338_vm0  ;;  %v1384_v46 = vsel %vm1368_vm8, 1.0, %v8120_v7  ;;  %vm7977_vm9 = vcmp.ge.s32.totalorder %v5743_v27, 0  ;;  %vm8339_vm5 = vcmp.ge.s32.totalorder %v5613_v30, 0  ;;  %v8340_v51 = vmov 0 }
 0x18a   :  { %v1385_v17 = vsel %vm1369_vm2, 1.0, %v8120_v7  ;;  %vm5804_vm15 = vmand %vm8339_vm5, %vm1119_vm11  ;;  %v838_v54 = vsel %vm5633_vm4, 1.0, %v8120_v7  ;;  %vm8343_vm8 = vnez %v8307_v4  ;;  %v1057_v59 = vshll.u32 %v997_v16, 16 }
 0x18b   :  { %v8341_v51 = vsel %vm5804_vm15, 4294967295, %v8340_v51  ;;  %v839_v61 = vsel %vm8343_vm8, 1.0, %v8120_v7  ;;  %v1395_v25 = vpack.c.bf16 %v1385_v17, %v1384_v46  ;;  %vm5819_vm2 = vmand %vm1104_vm3, %vm1120_vm10  ;;  %v8344_v26 = vmov 0 }
 0x18c   :  { %8342 = vst [vmem:[#allocation95_spill] sm:$0xff] %v8341_v51  ;;  %v8345_v26 = vsel %vm5819_vm2, 4294967295, %v8344_v26  ;;  %vm8347_vm11 = vcmp.ge.s32.totalorder %v5731_v38, 0  ;;  %v1744_v16 = vpack.c.bf16 %v5768_v1, %v5748_v42  ;;  %vm8348_vm5 = vnez %v8281_v41  ;;  %vm1152_vm10 = vmand %vm5819_vm2, %vm7977_vm9 }
 0x18d   :  { %8346 = vst [vmem:[#allocation96_spill] sm:$0xff] %v8345_v26  ;;  %vm1151_vm0 = vmand %vm5804_vm15, %vm8347_vm11  ;;  %vm8349_vm3 = vnez %v8285_v60  ;;  %v1056_v17 = vrot.slane %v1054_v36, 3  ;;  %v849_v12 = vpack.c.bf16 %v839_v61, %v838_v54  ;;  %vm8350_vm11 = vcmp.lt.s32.totalorder %v5662_v31, 8 }
 0x18e   :  { %v1735_v46 = vsel %vm8349_vm3, 1.0, %v8120_v7  ;;  %v1183_v60 = vsel %vm1151_vm0, 1.0, %v8120_v7  ;;  %v1059_v62 = vrot.slane %v1057_v59, 4  ;;  %vm8353_vm3 = vcmp.lt.s32.totalorder %v5665_v49, 8 }
 0x18f   :  { %vm1819_vm9 = vmand %vm5776_vm14, %vm8353_vm3  ;;  %vm8355_vm13 = vsmask.f32 7424  ;;  %v41_v26 = vadd.s32 112, %v4504_v13  ;;  %v1442_v49 = vshll.u32 %v1395_v25, 16  ;;  %vm8358_vm0 = vcmask 261120  }
 0x190   :  { %v5884_v41 = vadd.s32 120, %v4504_v13  ;;  %vm8364_vm3 = vnez %v8231_v34  ;;  %v8397_v4 = vmov 0 }
 0x1bb   :  { %v4176_v58 = vpop.f32.mrb[0].mxu1 }
 0x1bc   :  { %v400_v45 = vadd.f32 %v4176_v58, %v4765_v50  ;;  %v391_v3 = vpop.f32.mrb[1].mxu1  ;;  %v1238_v58 = vrot.slane %v1236_v56, 1  ;;  %v1734_v56 = vsel %vm8348_vm5, 1.0, %v8120_v7  ;;  %vm5845_vm5 = vmand %vm5761_vm12, %vm8350_vm11  ;;  %vm8354_vm11 = vsmask.f32 4352 }
 0x1bd   :  { %v392_v10 = vadd.f32 %v391_v3, %v4765_v50  ;;  %v4177_v22 = vpop.f32.mrb[2].mxu1  ;;  %v5858_v54 = vsel %vm8354_vm11, %v5462_v15, %v5782_v48  ;;  %v1834_v15 = vsel %vm5845_vm5, 1.0, %v8120_v7  ;;  %vm8363_vm5 = vcmp.ge.s32.totalorder %v5285_v18, 0 }
 0x1be   :  { %v403_v30 = vadd.f32 %v4177_v22, %v4765_v50  ;;  %v394_v28 = vpop.f32.mrb[3].mxu1  ;;  %v1439_v22 = vshrl.u32 %v1395_v25, 16  ;;  %v456_v53 = vmax.f32 %v400_v45, 0.0  ;;  %v5861_v61 = vsel %vm8355_vm13, %v1234_v55, %v1238_v58  ;;  %vm8359_vm13 = vmmov %vm8358_vm0 }
 0x1bf   :  { %v395_v3 = vadd.f32 %v394_v28, %v4765_v50  ;;  %v1184_v28 = vsel %vm1152_vm10, 1.0, %v8120_v7  ;;  %v454_v1 = vmax.f32 %v392_v10, 0.0  ;;  %v1835_v55 = vsel %vm1819_vm9, 1.0, %v8120_v7  ;;  %vm5903_vm11 = vmand %vm8364_vm3, %vm8363_vm5 }
 0x1c0   :  { %v457_v42 = vmax.f32 %v403_v30, 0.0  ;;  %v1745_v30 = vpack.c.bf16 %v1735_v46, %v1734_v56  ;;  %v5864_v59 = vrot.slane %v1439_v22, 7  ;;  %v5866_v51 = vpack.c.bf16 %v1184_v28, %v1183_v60 }
 0x1c1   :  { %v455_v36 = vmax.f32 %v395_v3, 0.0  ;;  %v1763_v46 = vrot.slane %v1744_v16, 4  ;;  %v5876_v25 = vor.u32 %v1059_v62, %v1056_v17  ;;  %v5878_v60 = vrot.slane %v849_v12, 4 }
 0x1c2   :  { %v481_v45 = vpack.c.bf16 %v457_v42, %v456_v53  ;;  %8356 = vst [vmem:[#allocation97_spill] sm:$0xff] %v5864_v59  ;;  %8357 = vst [vmem:[#allocation98_spill] sm:$0xff] %v5866_v51  ;;  %v5880_v28 = vrot.slane %v1745_v30, 4  ;;  %v73_v16 = vshra.s32 %v41_v26, 3  ;;  %v1244_v62 = vshll.u32 %v5866_v51, 16 }
 0x1c3   :  { %v480_v10 = vpack.c.bf16 %v455_v36, %v454_v1  ;;  %v4180_v3 = vpop.f32.mrb[4].mxu1  ;;  %v5889_v17 = vpack.c.bf16 %v1835_v55, %v1834_v15  ;;  %v8361_v30 = vshrl.u32 %v5733_v14, 16  ;;  %vm8362_vm9 = vcmask 1043456  }
 0x1c4   :  { %489 = vst.msk [vmem:[#allocation2 + $0x10] sm:$0xff] %vm8358_vm0, %v481_v45  ;;  %v416_v53 = vadd.f32 %v4180_v3, %v4765_v50  ;;  %v407_v56 = vpop.f32.mrb[5].mxu1  ;;  %8360 = vst [vmem:[#allocation99_spill] sm:$0xff] %v5880_v28  ;;  %vm8368_vm0 = vsmask.f32 4352  ;;  %vm8372_vm5 = vnez %v8234_v24  ;;  %v8373_v18 = vmov 0 }
 0x1c5   :  { %488 = vst.msk [vmem:[#allocation2 + $0x8] sm:$0xff] %vm8359_vm13, %v480_v10  ;;  %v408_v22 = vadd.f32 %v407_v56, %v4765_v50  ;;  %v4181_v42 = vpop.f32.mrb[6].mxu1  ;;  %v1444_v56 = vor.u32 %v1442_v49, %v5864_v59  ;;  %v5910_v15 = vsel %vm8368_vm0, %v5782_v48, %v5876_v25  ;;  %vm8369_vm13 = vmmov %vm8362_vm9  ;;  %vm8401_vm10 = vcmask 1043456  }
 0x1c6   :  { %v460_v1 = vmax.f32 %v416_v53, 0.0  ;;  %v419_v36 = vadd.f32 %v4181_v42, %v4765_v50  ;;  %v410_v45 = vpop.f32.mrb[7].mxu1  ;;  %v5893_v53 = vor.u32 %v8361_v30, %v1238_v58  ;;  %v5897_v42 = vsel %vm8362_vm9, %v5525_v19, %v1763_v46  ;;  %vm8376_vm0 = vmmov %vm8369_vm13 }
 0x1c7   :  { %v458_v3 = vmax.f32 %v408_v22, 0.0  ;;  %v411_v10 = vadd.f32 %v410_v45, %v4765_v50  ;;  %v8365_v22 = vmov 0  ;;  %v5915_v14 = vsel %vm8369_vm13, %v5615_v43, %v5878_v60 }
 0x1c8   :  { %v461_v12 = vmax.f32 %v419_v36, 0.0  ;;  %v8366_v22 = vsel %vm5903_vm11, 4294967295, %v8365_v22  ;;  %v5917_v19 = vand.u32 7, %v41_v26  ;;  %vm8371_vm9 = vcmp.ge.s32.totalorder %v5310_v9, 0 }
 0x1c9   :  { %8367 = vst [vmem:[#allocation100_spill] sm:$0xff] %v8366_v22  ;;  %v459_v49 = vmax.f32 %v411_v10, 0.0  ;;  %vm5923_vm3 = vmand %vm8372_vm5, %vm8371_vm9  ;;  %v5929_v48 = vsel %vm8376_vm0, %v1763_v46, %v5880_v28  ;;  %v5932_v58 = vand.u32 7, %v5884_v41  ;;  %v74_v43 = vshra.s32 %v5884_v41, 3 }
 0x1ca   :  { %8370 = vst [vmem:[#allocation101_spill] sm:$0xff] %v5917_v19  ;;  %v8374_v18 = vsel %vm5923_vm3, 4294967295, %v8373_v18  ;;  %v483_v34 = vpack.c.bf16 %v461_v12, %v460_v1  ;;  %vm8378_vm13 = vsmask.f32 256  ;;  %v5941_v36 = vrot.slane %v1244_v62, 1 }
 0x1cb   :  { %8375 = vst [vmem:[#allocation102_spill] sm:$0xff] %v8374_v18  ;;  %8377 = vst [vmem:[#allocation103_spill] sm:$0xff] %v5932_v58  ;;  %v482_v26 = vpack.c.bf16 %v459_v49, %v458_v3  ;;  %v4184_v55 = vpop.f32.mrb[8].mxu1  ;;  %v5935_v9 = vld [vmem:[#allocation2 + $0x10] sm:$0xff]  ;;  %v5939_v24 = vsel %vm8378_vm13, %v5659_v35, %v1444_v56  ;;  %v5943_v1 = vand.u32 7, %v73_v16  ;;  %vm8380_vm9 = vcmask 261120  }
 0x1cc   :  { %8379 = vst [vmem:[#allocation104_spill] sm:$0xff] %v5941_v36  ;;  %491 = vst.msk [vmem:[#allocation2 + $0x20] sm:$0xff] %vm8380_vm9, %v483_v34  ;;  %v432_v46 = vadd.f32 %v4184_v55, %v4765_v50  ;;  %v423_v45 = vpop.f32.mrb[9].mxu1  ;;  %v1683_v41 = vmul.bf16 %v4958_v52, %v5935_v9  ;;  %v1480_v3 = vld [vmem:[#allocation2 + $0x8] sm:$0xf8]  ;;  %v1082_v12 = vmul.bf16 %v5066_v63, %v5935_v9  ;;  %vm8383_vm0 = vcmask 1046528  }
 0x1cd   :  { %v5949_v10 = vld [vmem:[#allocation2 + $0x8] sm:$0xff]  ;;  %v1270_v35 = vmul.bf16 %v5186_v20, %v5935_v9  ;;  %vm8382_vm5 = vmmov %vm8380_vm9  ;;  %v424_v16 = vadd.f32 %v423_v45, %v4765_v50  ;;  %v4185_v56 = vpop.f32.mrb[10].mxu1  ;;  %v1682_v62 = vmul.bf16 %v4842_v6, %v1480_v3  ;;  %v4350_v6 = vld [vmem:[%s7848_s2 + $0x60] sm:$0xff]   ;;  %v5977_v45 = vadd.s32 1, %v5917_v19 }
 0x1ce   :  { %8381 = vst [vmem:[#allocation105_spill] sm:$0xff] %v5949_v10  ;;  %490 = vst.msk [vmem:[#allocation2 + $0x18] sm:$0xff] %vm8382_vm5, %v482_v26  ;;  %v1081_v30 = vmul.bf16 %v5053_v21, %v5949_v10  ;;  %v1471_v52 = vmul.bf16 %v5078_v32, %v5949_v10  ;;  %v464_v49 = vmax.f32 %v432_v46, 0.0  ;;  %v435_v34 = vadd.f32 %v4185_v56, %v4765_v50  ;;  %v426_v20 = vpop.f32.mrb[11].mxu1  ;;  %v4351_v21 = vld [vmem:[%s7848_s2 + $0x20] sm:$0xff]  }
 0x1cf   :  { %2240 = vrot.lane.b32.xlu1 %v1683_v41, %s4419_s26  ;;  %v5964_v63 = vrot.slane %v1082_v12, 1  ;;  %v1269_v26 = vmul.bf16 %v5182_v23, %v5949_v10  ;;  %v462_v32 = vmax.f32 %v424_v16, 0.0  ;;  %v427_v55 = vadd.f32 %v426_v20, %v4765_v50  ;;  %2238 = vrot.lane.b32.xlu0 %v1682_v62, %s4419_s26 }
 0x1d0   :  { %v2035_v46 = vrot.slane %v1081_v30, 1  ;;  %v465_v41 = vmax.f32 %v435_v34, 0.0  ;;  %v5981_v23 = vrot.slane %v1270_v35, 4  ;;  %v1472_v12 = vmul.bf16 %v5197_v11, %v5935_v9  ;;  %4046 = vmatprep.subr.bf16.mxu0 %v4350_v6  ;;  %v5989_v30 = vld [vmem:[#allocation2 + $0x8] sm:$0xf0] }
 0x1d1   :  { %v5979_v3 = vrot.slane %v1269_v26, 4  ;;  %v463_v56 = vmax.f32 %v427_v55, 0.0  ;;  %v2194_v20 = vrot.slane %v1471_v52, 5  ;;  %v886_v62 = vmul.bf16 %v4989_v33, %v5949_v10  ;;  %8384 = vst [vmem:[#allocation106_spill] sm:$0xff] %v5989_v30  ;;  %4047 = vmatpush3.bf16.msra.mxu0 %v4351_v21  ;;  %v8390_v26 = vld [vmem:[#allocation81_spill] sm:$0xff]  ;;  %v8402_v55 = vld [vmem:[#allocation58_spill] sm:$0xff] }
 0x1d2   :  { %v2038_v16 = vsel %vm8383_vm0, %v2035_v46, %v5964_v63  ;;  %vm8385_vm13 = vcmp.ge.s32.totalorder %v5518_v44, 0  ;;  %v8386_v35 = vmov 0  ;;  %v485_v11 = vpack.c.bf16 %v465_v41, %v464_v49 }
 0x1d3   :  { %vm5995_vm9 = vmand %vm5633_vm4, %vm8385_vm13  ;;  %2053 = vrot.lane.b32.xlu1 %v2038_v16, %s4419_s26  ;;  %v6000_v34 = vrot.slane %v1472_v12, 5  ;;  %v6004_v52 = vmul.bf16 %v5075_v0, %v5935_v9  ;;  %v6006_v33 = vand.u32 7, %v74_v43  ;;  %vm8391_vm5 = vcmp.ge.s32.totalorder %v8390_v26, 0  ;;  %2211 = vrot.lane.b32.xlu0 %v2194_v20, %s4420_s7  ;;  %v4188_v6 = vpop.f32.mrb[12].mxu1  ;;  %v6088_v51 = vld [vmem:[#allocation2 + $0x20] sm:$0xff] }
 0x1d4   :  { %v8387_v35 = vsel %vm5995_vm9, 4294967295, %v8386_v35  ;;  %vm6012_vm0 = vmand %vm8343_vm8, %vm8391_vm5  ;;  %v8392_v44 = vmov 0  ;;  %v484_v5 = vpack.c.bf16 %v463_v56, %v462_v32  ;;  %v1943_v49 = vshll.u32 %v886_v62, 16  ;;  %v439_v32 = vpop.f32.mrb[13].mxu1 }
 0x1d5   :  { %8388 = vst [vmem:[#allocation107_spill] sm:$0xff] %v8387_v35  ;;  %8389 = vst [vmem:[#allocation108_spill] sm:$0xff] %v6006_v33  ;;  %v8393_v44 = vsel %vm6012_vm0, 4294967295, %v8392_v44  ;;  %vm8395_vm4 = vsmask.f32 7424  ;;  %v6023_v43 = vadd.s32 1, %v5932_v58  ;;  %v2082_v21 = vsel %vm8401_vm10, %v5979_v3, %v5981_v23 }
 0x1d6   :  { %8394 = vst [vmem:[#allocation81_spill] sm:$0xff] %v8393_v44  ;;  %v6020_v0 = vsel %vm8395_vm4, %v5893_v53, %v5941_v36  ;;  %vm8396_vm13 = vcmp.ge.s32.totalorder %v5731_v38, 0  ;;  %vm8400_vm5 = vcmask 261120   ;;  %v448_v53 = vadd.f32 %v4188_v6, %v4765_v50  ;;  %v4189_v13 = vpop.f32.mrb[14].mxu1 }
 0x1d7   :  { %vm6029_vm8 = vmand %vm5706_vm1, %vm8396_vm13  ;;  %493 = vst.msk [vmem:[#allocation2 + $0x30] sm:$0xff] %vm8400_vm5, %v485_v11  ;;  %v1780_v41 = vmul.bf16 %v8402_v55, %v5989_v30  ;;  %v6041_v12 = vadd.s32 1, %v5943_v1  ;;  %vm8403_vm4 = vcmp.ge.s32.totalorder %v5743_v27, 0  ;;  %v8404_v56 = vmov 0  ;;  %v6055_v55 = vld [vmem:[#allocation2 + $0x18] sm:$0xff]  ;;  %2097 = vrot.lane.b32.xlu1 %v2082_v21, %s4421_s8  ;;  %v442_v18 = vpop.f32.mrb[15].mxu1 }
 0x1d8   :  { %v8398_v4 = vsel %vm6029_vm8, 4294967295, %v8397_v4  ;;  %vm6047_vm13 = vmand %vm5720_vm7, %vm8403_vm4  ;;  %492 = vst.msk [vmem:[#allocation2 + $0x28] sm:$0xff] %vm8400_vm5, %v484_v5  ;;  %vm8407_vm10 = vcmask 1042432   ;;  %v1945_v11 = vrot.slane %v1943_v49, 1  ;;  %v1947_v26 = vshrl.u32 %v886_v62, 16  ;;  %v8413_v21 = vld [vmem:[#allocation52_spill] sm:$0xff] }
 0x1d9   :  { %8399 = vst [vmem:[#allocation109_spill] sm:$0xff] %v8398_v4  ;;  %v8405_v56 = vsel %vm6047_vm13, 4294967295, %v8404_v56  ;;  %v2196_v16 = vsel %vm8407_vm10, %v2194_v20, %v6000_v34  ;;  %v440_v6 = vadd.f32 %v439_v32, %v4765_v50  ;;  %v1951_v4 = vshll.u32 %v6004_v52, 16  ;;  %v8409_v20 = vld [vmem:[#allocation67_spill] sm:$0xff] }
 0x1da   :  { %8406 = vst [vmem:[#allocation58_spill] sm:$0xff] %v8405_v56  ;;  %v468_v44 = vmax.f32 %v448_v53, 0.0  ;;  %v451_v56 = vadd.f32 %v4189_v13, %v4765_v50  ;;  %2213 = vrot.lane.b32.xlu0 %v2196_v16, %s4420_s7  ;;  %v6065_v62 = vmul.bf16 %v8409_v20, %v5935_v9  ;;  %v6068_v49 = vadd.s32 1, %v6006_v33  ;;  %v8410_v13 = vld [vmem:[#allocation69_spill] sm:$0xff]  ;;  %v8411_v20 = vld [vmem:[#allocation51_spill] sm:$0xff] }
 0x1db   :  { %v1949_v53 = vor.u32 %v1947_v26, %v1945_v11  ;;  %v1083_v22 = vmul.bf16 %v8410_v13, %v6055_v55  ;;  %v2259_v35 = vshll.u32 %v1780_v41, 16  ;;  %v4352_v16 = vld [vmem:[%s7848_s2 + $0x68] sm:$0xff]   ;;  %vm8412_vm4 = vsmask.f32 7424 }
 0x1dc   :  { %v469_v10 = vmax.f32 %v451_v56, 0.0  ;;  %v4353_v9 = vld [vmem:[%s7848_s2 + $0x28] sm:$0xff]   ;;  %v1946_v30 = vsel %vm8412_vm4, %v8411_v20, %v1945_v11  ;;  %vm8414_vm5 = vcmask 1046528   ;;  %v466_v26 = vmax.f32 %v440_v6, 0.0  ;;  %4048 = vmatprep.subr.bf16.mxu0 %v4352_v16  ;;  %vm8417_vm10 = vmmov %vm8412_vm4 }
 0x1dd   :  { %v2036_v32 = vsel %vm8414_vm5, %v8413_v21, %v2035_v46  ;;  %v443_v5 = vadd.f32 %v442_v18, %v4765_v50  ;;  %2006 = vrot.lane.b32.xlu1 %v1946_v30, %s4420_s7  ;;  %v6086_v56 = vrot.slane %v1951_v4, 1  ;;  %v2257_v28 = vshrl.u32 %v1780_v41, 16  ;;  %v8415_v46 = vld [vmem:[#allocation70_spill] sm:$0xff]  ;;  %v8416_v50 = vld [vmem:[#allocation79_spill] sm:$0xff]  ;;  %4049 = vmatpush3.bf16.msra.mxu0 %v4353_v9  ;;  %v8431_v4 = vld [vmem:[#allocation93_spill] sm:$0xff] }
 0x1de   :  { %v487_v13 = vpack.c.bf16 %v469_v10, %v468_v44  ;;  %v2261_v36 = vrot.slane %v2259_v35, 1  ;;  %2051 = vrot.lane.b32.xlu0 %v2036_v32, %s4419_s26  ;;  %v2264_v11 = vshll.u32 %v6065_v62, 16  ;;  %v1271_v6 = vmul.bf16 %v8415_v46, %v6055_v55  ;;  %v4354_v10 = vld [vmem:[%s7848_s2 + $0x70] sm:$0xff]   ;;  %v4356_v41 = vld [vmem:[%s7848_s2 + $0x78] sm:$0xff]  }
 0x1df   :  { %v467_v20 = vmax.f32 %v443_v5, 0.0  ;;  %v1084_v18 = vmul.bf16 %v8416_v50, %v6088_v51  ;;  %v4355_v30 = vld [vmem:[%s7848_s2 + $0x30] sm:$0xff]   ;;  %v1954_v35 = vsel %vm8417_vm10, %v1949_v53, %v6086_v56  ;;  %v2039_v44 = vrot.slane %v1083_v22, 1  ;;  %v8419_v32 = vld [vmem:[#allocation83_spill] sm:$0xff]  ;;  %4050 = vmatprep.subr.bf16.mxu0 %v4354_v10 }
 0x1e0   :  { %vm8418_vm4 = vcmask 261120   ;;  %v2262_v5 = vor.u32 %v2261_v36, %v2257_v28  ;;  %v1272_v16 = vmul.bf16 %v8419_v32, %v6088_v51  ;;  %v8420_v9 = vld [vmem:[#allocation74_spill] sm:$0xff]  ;;  %v8421_v22 = vld [vmem:[#allocation53_spill] sm:$0xff]  ;;  %vm1528_vm5 = vcmp.lt.s32.totalorder %v6041_v12, 8 }
 0x1e1   :  { %495 = vst.msk [vmem:[#allocation2 + $0x40] sm:$0xff] %vm8418_vm4, %v487_v13  ;;  %v486_v21 = vpack.c.bf16 %v467_v20, %v466_v26  ;;  %v6114_v46 = vmul.bf16 %v8420_v9, %v6055_v55  ;;  %2008 = vrot.lane.b32.xlu1 %v1954_v35, %s4420_s7  ;;  %vm8422_vm4 = vcmask 1043456   ;;  %v8423_v13 = vld [vmem:[#allocation73_spill] sm:$0xff]  ;;  %vm1529_vm6 = vcmp.lt.s32.totalorder %v6068_v49, 8  ;;  %4051 = vmatpush3.bf16.msra.mxu0 %v4355_v30  ;;  %v8426_v35 = vld [vmem:[#allocation72_spill] sm:$0xff] }
 0x1e2   :  { %v2080_v53 = vsel %vm8422_vm4, %v8421_v22, %v5979_v3  ;;  %v1473_v28 = vmul.bf16 %v8423_v13, %v6055_v55  ;;  %v2266_v36 = vrot.slane %v2264_v11, 1  ;;  %vm8424_vm13 = vcmask 261120   ;;  %v4357_v3 = vld [vmem:[%s7848_s2 + $0x38] sm:$0xff]   ;;  %4052 = vmatprep.subr.bf16.mxu0 %v4356_v41  ;;  %v4358_v30 = vld [vmem:[%s7848_s2 + $0x80] sm:$0xff]  }
 0x1e3   :  { %2095 = vrot.lane.b32.xlu0 %v2080_v53, %s4421_s8  ;;  %494 = vst.msk [vmem:[#allocation2 + $0x38] sm:$0xff] %vm8424_vm13, %v486_v21  ;;  %v2083_v26 = vrot.slane %v1271_v6, 4  ;;  %v6127_v20 = vrot.slane %v1084_v18, 1  ;;  %v2272_v50 = vshll.u32 %v6114_v46, 16  ;;  %vm8425_vm4 = vcmask 1046528   ;;  %v8427_v21 = vld [vmem:[#allocation71_spill] sm:$0xff] }
 0x1e4   :  { %v2040_v10 = vsel %vm8425_vm4, %v5964_v63, %v2039_v44  ;;  %v1685_v11 = vmul.bf16 %v8426_v35, %v6088_v51  ;;  %v1684_v6 = vmul.bf16 %v8427_v21, %v6055_v55  ;;  %v8428_v18 = vld [vmem:[#allocation82_spill] sm:$0xff]  ;;  %v2267_v9 = vsel %vm8417_vm10, %v2262_v5, %v2266_v36  ;;  %v8429_v53 = vld [vmem:[#allocation80_spill] sm:$0xff] }
 0x1e5   :  { %v888_v32 = vmul.bf16 %v8428_v18, %v6055_v55  ;;  %v6147_v22 = vrot.slane %v1272_v16, 4  ;;  %v2268_v63 = vshrl.u32 %v6065_v62, 16  ;;  %v1474_v13 = vmul.bf16 %v8429_v53, %v6088_v51  ;;  %v6152_v35 = vld [vmem:[#allocation2 + $0x28] sm:$0xff]  ;;  %2055 = vrot.lane.b32.xlu1 %v2040_v10, %s4419_s26  ;;  %4053 = vmatpush3.bf16.msra.mxu0 %v4357_v3 }
 0x1e6   :  { %v2197_v55 = vrot.slane %v1473_v28, 5  ;;  %v8430_v41 = vld [vmem:[#allocation84_spill] sm:$0xff]  ;;  %v6161_v5 = vmul.bf16 %v8431_v4, %v6088_v51  ;;  %vm8432_vm10 = vcmask 1043456   ;;  %v2042_v16 = vsel %vm8425_vm4, %v2039_v44, %v6127_v20  ;;  %4054 = vmatprep.subr.bf16.mxu0 %v4358_v30 }
 0x1e7   :  { %v1959_v21 = vshll.u32 %v888_v32, 16  ;;  %v6157_v18 = vmul.bf16 %v8430_v41, %v6088_v51  ;;  %2327 = vrot.lane.b32.xlu0 %v2267_v9, %s4421_s8  ;;  %v2084_v62 = vsel %vm8432_vm10, %v5981_v23, %v2083_v26  ;;  %v2270_v53 = vor.u32 %v2268_v63, %v2266_v36  ;;  %v4359_v28 = vld [vmem:[%s7848_s2 + $0x40] sm:$0xff]   ;;  %v4360_v23 = vld [vmem:[%s7848_s2 + $0x88] sm:$0xff]   ;;  %v6189_v9 = vld [vmem:[#allocation2 + $0x30] sm:$0xff] }
 0x1e8   :  { %v2274_v10 = vrot.slane %v2272_v50, 1  ;;  %v2276_v59 = vshrl.u32 %v6114_v46, 16  ;;  %v1963_v51 = vshrl.u32 %v888_v32, 16  ;;  %v1085_v4 = vmul.bf16 %v5858_v54, %v6152_v35 }
 0x1e9   :  { %v1961_v41 = vrot.slane %v1959_v21, 1  ;;  %v2199_v44 = vrot.slane %v1474_v13, 5  ;;  %v1955_v36 = vshrl.u32 %v6004_v52, 16  ;;  %v1273_v50 = vmul.bf16 %v5861_v61, %v6152_v35  ;;  %2099 = vrot.lane.b32.xlu1 %v2084_v62, %s4421_s8  ;;  %4055 = vmatpush3.bf16.msra.mxu0 %v4359_v28 }
 0x1ea   :  { %v1475_v3 = vmul.bf16 %v5758_v37, %v6152_v35  ;;  %v2086_v46 = vsel %vm8432_vm10, %v2083_v26, %v6147_v22  ;;  %vm8433_vm4 = vcmask 1042432   ;;  %v2280_v32 = vshll.u32 %v6157_v18, 16  ;;  %4056 = vmatprep.subr.bf16.mxu0 %v4360_v23 }
 0x1eb   :  { %v2198_v54 = vsel %vm8433_vm4, %v6000_v34, %v2197_v55  ;;  %v1967_v30 = vshll.u32 %v6161_v5, 16  ;;  %2244 = vrot.lane.b32.xlu0 %v1685_v11, %s4419_s26  ;;  %vm8434_vm13 = vsmask.f32 7424  ;;  %v1957_v37 = vor.u32 %v1955_v36, %v6086_v56  ;;  %v4361_v56 = vld [vmem:[%s7848_s2 + $0x48] sm:$0xff]  }
 0x1ec   :  { %v6193_v61 = vsel %vm8434_vm13, %v2270_v53, %v2274_v10  ;;  %v1086_v52 = vmul.bf16 %v5910_v15, %v6189_v9  ;;  %vm8435_vm10 = vcmp.ge.s32.totalorder %v6041_v12, 0  ;;  %v8438_v26 = vshrl.u32 %v5750_v40, 16 }
 0x1ed   :  { %vm6202_vm4 = vmand %vm8435_vm10, %vm1528_vm5  ;;  %v2278_v11 = vor.u32 %v2276_v59, %v2274_v10  ;;  %v1965_v13 = vor.u32 %v1963_v51, %v1961_v41  ;;  %v2043_v15 = vrot.slane %v1085_v4, 1  ;;  %v1476_v21 = vmul.bf16 %v5939_v24, %v6189_v9  ;;  %2057 = vrot.lane.b32.xlu1 %v2042_v16, %s4419_s26  ;;  %4057 = vmatpush3.bf16.msra.mxu0 %v4361_v56 }
 0x1ee   :  { %v6208_v63 = vrot.slane %v8438_v26, 3  ;;  %vm8439_vm5 = vcmp.ge.s32.totalorder %v6068_v49, 0  ;;  %vm8442_vm10 = vcmask 1042432   ;;  %v2087_v53 = vrot.slane %v1273_v50, 4 }
 0x1ef   :  { %vm6219_vm13 = vmand %vm8439_vm5, %vm1529_vm6  ;;  %v2200_v62 = vsel %vm8442_vm10, %v2197_v55, %v2199_v44  ;;  %v2201_v28 = vrot.slane %v1475_v3, 5  ;;  %v1274_v59 = vmul.bf16 %v6020_v0, %v6189_v9  ;;  %v2282_v10 = vrot.slane %v2280_v32, 1  ;;  %v4362_v0 = vld [vmem:[%s7848_s2 + $0x90] sm:$0xff]   ;;  %2242 = vrot.lane.b32.xlu0 %v1684_v6, %s4419_s26 }
 0x1f0   :  { %v6227_v24 = vrot.slane %v1967_v30, 1  ;;  %v1687_v49 = vmul.bf16 %v5772_v39, %v6189_v9  ;;  %v6231_v51 = vrot.slane %v1086_v52, 1  ;;  %vm8443_vm6 = vcmp.lt.s32.totalorder %v5977_v45, 8  ;;  %4058 = vmatprep.subr.bf16.mxu0 %v4362_v0 }
 0x1f1   :  { %vm6237_vm5 = vmand %vm6202_vm4, %vm8443_vm6  ;;  %vm8446_vm10 = vsmask.f32 7424  ;;  %v1686_v4 = vmul.bf16 %v5754_v29, %v6152_v35  ;;  %v6252_v23 = vmul.bf16 %v5897_v42, %v6152_v35  ;;  %vm8447_vm6 = vcmp.lt.s32.totalorder %v6023_v43, 8  ;;  %2101 = vrot.lane.b32.xlu1 %v2086_v46, %s4421_s8 }
 0x1f2   :  { %v6246_v16 = vsel %vm8446_vm10, %v1957_v37, %v1961_v41  ;;  %vm6258_vm8 = vmand %vm6219_vm13, %vm8447_vm6  ;;  %v8450_v6 = vshll.u32 %v5750_v40, 16  ;;  %v4363_v41 = vld [vmem:[%s7848_s2 + $0x50] sm:$0xff]   ;;  %v2283_v3 = vsel %vm8446_vm10, %v2278_v11, %v2282_v10  ;;  %vm8452_vm9 = vcmask 1046528  }
 0x1f3   :  { %vm8451_vm0 = vmmov %vm8446_vm10  ;;  %v6274_v32 = vsel %vm8452_vm9, %v6127_v20, %v2043_v15  ;;  %v6276_v30 = vrot.slane %v1476_v21, 5  ;;  %vm8453_vm6 = vcmask 1043456   ;;  %vm8454_vm3 = vcmask 1042432   ;;  %2215 = vrot.lane.b32.xlu0 %v2198_v54, %s4420_s7  ;;  %4059 = vmatpush3.bf16.msra.mxu0 %v4363_v41  ;;  %v4364_v54 = vld [vmem:[%s7848_s2 + $0x98] sm:$0xff]  }
 0x1f4   :  { %v1896_v50 = vrot.slane %v8450_v6, 4  ;;  %v6270_v42 = vsel %vm8451_vm0, %v1965_v13, %v6227_v24  ;;  %v6280_v40 = vsel %vm8453_vm6, %v6147_v22, %v2087_v53  ;;  %v6283_v37 = vsel %vm8454_vm3, %v2199_v44, %v2201_v28  ;;  %vm8455_vm0 = vmmov %vm8452_vm9  ;;  %4060 = vmatprep.subr.bf16.mxu0 %v4364_v54  ;;  %v6366_v54 = vld [vmem:[#allocation2 + $0x40] sm:$0xff] }
 0x1f5   :  { %v6285_v52 = vrot.slane %v1274_v59, 4  ;;  %v2284_v26 = vshrl.u32 %v6157_v18, 16  ;;  %v6291_v20 = vsel %vm8455_vm0, %v2043_v15, %v6231_v51  ;;  %v6295_v56 = vmul.bf16 %v5915_v14, %v6152_v35  ;;  %2329 = vrot.lane.b32.xlu1 %v6193_v61, %s4421_s8  ;;  %v6356_v61 = vld [vmem:[#allocation2 + $0x38] sm:$0xff] }
 0x1f6   :  { %v1836_v22 = vsel %vm6237_vm5, 1.0, %v8120_v7  ;;  %v1837_v44 = vsel %vm6258_vm8, 1.0, %v8120_v7  ;;  %v2288_v18 = vshll.u32 %v6252_v23, 16  ;;  %v1971_v46 = vshrl.u32 %v6161_v5, 16  ;;  %v4365_v5 = vld [vmem:[%s7848_s2 + $0x58] sm:$0xff]  }
 0x1f7   :  { %v6308_v11 = vmul.bf16 %v5929_v48, %v6189_v9  ;;  %v1845_v14 = vpack.c.bf16 %v1837_v44, %v1836_v22  ;;  %vm8456_vm3 = vcmp.ge.s32.totalorder %v5731_v38, 0  ;;  %vm8459_vm8 = vcmask 1042432   ;;  %2217 = vrot.lane.b32.xlu0 %v2200_v62, %s4420_s7  ;;  %4061 = vmatpush3.bf16.msra.mxu0 %v4365_v5  ;;  %v4381_v62 = vld [vmem:[%s7848_s2 + $0xa0] sm:$0xff]  }
 0x1f8   :  { %vm6314_vm9 = vmand %vm5761_vm12, %vm8456_vm3  ;;  %v6326_v48 = vsel %vm8459_vm8, %v2201_v28, %v6276_v30  ;;  %v8460_v38 = vshrl.u32 %v5889_v17, 16  ;;  %v1903_v21 = vshll.u32 %v5889_v17, 16  ;;  %v840_v59 = vsel %vm5706_vm1, 1.0, %v8120_v7  ;;  %4190 = vmatprep.subr.bf16.mxu0 %v4381_v62 }
 0x1f9   :  { %vm8461_vm5 = vcmp.ge.s32.totalorder %v5743_v27, 0  ;;  %v6340_v55 = vsel %vm8453_vm6, %v2087_v53, %v6285_v52  ;;  %v1909_v28 = vshrl.u32 %v1845_v14, 16  ;;  %v1912_v0 = vshll.u32 %v1845_v14, 16  ;;  %2010 = vrot.lane.b32.xlu1 %v6246_v16, %s4420_s7  ;;  %vm8466_vm8 = vmmov %vm8453_vm6 }
 0x1fa   :  { %v1902_v15 = vrot.slane %v8460_v38, 3  ;;  %vm1559_vm10 = vmand %vm5776_vm14, %vm8461_vm5  ;;  %v841_v36 = vsel %vm5720_vm7, 1.0, %v8120_v7  ;;  %v6347_v2 = vor.u32 %v2284_v26, %v2282_v10  ;;  %v1905_v27 = vrot.slane %v1903_v21, 4  ;;  %v1789_v10 = vld [vmem:[#allocation2 + $0x48] sm:$0x1f] }
 0x1fb   :  { %v850_v17 = vpack.c.bf16 %v841_v36, %v840_v59  ;;  %v1590_v6 = vsel %vm6314_vm9, 1.0, %v8120_v7  ;;  %v1911_v53 = vrot.slane %v1909_v28, 3  ;;  %v1914_v41 = vrot.slane %v1912_v0, 4  ;;  %2331 = vrot.lane.b32.xlu0 %v2283_v3, %s4421_s8 }
 0x1fc   :  { %v1591_v22 = vsel %vm1559_vm10, 1.0, %v8120_v7  ;;  %v519_v8 = vadd.s32 4294967295, %v5943_v1  ;;  %v1975_v44 = vshll.u32 %v6295_v56, 16  ;;  %v6359_v26 = vor.u32 %v1896_v50, %v6208_v63 }
 0x1fd   :  { %v1906_v14 = vor.u32 %v1905_v27, %v1902_v15  ;;  %v6361_v13 = vrot.slane %v850_v17, 4  ;;  %v1915_v38 = vor.u32 %v1914_v41, %v1911_v53  ;;  %v520_v5 = vadd.s32 4294967295, %v6006_v33  ;;  %v8474_v53 = vld [vmem:[#allocation90_spill] sm:$0xff]  ;;  %2012 = vrot.lane.b32.xlu1 %v6270_v42, %s4420_s7 }
 0x1fe   :  { %vm551_vm1 = vcmp.ge.s32.totalorder %v519_v8, 0  ;;  %vm567_vm7 = vcmp.lt.s32.totalorder %v519_v8, 8  ;;  %v6371_v63 = vrot.slane %v2288_v18, 1  ;;  %v6374_v50 = vor.u32 %v1971_v46, %v6227_v24 }
 0x1ff   :  { %vm8462_vm0 = vsmask.f32 4352  ;;  %v1600_v21 = vpack.c.bf16 %v1591_v22, %v1590_v6  ;;  %vm6378_vm3 = vmand %vm551_vm1, %vm567_vm7  ;;  %v1934_v16 = vmul.bf16 %v1915_v38, %v1789_v10  ;;  %v873_v24 = vsel %vm8466_vm8, %v5878_v60, %v6361_v13  ;;  %2248 = vrot.lane.b32.xlu0 %v1687_v49, %s4419_s26 }
 0x200   :  { %v1907_v15 = vsel %vm8462_vm0, %v6359_v26, %v1906_v14  ;;  %vm8465_vm9 = vmmov %vm8462_vm0  ;;  %vm8467_vm5 = vcmp.lt.s32.totalorder %v5662_v31, 8  ;;  %vm552_vm6 = vcmp.ge.s32.totalorder %v520_v5, 0  ;;  %vm8471_vm1 = vcmp.lt.s32.totalorder %v5977_v45, 8 }
 0x201   :  { %v1916_v28 = vsel %vm8465_vm9, %v1906_v14, %v1915_v38  ;;  %v1932_v0 = vmul.bf16 %v1907_v15, %v6356_v61  ;;  %vm6392_vm10 = vmand %vm5804_vm15, %vm8467_vm5  ;;  %v6407_v31 = vrot.slane %v1975_v44, 1  ;;  %v2369_v6 = vrot.slane %v1934_v16, 1  ;;  %2059 = vrot.lane.b32.xlu1 %v6274_v32, %s4419_s26 }
 0x202   :  { %v1933_v27 = vmul.bf16 %v1916_v28, %v6366_v54  ;;  %vm6403_vm7 = vmand %vm6378_vm3, %vm8471_vm1  ;;  %vm568_vm0 = vcmp.lt.s32.totalorder %v520_v5, 8  ;;  %vm8475_vm9 = vcmp.lt.s32.totalorder %v8474_v53, 8  ;;  %v6422_v10 = vmul.bf16 %v873_v24, %v6189_v9 }
 0x203   :  { %v6409_v17 = vrot.slane %v1932_v0, 1  ;;  %vm6415_vm8 = vmand %vm5819_vm2, %vm8475_vm9  ;;  %v1656_v44 = vshrl.u32 %v1600_v21, 16  ;;  %v1659_v14 = vshll.u32 %v1600_v21, 16  ;;  %v2753_v38 = vshrl.u32 %v2369_v6, 16  ;;  %2246 = vrot.lane.b32.xlu0 %v1686_v4, %s4419_s26 }
 0x204   :  { %v2367_v8 = vrot.slane %v1933_v27, 1  ;;  %vm6424_vm5 = vmand %vm552_vm6, %vm568_vm0  ;;  %v2756_v5 = vshll.u32 %v2369_v6, 16  ;;  %vm8481_vm1 = vcmp.lt.s32.totalorder %v6023_v43, 8  ;;  %v989_v42 = vsel %vm6403_vm7, 1.0, %v8120_v7 }
 0x205   :  { %vm974_vm9 = vmand %vm6424_vm5, %vm8481_vm1  ;;  %v1386_v15 = vsel %vm6392_vm10, 1.0, %v8120_v7  ;;  %vm8482_vm6 = vcmask 1046528   ;;  %v1387_v28 = vsel %vm6415_vm8, 1.0, %v8120_v7  ;;  %v2755_v46 = vrot.slane %v2753_v38, 3  ;;  %2103 = vrot.lane.b32.xlu1 %v6280_v40, %s4421_s8 }
 0x206   :  { %v2368_v21 = vsel %vm8482_vm6, %v6409_v17, %v2367_v8  ;;  %vm8483_vm0 = vmmov %vm8482_vm6  ;;  %v990_v49 = vsel %vm974_vm9, 1.0, %v8120_v7  ;;  %v2758_v60 = vrot.slane %v2756_v5, 4  ;;  %v1658_v53 = vrot.slane %v1656_v44, 4 }
 0x207   :  { %v2370_v39 = vsel %vm8483_vm0, %v2367_v8, %v2369_v6  ;;  %v2703_v0 = vshrl.u32 %v2368_v21, 16  ;;  %v2706_v16 = vshll.u32 %v2368_v21, 16  ;;  %v1661_v3 = vrot.slane %v1659_v14, 5  ;;  %2219 = vrot.lane.b32.xlu0 %v6283_v37, %s4420_s7 }
 0x208   :  { %v2728_v24 = vshrl.u32 %v2370_v39, 16  ;;  %v2731_v27 = vshll.u32 %v2370_v39, 16  ;;  %v2759_v41 = vor.u32 %v2758_v60, %v2755_v46  ;;  %v998_v21 = vpack.c.bf16 %v990_v49, %v989_v42 }
 0x209   :  { %v2705_v6 = vrot.slane %v2703_v0, 3  ;;  %v2708_v8 = vrot.slane %v2706_v16, 4  ;;  %v1396_v18 = vpack.c.bf16 %v1387_v28, %v1386_v15  ;;  %v6456_v39 = vadd.s32 4294967295, %v5917_v19  ;;  %2061 = vrot.lane.b32.xlu1 %v6291_v20, %s4419_s26 }
 0x20a   :  { %v2730_v22 = vrot.slane %v2728_v24, 3  ;;  %v2733_v36 = vrot.slane %v2731_v27, 4  ;;  %v6461_v44 = vadd.s32 4294967295, %v5932_v58  ;;  %v1063_v29 = vshrl.u32 %v998_v21, 16 }
 0x20b   :  { %v6458_v32 = vor.u32 %v2708_v8, %v2705_v6  ;;  %v1066_v35 = vshll.u32 %v998_v21, 16  ;;  %v1447_v4 = vshrl.u32 %v1396_v18, 16  ;;  %v1450_v14 = vshll.u32 %v1396_v18, 16  ;;  %2221 = vrot.lane.b32.xlu0 %v6326_v48, %s4420_s7  ;;  %v8504_v8 = vld [vmem:[#allocation97_spill] sm:$0xff] }
 0x20c   :  { %v2734_v38 = vor.u32 %v2733_v36, %v2730_v22  ;;  %vm8484_vm7 = vsmask.f32 4352  ;;  %vm7999_vm1 = vcmp.ge.s32.totalorder %v6456_v39, 0  ;;  %vm8486_vm6 = vcmask 261120  }
 0x20d   :  { %vm8485_vm8 = vmmov %vm8484_vm7  ;;  %v1065_v42 = vrot.slane %v1063_v29, 3  ;;  %v1068_v40 = vrot.slane %v1066_v35, 4  ;;  %v6474_v15 = vrot.slane %v1447_v4, 7  ;;  %vm1122_vm9 = vcmp.lt.s32.totalorder %v6006_v33, 8  ;;  %2105 = vrot.lane.b32.xlu1 %v6340_v55, %s4421_s8 }
 0x20e   :  { %v2735_v5 = vsel %vm8484_vm7, %v6458_v32, %v2734_v38  ;;  %v2760_v36 = vsel %vm8485_vm8, %v2734_v38, %v2759_v41  ;;  %vm6481_vm10 = vmand %vm6202_vm4, %vm7999_vm1  ;;  %vm8489_vm7 = vsmask.f32 7424  ;;  %v1736_v41 = vsel %vm5761_vm12, 1.0, %v8120_v7 }
 0x20f   :  { %4206 = vmatprep.mubr.msk.bf16.mxu1 %vm8486_vm6, %v2735_v5  ;;  %v2291_v18 = vsel %vm8489_vm7, %v6347_v2, %v6371_v63  ;;  %vm8490_vm8 = vmmov %vm8486_vm6  ;;  %vm1121_vm6 = vcmp.lt.s32.totalorder %v5943_v1, 8  ;;  %vm8491_vm0 = vcmp.ge.s32.totalorder %v6461_v44, 0  ;;  %v1979_v2 = vshrl.u32 %v6295_v56, 16 }
 0x210   :  { %4207 = vmatmul.mubr.msk.bf16.vlgmr.msra.gmra.mrb[16].mxu1 %vm8490_vm8, %v2760_v36  ;;  %vm6498_vm1 = vmand %vm6219_vm13, %vm8491_vm0  ;;  %v6505_v28 = vor.u32 %v1068_v40, %v1065_v42  ;;  %v1452_v0 = vor.u32 %v1450_v14, %v6474_v15  ;;  %vm8494_vm7 = vcmp.ge.s32.totalorder %v5943_v1, 0  ;;  %v1737_v16 = vsel %vm5776_vm14, 1.0, %v8120_v7  ;;  %2333 = vrot.lane.b32.xlu0 %v2291_v18, %s4421_s8  ;;  %v8510_v14 = vld [vmem:[#allocation94_spill] sm:$0xff] }
 0x211   :  { %vm6510_vm12 = vmand %vm8494_vm7, %vm1121_vm6  ;;  %v6519_v20 = vor.u32 %v1661_v3, %v1658_v53  ;;  %vm8497_vm0 = vcmp.ge.s32.totalorder %v6006_v33, 0  ;;  %v1746_v24 = vpack.c.bf16 %v1737_v16, %v1736_v41  ;;  %v842_v27 = vsel %vm6378_vm3, 1.0, %v8120_v7  ;;  %v8517_v16 = vld [vmem:[#allocation99_spill] sm:$0xff] }
 0x212   :  { %vm6523_vm8 = vmand %vm8497_vm0, %vm1122_vm9  ;;  %v843_v57 = vsel %vm6424_vm5, 1.0, %v8120_v7  ;;  %v8500_v48 = vshrl.u32 %v6252_v23, 16  ;;  %v8501_v46 = vshll.u32 %v6308_v11, 16  ;;  %v1983_v53 = vshll.u32 %v6422_v10, 16 }
 0x213   :  { %vm8502_vm14 = vsmask.f32 4352  ;;  %vm8503_vm9 = vcmp.ge.s32.totalorder %v6456_v39, 0  ;;  %vm8505_vm7 = vsmask.f32 256  ;;  %vm8506_vm0 = vcmp.ge.s32.totalorder %v6461_v44, 0 }
 0x214   :  { %v2294_v3 = vor.u32 %v8500_v48, %v6371_v63  ;;  %v6538_v60 = vrot.slane %v8501_v46, 1  ;;  %v1070_v6 = vsel %vm8502_vm14, %v5876_v25, %v6505_v28  ;;  %vm1153_vm6 = vmand %vm6510_vm12, %vm8503_vm9  ;;  %v1453_v22 = vsel %vm8505_vm7, %v8504_v8, %v1452_v0  ;;  %v8507_v63 = vld [vmem:[#allocation98_spill] sm:$0xff]  ;;  %v894_v8 = vld [vmem:[#allocation2 + $0x40] sm:$0x1f] }
 0x215   :  { %vm1154_vm2 = vmand %vm6523_vm8, %vm8506_vm0  ;;  %v1185_v23 = vsel %vm1153_vm6, 1.0, %v8120_v7  ;;  %v1248_v21 = vshrl.u32 %v8507_v63, 16  ;;  %v6556_v38 = vrot.slane %v1746_v24, 4  ;;  %vm8508_vm14 = vsmask.f32 7424 }
 0x216   :  { %v1978_v25 = vsel %vm8508_vm14, %v6374_v50, %v6407_v31  ;;  %v1981_v29 = vor.u32 %v1979_v2, %v6407_v31  ;;  %v1186_v35 = vsel %vm1154_vm2, 1.0, %v8120_v7  ;;  %vm8509_vm9 = vcmp.lt.s32.totalorder %v5977_v45, 8 }
 0x217   :  { %vm1372_vm6 = vmand %vm6510_vm12, %vm8509_vm9  ;;  %v851_v4 = vpack.c.bf16 %v843_v57, %v842_v27  ;;  %vm8511_vm7 = vsmask.f32 3328  ;;  %v1087_v5 = vmul.bf16 %v1070_v6, %v6356_v61  ;;  %v1194_v36 = vpack.c.bf16 %v1186_v35, %v1185_v23  ;;  %2014 = vrot.lane.b32.xlu1 %v1978_v25, %s4420_s7 }
 0x218   :  { %v1663_v55 = vsel %vm8511_vm7, %v8510_v14, %v6519_v20  ;;  %vm8512_vm0 = vcmp.lt.s32.totalorder %v6023_v43, 8  ;;  %v1388_v45 = vsel %vm1372_vm6, 1.0, %v8120_v7  ;;  %v6579_v50 = vrot.slane %v1983_v53, 1  ;;  %v8516_v43 = vld [vmem:[#allocation104_spill] sm:$0xff] }
 0x219   :  { %vm1373_vm2 = vmand %vm6523_vm8, %vm8512_vm0  ;;  %v1477_v31 = vmul.bf16 %v1453_v22, %v6356_v61  ;;  %v6583_v40 = vrot.slane %v851_v4, 4  ;;  %vm8513_vm14 = vcmp.ge.s32.totalorder %v6456_v39, 0  ;;  %v1250_v41 = vor.u32 %v1248_v21, %v8516_v43 }
 0x21a   :  { %v1389_v42 = vsel %vm1373_vm2, 1.0, %v8120_v7  ;;  %vm6589_vm9 = vmand %vm6378_vm3, %vm8513_vm14  ;;  %v1252_v2 = vshll.u32 %v1194_v36, 16  ;;  %vm8518_vm6 = vcmask 1043456   ;;  %vm8519_vm7 = vcmp.ge.s32.totalorder %v6461_v44, 0 }
 0x21b   :  { %v1397_v0 = vpack.c.bf16 %v1389_v42, %v1388_v45  ;;  %v1768_v24 = vsel %vm8518_vm6, %v8517_v16, %v6556_v38  ;;  %vm6601_vm0 = vmand %vm6424_vm5, %vm8519_vm7  ;;  %vm8522_vm3 = vsmask.f32 7424  ;;  %v1688_v57 = vmul.bf16 %v1663_v55, %v6356_v61 }
 0x21c   :  { %v2299_v59 = vsel %vm8522_vm3, %v2294_v3, %v6538_v60  ;;  %vm8523_vm2 = vmmov %vm8522_vm3  ;;  %v1592_v44 = vsel %vm6481_vm10, 1.0, %v8120_v7  ;;  %v2047_v62 = vrot.slane %v1087_v5, 1  ;;  %v1254_v48 = vrot.slane %v1252_v2, 1 }
 0x21d   :  { %v1986_v27 = vsel %vm8523_vm2, %v1981_v29, %v6579_v50  ;;  %2335 = vrot.lane.b32.xlu0 %v2299_v59, %s4421_s8  ;;  %v1455_v46 = vshrl.u32 %v1397_v0, 16  ;;  %v1458_v53 = vshll.u32 %v1397_v0, 16  ;;  %v2205_v6 = vrot.slane %v1477_v31, 5  ;;  %vm8524_vm5 = vmmov %vm8518_vm6 }
 0x21e   :  { %v1786_v22 = vmul.bf16 %v1768_v24, %v6356_v61  ;;  %v875_v3 = vsel %vm8524_vm5, %v6361_v13, %v6583_v40  ;;  %v1593_v23 = vsel %vm6498_vm1, 1.0, %v8120_v7  ;;  %vm8525_vm14 = vmmov %vm8523_vm2  ;;  %v1738_v25 = vsel %vm6202_vm4, 1.0, %v8120_v7  ;;  %2016 = vrot.lane.b32.xlu1 %v1986_v27, %s4420_s7 }
 0x21f   :  { %v1255_v37 = vsel %vm8525_vm14, %v1250_v41, %v1254_v48  ;;  %v6623_v63 = vrot.slane %v1455_v46, 7  ;;  %v1601_v21 = vpack.c.bf16 %v1593_v23, %v1592_v44  ;;  %v2300_v35 = vshrl.u32 %v6308_v11, 16  ;;  %vm8529_vm1 = vmmov %vm8524_vm5 }
 0x220   :  { %v1275_v29 = vmul.bf16 %v1255_v37, %v6356_v61  ;;  %v1739_v13 = vsel %vm6219_vm13, 1.0, %v8120_v7  ;;  %v1088_v4 = vmul.bf16 %v6505_v28, %v894_v8  ;;  %vm8526_vm4 = vcmask 1046528   ;;  %vm8530_vm6 = vmmov %vm8529_vm1 }
 0x221   :  { %2250 = vrot.lane.b32.xlu0 %v1688_v57, %s4419_s26  ;;  %v1460_v49 = vor.u32 %v1458_v53, %v6623_v63  ;;  %v1665_v14 = vshrl.u32 %v1601_v21, 16  ;;  %v1668_v55 = vshll.u32 %v1601_v21, 16  ;;  %v2048_v34 = vsel %vm8526_vm4, %v6231_v51, %v2047_v62  ;;  %v6665_v53 = vld [vmem:[#allocation2 + $0x40] sm:$0xf]  ;;  %vm8532_vm3 = vmmov %vm8526_vm4 }
 0x222   :  { %v892_v5 = vmul.bf16 %v875_v3, %v6356_v61  ;;  %v1256_v45 = vshrl.u32 %v1194_v36, 16  ;;  %v1747_v31 = vpack.c.bf16 %v1739_v13, %v1738_v25  ;;  %vm8527_vm10 = vcmask 1042432   ;;  %2063 = vrot.lane.b32.xlu1 %v2048_v34, %s4419_s26  ;;  %vm8534_vm14 = vmmov %vm8523_vm2  ;;  %v1341_v34 = vld [vmem:[#allocation2 + $0x48] sm:$0x1] }
 0x223   :  { %v2206_v11 = vsel %vm8527_vm10, %v6276_v30, %v2205_v6  ;;  %v2091_v12 = vrot.slane %v1275_v29, 4  ;;  %vm8528_vm13 = vsmask.f32 256  ;;  %v2304_v43 = vshll.u32 %v1786_v22, 16  ;;  %vm8531_vm7 = vmmov %vm8527_vm10 }
 0x224   :  { %v1461_v42 = vsel %vm8528_vm13, %v6474_v15, %v1460_v49  ;;  %v1667_v41 = vrot.slane %v1665_v14, 4  ;;  %v1670_v2 = vrot.slane %v1668_v55, 5  ;;  %v1769_v0 = vrot.slane %v1747_v31, 4  ;;  %v8537_v14 = vld [vmem:[#allocation26_spill] sm:$0xff]  ;;  %vm8539_vm13 = vmmov %vm8529_vm1 }
 0x225   :  { %v1478_v28 = vmul.bf16 %v1461_v42, %v6366_v54  ;;  %2223 = vrot.lane.b32.xlu0 %v2206_v11, %s4420_s7  ;;  %v1987_v51 = vshrl.u32 %v6422_v10, 16  ;;  %v1991_v36 = vshll.u32 %v892_v5, 16  ;;  %v1258_v16 = vor.u32 %v1256_v45, %v1254_v48  ;;  %v6660_v48 = vld [vmem:[#allocation2 + $0x48] sm:$0xf] }
 0x226   :  { %v1770_v30 = vsel %vm8529_vm1, %v6556_v38, %v1769_v0  ;;  %v2092_v15 = vsel %vm8530_vm6, %v6285_v52, %v2091_v12  ;;  %v6652_v24 = vrot.slane %v1088_v4, 1  ;;  %v2302_v59 = vor.u32 %v2300_v35, %v6538_v60  ;;  %vm8540_vm1 = vmmov %vm8523_vm2 }
 0x227   :  { %v2207_v61 = vrot.slane %v1478_v28, 5  ;;  %2107 = vrot.lane.b32.xlu1 %v2092_v15, %s4421_s8  ;;  %v2306_v57 = vrot.slane %v2304_v43, 1  ;;  %v6657_v44 = vor.u32 %v1670_v2, %v1667_v41  ;;  %v1787_v10 = vmul.bf16 %v1770_v30, %v6366_v54  ;;  %vm8541_vm6 = vmmov %vm8540_vm1 }
 0x228   :  { %v1989_v38 = vor.u32 %v1987_v51, %v6579_v50  ;;  %v1993_v52 = vrot.slane %v1991_v36, 1  ;;  %v1276_v46 = vmul.bf16 %v1258_v16, %v6366_v54  ;;  %v2050_v60 = vsel %vm8532_vm3, %v2047_v62, %v6652_v24  ;;  %v8543_v51 = vld [vmem:[#allocation39_spill] sm:$0xff]  ;;  %v8545_v16 = vld [vmem:[#allocation40_spill] sm:$0xff] }
 0x229   :  { %v2208_v27 = vsel %vm8531_vm7, %v2205_v6, %v2207_v61  ;;  %v2308_v6 = vshrl.u32 %v1786_v22, 16  ;;  %v1788_v8 = vmul.bf16 %v1769_v0, %v6660_v48  ;;  %v2307_v3 = vsel %vm8523_vm2, %v2302_v59, %v2306_v57  ;;  %vm8542_vm7 = vmmov %vm8540_vm1 }
 0x22a   :  { %2225 = vrot.lane.b32.xlu0 %v2208_v27, %s4420_s7  ;;  %vm8533_vm5 = vsmask.f32 3328  ;;  %v2312_v50 = vshll.u32 %v1787_v10, 16  ;;  %v893_v37 = vmul.bf16 %v6583_v40, %v6665_v53  ;;  %v1994_v21 = vsel %vm8534_vm14, %v1989_v38, %v1993_v52  ;;  %v8548_v27 = vld [vmem:[#allocation25_spill] sm:$0xff] }
 0x22b   :  { %2065 = vrot.lane.b32.xlu1 %v2050_v60, %s4419_s26  ;;  %v1672_v23 = vsel %vm8533_vm5, %v6519_v20, %v6657_v44  ;;  %v2093_v62 = vrot.slane %v1276_v46, 4  ;;  %v2310_v25 = vor.u32 %v2308_v6, %v2306_v57  ;;  %v1995_v29 = vshrl.u32 %v892_v5, 16  ;;  %v8535_v20 = vld [vmem:[#allocation24_spill] sm:$0xff]  ;;  %v8554_v46 = vld [vmem:[#allocation34_spill] sm:$0xff]  ;;  %v8556_v60 = vld [vmem:[#allocation41_spill] sm:$0xff] }
 0x22c   :  { %v1689_v22 = vmul.bf16 %v1672_v23, %v6366_v54  ;;  %v2320_v35 = vshll.u32 %v1788_v8, 16  ;;  %v2314_v13 = vrot.slane %v2312_v50, 1  ;;  %v2316_v49 = vshrl.u32 %v1787_v10, 16  ;;  %v8550_v57 = vld [vmem:[#allocation32_spill] sm:$0xff]  ;;  %v8558_v6 = vld [vmem:[#allocation105_spill] sm:$0xff]  ;;  %v8559_v23 = vld [vmem:[#allocation42_spill] sm:$0xff] }
 0x22d   :  { %vm8536_vm4 = vnez %v8535_v20  ;;  %vm8538_vm10 = vnez %v8537_v14  ;;  %v1999_v55 = vshll.u32 %v893_v37, 16  ;;  %v2094_v5 = vsel %vm8539_vm13, %v2091_v12, %v2093_v62 }
 0x22e   :  { %2337 = vrot.lane.b32.xlu0 %v2307_v3, %s4421_s8  ;;  %v651_v4 = vsel %vm8536_vm4, 1.0, %v8120_v7  ;;  %v652_v40 = vsel %vm8538_vm10, 1.0, %v8120_v7  ;;  %v1997_v45 = vor.u32 %v1995_v29, %v1993_v52  ;;  %v2315_v31 = vsel %vm8540_vm1, %v2310_v25, %v2314_v13  ;;  %v8552_v52 = vld [vmem:[#allocation27_spill] sm:$0xff] }
 0x22f   :  { %2018 = vrot.lane.b32.xlu1 %v1994_v21, %s4420_s7  ;;  %v6688_v54 = vpack.c.bf16 %v652_v40, %v651_v4  ;;  %v2318_v11 = vor.u32 %v2316_v49, %v2314_v13  ;;  %v2322_v42 = vrot.slane %v2320_v35, 1  ;;  %v1479_v43 = vmul.bf16 %v6623_v63, %v1341_v34  ;;  %v8565_v13 = vld [vmem:[#allocation64_spill] sm:$0xff] }
 0x230   :  { %v2001_v28 = vrot.slane %v1999_v55, 1  ;;  %v2003_v41 = vshrl.u32 %v893_v37, 16  ;;  %vm8544_vm3 = vnez %v8543_v51  ;;  %vm8546_vm2 = vnez %v8545_v16  ;;  %v6754_v51 = vld [vmem:[#allocation2 + $0x10] sm:$0xff] }
 0x231   :  { %v2323_v0 = vsel %vm8542_vm7, %v2318_v11, %v2322_v42  ;;  %v2209_v12 = vrot.slane %v1479_v43, 5  ;;  %v1309_v36 = vsel %vm8544_vm3, 1.0, %v8120_v7  ;;  %v1310_v63 = vsel %vm8546_vm2, 1.0, %v8120_v7 }
 0x232   :  { %2252 = vrot.lane.b32.xlu0 %v1689_v22, %s4419_s26  ;;  %v2002_v2 = vsel %vm8541_vm6, %v1997_v45, %v2001_v28  ;;  %v2005_v30 = vor.u32 %v2003_v41, %v2001_v28  ;;  %vm8547_vm5 = vcmask 1042432   ;;  %v1325_v59 = vpack.c.bf16 %v1310_v63, %v1309_v36  ;;  %v8571_v63 = vld [vmem:[#allocation81_spill] sm:$0xff] }
 0x233   :  { %2109 = vrot.lane.b32.xlu1 %v2094_v5, %s4421_s8  ;;  %v2210_v15 = vsel %vm8547_vm5, %v2207_v61, %v2209_v12  ;;  %vm8549_vm14 = vcmp.ge.s32.totalorder %v8548_v27, 0  ;;  %vm8551_vm4 = vnez %v8550_v57  ;;  %v1690_v10 = vmul.bf16 %v6657_v44, %v6660_v48 }
 0x234   :  { %vm601_vm10 = vmand %vm8551_vm4, %vm8549_vm14  ;;  %v2324_v38 = vshrl.u32 %v1788_v8, 16  ;;  %vm8553_vm13 = vcmp.ge.s32.totalorder %v8552_v52, 0  ;;  %vm8555_vm1 = vnez %v8554_v46  ;;  %vm8557_vm7 = vnez %v8556_v60  ;;  %v8561_v8 = vld [vmem:[#allocation33_spill] sm:$0xff] }
 0x235   :  { %vm602_vm6 = vmand %vm8555_vm1, %vm8553_vm13  ;;  %v1311_v61 = vsel %vm8557_vm7, 1.0, %v8120_v7  ;;  %v1333_v3 = vmul.bf16 %v1325_v59, %v8558_v6  ;;  %vm8560_vm3 = vnez %v8559_v23  ;;  %v649_v44 = vsel %vm601_vm10, 1.0, %v8120_v7 }
 0x236   :  { %2339 = vrot.lane.b32.xlu0 %v2315_v31, %s4421_s8  ;;  %v1312_v50 = vsel %vm8560_vm3, 1.0, %v8120_v7  ;;  %v650_v48 = vsel %vm602_vm6, 1.0, %v8120_v7  ;;  %v1855_v37 = vshrl.u32 %v8561_v8, 16  ;;  %v2326_v21 = vor.u32 %v2324_v38, %v2322_v42  ;;  %v8566_v31 = vld [vmem:[#allocation107_spill] sm:$0xff] }
 0x237   :  { %2020 = vrot.lane.b32.xlu1 %v2002_v2, %s4420_s7  ;;  %v657_v25 = vsel %vm5903_vm11, 1.0, %v8120_v7  ;;  %v1858_v35 = vshll.u32 %v8561_v8, 16  ;;  %v1873_v49 = vshrl.u32 %v8565_v13, 16  ;;  %v1876_v20 = vshll.u32 %v8565_v13, 16  ;;  %v8568_v2 = vld [vmem:[#allocation68_spill] sm:$0xff]  ;;  %v8573_v38 = vld [vmem:[#allocation43_spill] sm:$0xff] }
 0x238   :  { %v1326_v14 = vpack.c.bf16 %v1312_v50, %v1311_v61  ;;  %v665_v40 = vpack.c.bf16 %v650_v48, %v649_v44  ;;  %v2114_v55 = vshrl.u32 %v1333_v3, 16  ;;  %v1857_v34 = vrot.slane %v1855_v37, 3  ;;  %v8575_v44 = vld [vmem:[#allocation109_spill] sm:$0xff]  ;;  %v8577_v8 = vld [vmem:[#allocation58_spill] sm:$0xff] }
 0x239   :  { %v2117_v5 = vshll.u32 %v1333_v3, 16  ;;  %vm8567_vm11 = vnez %v8566_v31  ;;  %v1860_v42 = vrot.slane %v1858_v35, 4  ;;  %v6745_v43 = vrot.slane %v1873_v49, 3 }
 0x23a   :  { %2341 = vrot.lane.b32.xlu0 %v2323_v0, %s4421_s8  ;;  %v659_v11 = vsel %vm8567_vm11, 1.0, %v8120_v7  ;;  %v6747_v28 = vrot.slane %v1876_v20, 4  ;;  %v8569_v0 = vld [vmem:[#allocation106_spill] sm:$0xff]  ;;  %v1334_v36 = vmul.bf16 %v6754_v51, %v1326_v14  ;;  %v675_v16 = vshrl.u32 %v665_v40, 16  ;;  %v8579_v20 = vld [vmem:[#allocation44_spill] sm:$0xff] }
 0x23b   :  { %2022 = vrot.lane.b32.xlu1 %v2005_v30, %s4420_s7  ;;  %v8570_v12 = vmul.bf16 %v8568_v2, %v8569_v0  ;;  %vm8572_vm5 = vnez %v8571_v63  ;;  %v678_v59 = vshll.u32 %v665_v40, 16  ;;  %v6763_v57 = vsel %vm6510_vm12, 1.0, %v8120_v7 }
 0x23c   :  { %v660_v30 = vsel %vm8572_vm5, 1.0, %v8120_v7  ;;  %vm8574_vm14 = vnez %v8573_v38  ;;  %v6771_v60 = vsel %vm6523_vm8, 1.0, %v8120_v7  ;;  %v2122_v47 = vshrl.u32 %v1334_v36, 16 }
 0x23d   :  { %v670_v27 = vpack.c.bf16 %v660_v30, %v659_v11  ;;  %v1313_v52 = vsel %vm8574_vm14, 1.0, %v8120_v7  ;;  %v2125_v50 = vshll.u32 %v1334_v36, 16  ;;  %vm8576_vm12 = vnez %v8575_v44 }
 0x23e   :  { %2227 = vrot.lane.b32.xlu0 %v2210_v15, %s4420_s7  ;;  %v2116_v15 = vrot.slane %v2114_v55, 4  ;;  %v661_v48 = vsel %vm8576_vm12, 1.0, %v8120_v7  ;;  %vm8578_vm4 = vnez %v8577_v8  ;;  %v680_v56 = vrot.slane %v678_v59, 5 }
 0x23f   :  { %2067 = vrot.lane.b32.xlu1 %v6652_v24, %s4419_s26  ;;  %v8563_v24 = vld [vmem:[#allocation102_spill] sm:$0xff]  ;;  %v719_v6 = vshrl.u32 %v670_v27, 16  ;;  %v722_v3 = vshll.u32 %v670_v27, 16  ;;  %v662_v37 = vsel %vm8578_vm4, 1.0, %v8120_v7  ;;  %v663_v13 = vsel %vm6589_vm9, 1.0, %v8120_v7 }
 0x240   :  { %vm8564_vm2 = vnez %v8563_v24  ;;  %v683_v24 = vshrl.u32 %v6688_v54, 16  ;;  %v671_v35 = vpack.c.bf16 %v662_v37, %v661_v48  ;;  %vm8580_vm8 = vnez %v8579_v20  ;;  %v8591_v48 = vld [vmem:[#allocation57_spill] sm:$0xff]  ;;  %v8593_v37 = vld [vmem:[#allocation38_spill] sm:$0xff] }
 0x241   :  { %v658_v29 = vsel %vm8564_vm2, 1.0, %v8120_v7  ;;  %v721_v22 = vrot.slane %v719_v6, 4  ;;  %v6786_v49 = vpop.permute.xlu1 %2240  ;;  %v664_v55 = vsel %vm6601_vm0, 1.0, %v8120_v7  ;;  %v2127_v11 = vrot.slane %v2125_v50, 5  ;;  %v8584_v6 = vld [vmem:[#allocation37_spill] sm:$0xff]  ;;  %v8590_v50 = vld [vmem:[#allocation63_spill] sm:$0xff] }
 0x242   :  { %2254 = vrot.lane.b32.xlu0 %v1690_v10, %s4419_s26  ;;  %v669_v4 = vpack.c.bf16 %v658_v29, %v657_v25  ;;  %v2119_v10 = vrot.slane %v2117_v5, 5  ;;  %v724_v25 = vrot.slane %v722_v3, 5  ;;  %v686_v29 = vshll.u32 %v6688_v54, 16  ;;  %v6796_v5 = vpop.permute.xlu0 %2238  ;;  %v8586_v3 = vld [vmem:[#allocation35_spill] sm:$0xff] }
 0x243   :  { %2111 = vrot.lane.b32.xlu1 %v2093_v62, %s4421_s8  ;;  %v6752_v62 = vrot.slane %v8570_v12, 1  ;;  %v728_v18 = vshrl.u32 %v671_v35, 16  ;;  %v731_v31 = vshll.u32 %v671_v35, 16  ;;  %vm8581_vm9 = vsmask.f32 3328 }
 0x244   :  { %v710_v45 = vshrl.u32 %v669_v4, 16  ;;  %v713_v41 = vshll.u32 %v669_v4, 16  ;;  %v1314_v4 = vsel %vm8580_vm8, 1.0, %v8120_v7  ;;  %v725_v40 = vor.u32 %v724_v25, %v721_v22  ;;  %v6834_v25 = vld [vmem:[#allocation2 + $0x18] sm:$0xff]  ;;  %vm8597_vm11 = vmmov %vm8581_vm9 }
 0x245   :  { %v6798_v54 = vor.u32 %v2119_v10, %v2116_v15  ;;  %v672_v12 = vpack.c.bf16 %v664_v55, %v663_v13  ;;  %v685_v36 = vrot.slane %v683_v24, 4  ;;  %v730_v63 = vrot.slane %v728_v18, 4  ;;  %v6806_v30 = vpop.permute.xlu1 %2053  ;;  %vm8606_vm8 = vmmov %vm8581_vm9 }
 0x246   :  { %2343 = vrot.lane.b32.xlu0 %v2326_v21, %s4421_s8  ;;  %v712_v46 = vrot.slane %v710_v45, 4  ;;  %v715_v61 = vrot.slane %v713_v41, 5  ;;  %v677_v21 = vrot.slane %v675_v16, 4  ;;  %v2124_v45 = vrot.slane %v2122_v47, 4  ;;  %v6808_v38 = vpop.permute.xlu0 %2211 }
 0x247   :  { %v1327_v16 = vpack.c.bf16 %v1314_v4, %v1313_v52  ;;  %v733_v39 = vrot.slane %v731_v31, 5  ;;  %v688_v59 = vrot.slane %v686_v29, 5  ;;  %v737_v15 = vshrl.u32 %v672_v12, 16  ;;  %v6844_v4 = vld [vmem:[#allocation2] sm:$0xf8] }
 0x248   :  { %v6791_v14 = vor.u32 %v715_v61, %v712_v46  ;;  %v6800_v41 = vor.u32 %v680_v56, %v677_v21  ;;  %v740_v27 = vshll.u32 %v672_v12, 16  ;;  %v1861_v10 = vor.u32 %v1860_v42, %v1857_v34  ;;  %v8582_v46 = vld [vmem:[#allocation56_spill] sm:$0xff] }
 0x249   :  { %vm8583_vm0 = vnez %v8582_v46  ;;  %vm8585_vm10 = vcmp.ge.s32.totalorder %v8584_v6, 0  ;;  %vm8587_vm13 = vnez %v8586_v3  ;;  %v734_v47 = vor.u32 %v733_v39, %v730_v63  ;;  %v8595_v21 = vld [vmem:[#allocation36_spill] sm:$0xff]  ;;  %v6842_v20 = vpop.permute.xlu1 %2097 }
 0x24a   :  { %v6804_v0 = vsel %vm8581_vm9, %v6791_v14, %v725_v40  ;;  %v6813_v61 = vsel %vm8583_vm0, 1.0, %v8120_v7  ;;  %vm6819_vm1 = vmand %vm8587_vm13, %vm8585_vm10  ;;  %v1864_v44 = vshrl.u32 %v8590_v50, 16  ;;  %v1867_v34 = vshll.u32 %v8590_v50, 16  ;;  %v8599_v12 = vld [vmem:[#allocation88_spill] sm:$0xff] }
 0x24b   :  { %v6825_v42 = vor.u32 %v2127_v11, %v2124_v45  ;;  %vm8592_vm6 = vnez %v8591_v48  ;;  %vm8594_vm7 = vcmp.ge.s32.totalorder %v8593_v37, 0  ;;  %vm8596_vm3 = vnez %v8595_v21  ;;  %v8609_v21 = vld [vmem:[#allocation55_spill] sm:$0xff] }
 0x24c   :  { %v1316_v8 = vsel %vm8592_vm6, 1.0, %v8120_v7  ;;  %vm606_vm2 = vmand %vm8596_vm3, %vm8594_vm7  ;;  %v739_v56 = vrot.slane %v737_v15, 4  ;;  %v742_v22 = vrot.slane %v740_v27, 5  ;;  %v1335_v24 = vmul.bf16 %v6834_v25, %v1327_v16  ;;  %v6852_v11 = vpop.permute.xlu0 %2213  ;;  %v8600_v15 = vld [vmem:[#allocation54_spill] sm:$0xff]  ;;  %v8602_v27 = vld [vmem:[#allocation49_spill] sm:$0xff] }
 0x24d   :  { %v6838_v29 = vsel %vm8597_vm11, %v725_v40, %v734_v47  ;;  %vm8598_vm5 = vsmask.f32 4352  ;;  %v1866_v13 = vrot.slane %v1864_v44, 3  ;;  %v653_v55 = vsel %vm6819_vm1, 1.0, %v8120_v7  ;;  %vm8616_vm7 = vmmov %vm8606_vm8 }
 0x24e   :  { %v1862_v35 = vsel %vm8598_vm5, %v8568_v2, %v1861_v10  ;;  %v6849_v45 = vor.u32 %v742_v22, %v739_v56  ;;  %v1869_v18 = vrot.slane %v1867_v34, 4  ;;  %v654_v40 = vsel %vm606_vm2, 1.0, %v8120_v7  ;;  %vm8607_vm9 = vmmov %vm8598_vm5  ;;  %v8611_v56 = vld [vmem:[#allocation50_spill] sm:$0xff] }
 0x24f   :  { %v1927_v31 = vmul.bf16 %v6754_v51, %v1862_v35  ;;  %v1879_v2 = vor.u32 %v6747_v28, %v6745_v43  ;;  %v1882_v16 = vshrl.u32 %v8599_v12, 16  ;;  %v1885_v63 = vshll.u32 %v8599_v12, 16  ;;  %v2007_v50 = vpop.permute.xlu1 %2006  ;;  %vm8608_vm0 = vmmov %vm8598_vm5  ;;  %v6896_v35 = vld [vmem:[#allocation2 + $0x20] sm:$0xff] }
 0x250   :  { %v6859_v39 = vor.u32 %v688_v59, %v685_v36  ;;  %vm8601_vm14 = vcmp.ge.s32.totalorder %v8600_v15, 0  ;;  %vm8603_vm12 = vnez %v8602_v27  ;;  %v6871_v6 = vsel %vm8606_vm8, %v734_v47, %v6849_v45  ;;  %v6880_v47 = vpop.permute.xlu0 %2051  ;;  %vm8617_vm3 = vmmov %vm8616_vm7 }
 0x251   :  { %vm6865_vm4 = vmand %vm8603_vm12, %vm8601_vm14  ;;  %v1870_v28 = vor.u32 %v1869_v18, %v1866_v13  ;;  %v754_v36 = vmul.bf16 %v6800_v41, %v6844_v4  ;;  %v1328_v59 = vpack.c.bf16 %v1316_v8, %v6813_v61  ;;  %v2355_v3 = vrot.slane %v1927_v31, 1 }
 0x252   :  { %v1884_v52 = vrot.slane %v1882_v16, 3  ;;  %v667_v44 = vpack.c.bf16 %v654_v40, %v653_v55  ;;  %v1887_v37 = vrot.slane %v1885_v63, 4  ;;  %vm8610_vm10 = vcmp.ge.s32.totalorder %v8609_v21, 0  ;;  %vm8618_vm5 = vmmov %vm8608_vm0 }
 0x253   :  { %v1871_v34 = vsel %vm8607_vm9, %v1861_v10, %v1870_v28  ;;  %v1880_v48 = vsel %vm8608_vm0, %v1870_v28, %v1879_v2  ;;  %vm8612_vm13 = vnez %v8611_v56  ;;  %v655_v61 = vsel %vm6865_vm4, 1.0, %v8120_v7  ;;  %vm8621_vm4 = vmmov %vm8608_vm0 }
 0x254   :  { %vm6886_vm1 = vmand %vm8612_vm13, %vm8610_vm10  ;;  %v1928_v8 = vmul.bf16 %v6834_v25, %v1871_v34  ;;  %vm8615_vm6 = vcmask 1046528   ;;  %v1929_v13 = vmul.bf16 %v6896_v35, %v1880_v48  ;;  %v690_v4 = vsel %vm8616_vm7, %v6800_v41, %v6859_v39 }
 0x255   :  { %v2356_v10 = vsel %vm8615_vm6, %v6752_v62, %v2355_v3  ;;  %v2131_v55 = vshrl.u32 %v1335_v24, 16  ;;  %v2134_v18 = vshll.u32 %v1335_v24, 16  ;;  %v1888_v31 = vor.u32 %v1887_v37, %v1884_v52  ;;  %v2009_v62 = vpop.permute.xlu1 %2008  ;;  %v2096_v46 = vpop.permute.xlu0 %2095  ;;  %vm8619_vm14 = vmmov %vm8615_vm6  ;;  %v4385_v37 = vld [vmem:[#allocation2 + $0x8] sm:$0xff] }
 0x256   :  { %v2357_v40 = vrot.slane %v1928_v8, 1  ;;  %v2570_v12 = vshrl.u32 %v2356_v10, 16  ;;  %v2573_v16 = vshll.u32 %v2356_v10, 16  ;;  %v2359_v63 = vrot.slane %v1929_v13, 1  ;;  %vm8620_vm12 = vmmov %vm8615_vm6 }
 0x257   :  { %v6905_v15 = vsel %vm8617_vm3, %v6798_v54, %v6825_v42  ;;  %vm2398_vm2 = vcmask 523264   ;;  %vm2417_vm11 = vcmask 785408   ;;  %v692_v27 = vshrl.u32 %v667_v44, 16  ;;  %vm8627_vm13 = vmmov %vm8621_vm4 }
 0x258   :  { %v656_v41 = vsel %vm6886_vm1, 1.0, %v8120_v7  ;;  %v1889_v24 = vsel %vm8618_vm5, %v1879_v2, %v1888_v31  ;;  %v6912_v28 = vmul.bf16 %v6896_v35, %v1328_v59  ;;  %v695_v52 = vshll.u32 %v667_v44, 16  ;;  %v6920_v44 = vld [vmem:[#allocation2 + $0x28] sm:$0xff]  ;;  %vm8628_vm1 = vmmov %vm8615_vm6 }
 0x259   :  { %v2358_v34 = vsel %vm8619_vm14, %v2355_v3, %v2357_v40  ;;  %v2360_v48 = vsel %vm8620_vm12, %v2357_v40, %v2359_v63  ;;  %v755_v21 = vmul.bf16 %v4385_v37, %v690_v4  ;;  %v2133_v56 = vrot.slane %v2131_v55, 4  ;;  %v6918_v2 = vpop.permute.xlu1 %2055  ;;  %v2328_v40 = vpop.permute.xlu0 %2327  ;;  %vm8629_vm6 = vmmov %vm8621_vm4 }
 0x25a   :  { %v2136_v8 = vrot.slane %v2134_v18, 5  ;;  %v2578_v10 = vshrl.u32 %v2358_v34, 16  ;;  %v6916_v13 = vpack.c.bf16 %v656_v41, %v655_v61  ;;  %v2572_v22 = vrot.slane %v2570_v12, 3  ;;  %vm8630_vm7 = vmmov %vm8628_vm1 }
 0x25b   :  { %v2575_v43 = vrot.slane %v2573_v16, 4  ;;  %v2581_v23 = vshll.u32 %v2358_v34, 16  ;;  %v694_v58 = vrot.slane %v692_v27, 4  ;;  %v2603_v33 = vshrl.u32 %v2360_v48, 16  ;;  %v8623_v16 = vld [vmem:[#allocation65_spill] sm:$0xff]  ;;  %vm8631_vm3 = vmmov %vm8628_vm1 }
 0x25c   :  { %v2580_v59 = vrot.slane %v2578_v10, 3  ;;  %v1930_v3 = vmul.bf16 %v6920_v44, %v1889_v24  ;;  %v697_v19 = vrot.slane %v695_v52, 5  ;;  %v2606_v55 = vshll.u32 %v2360_v48, 16  ;;  %vm8633_vm14 = vmmov %vm8621_vm4 }
 0x25d   :  { %v2583_v4 = vrot.slane %v2581_v23, 4  ;;  %v1898_v61 = vsel %vm8621_vm4, %v1888_v31, %v6359_v26  ;;  %vm8622_vm8 = vcmask 261120   ;;  %v6926_v12 = vor.u32 %v2136_v8, %v2133_v56  ;;  %v6938_v31 = vpop.permute.xlu1 %2099 }
 0x25e   :  { %v2376_v18 = vsel %vm8622_vm8, %v755_v21, %v2009_v62  ;;  %vm8624_vm9 = vnez %v8623_v16  ;;  %v2605_v41 = vrot.slane %v2603_v33, 3  ;;  %vm8625_vm0 = vmmov %vm8622_vm8  ;;  %v701_v24 = vshrl.u32 %v6916_v13, 16  ;;  %v6943_v33 = vpop.permute.xlu0 %2244 }
 0x25f   :  { %v6931_v27 = vsel %vm8624_vm9, 1.0, %v8120_v7  ;;  %v2373_v34 = vsel %vm8625_vm0, %v754_v36, %v2007_v50  ;;  %v2576_v52 = vor.u32 %v2575_v43, %v2572_v22  ;;  %v2584_v23 = vor.u32 %v2583_v4, %v2580_v59  ;;  %vm8626_vm10 = vmmov %vm8625_vm0 }
 0x260   :  { %v2438_v26 = vsel %vm8626_vm10, %v6798_v54, %v6808_v38  ;;  %v2608_v62 = vrot.slane %v2606_v55, 4  ;;  %v2361_v48 = vrot.slane %v1930_v3, 1  ;;  %v1931_v37 = vmul.bf16 %v1898_v61, %v6189_v9  ;;  %vm8632_vm5 = vmmov %vm8625_vm0 }
 0x261   :  { %v2402_v21 = vsel %vm2398_vm2, %v2376_v18, %v6806_v30  ;;  %v6945_v36 = vor.u32 %v697_v19, %v694_v58  ;;  %v704_v43 = vshll.u32 %v6916_v13, 16  ;;  %v6949_v50 = vsel %vm8627_vm13, %v2576_v52, %v2584_v23  ;;  %v6959_v13 = vpop.permute.xlu1 %2057  ;;  %vm8638_vm9 = vmmov %vm8629_vm6 }
 0x262   :  { %v2400_v54 = vsel %vm2398_vm2, %v2373_v34, %v6880_v47  ;;  %v2609_v38 = vor.u32 %v2608_v62, %v2605_v41  ;;  %v2362_v56 = vsel %vm8628_vm1, %v2359_v63, %v2361_v48  ;;  %v2363_v8 = vrot.slane %v1931_v37, 1  ;;  %v2243_v59 = vpop.permute.xlu0 %2242  ;;  %vm8639_vm0 = vmmov %vm8629_vm6 }
 0x263   :  { %v2419_v9 = vsel %vm2417_vm11, %v2400_v54, %v2096_v46  ;;  %v2464_v30 = vsel %vm2398_vm2, %v2438_v26, %v6796_v5  ;;  %v2628_v10 = vshrl.u32 %v2362_v56, 16  ;;  %v2631_v19 = vshll.u32 %v2362_v56, 16  ;;  %vm8640_vm10 = vmmov %vm8632_vm5 }
 0x264   :  { %v2421_v58 = vsel %vm2417_vm11, %v2402_v21, %v6842_v20  ;;  %v6962_v22 = vsel %vm8629_vm6, %v2584_v23, %v2609_v38  ;;  %v2364_v47 = vsel %vm8630_vm7, %v2361_v48, %v2363_v8  ;;  %v2366_v63 = vsel %vm8631_vm3, %v2363_v8, %v6409_v17  ;;  %v8635_v8 = vld [vmem:[#allocation66_spill] sm:$0xff]  ;;  %vm8641_vm13 = vmmov %vm8632_vm5 }
 0x265   :  { %v2630_v46 = vrot.slane %v2628_v10, 3  ;;  %v2633_v3 = vrot.slane %v2631_v19, 4  ;;  %v2653_v4 = vshrl.u32 %v2364_v47, 16  ;;  %v2656_v5 = vshll.u32 %v2364_v47, 16  ;;  %v6971_v17 = vpop.permute.xlu1 %2101  ;;  %vm8643_vm6 = vmmov %vm8639_vm0 }
 0x266   :  { %v2441_v55 = vsel %vm8632_vm5, %v6905_v15, %v6852_v11  ;;  %v2482_v20 = vsel %vm2417_vm11, %v2464_v30, %v2328_v40  ;;  %v2678_v61 = vshrl.u32 %v2366_v63, 16  ;;  %v2681_v18 = vshll.u32 %v2366_v63, 16  ;;  %v2216_v54 = vpop.permute.xlu0 %2215  ;;  %vm8644_vm7 = vmmov %vm8639_vm0 }
 0x267   :  { %v2539_v16 = vshrl.u32 %v2419_v9, 16  ;;  %v2634_v41 = vor.u32 %v2633_v3, %v2630_v46  ;;  %v2655_v34 = vrot.slane %v2653_v4, 3  ;;  %v2658_v52 = vrot.slane %v2656_v5, 4 }
 0x268   :  { %v2546_v23 = vshrl.u32 %v2421_v58, 16  ;;  %v2542_v26 = vshll.u32 %v2419_v9, 16  ;;  %v2680_v62 = vrot.slane %v2678_v61, 3  ;;  %v2683_v48 = vrot.slane %v2681_v18, 4 }
 0x269   :  { %v2549_v37 = vshll.u32 %v2421_v58, 16  ;;  %v2554_v21 = vshrl.u32 %v2482_v20, 16  ;;  %v6974_v56 = vsel %vm8633_vm14, %v2609_v38, %v2634_v41  ;;  %v2659_v11 = vor.u32 %v2658_v52, %v2655_v34  ;;  %v2330_v46 = vpop.permute.xlu1 %2329  ;;  %vm8649_vm14 = vmmov %vm8640_vm10 }
 0x26a   :  { %v2557_v15 = vshll.u32 %v2482_v20, 16  ;;  %vm8634_vm12 = vsmask.f32 3328  ;;  %vm8636_vm4 = vnez %v8635_v8  ;;  %v6982_v30 = vor.u32 %v2683_v48, %v2680_v62 }
 0x26b   :  { %v2138_v40 = vsel %vm8634_vm12, %v6825_v42, %v6926_v12  ;;  %v1318_v9 = vsel %vm8636_vm4, 1.0, %v8120_v7  ;;  %vm8637_vm8 = vmmov %vm8634_vm12  ;;  %v703_v19 = vrot.slane %v701_v24, 4  ;;  %v706_v58 = vrot.slane %v704_v43, 5  ;;  %v6997_v24 = vpop.permute.xlu0 %2217 }
 0x26c   :  { %v699_v10 = vsel %vm8637_vm8, %v6859_v39, %v6945_v36  ;;  %v6988_v38 = vsel %vm8638_vm9, %v2634_v41, %v2659_v11  ;;  %v2541_v47 = vrot.slane %v2539_v16, 3  ;;  %v2544_v63 = vrot.slane %v2542_v26, 4  ;;  %vm8642_vm1 = vmmov %vm8637_vm8 }
 0x26d   :  { %v2466_v42 = vsel %vm2398_vm2, %v2441_v55, %v6786_v49  ;;  %v6994_v3 = vsel %vm8639_vm0, %v2659_v11, %v6982_v30  ;;  %v2548_v4 = vrot.slane %v2546_v23, 3  ;;  %v2551_v5 = vrot.slane %v2549_v37, 4  ;;  %v2011_v26 = vpop.permute.xlu1 %2010  ;;  %vm8650_vm12 = vmmov %vm8639_vm0 }
 0x26e   :  { %v2556_v20 = vrot.slane %v2554_v21, 3  ;;  %v2484_v39 = vsel %vm2417_vm11, %v2466_v42, %v2330_v46  ;;  %v2559_v43 = vrot.slane %v2557_v15, 4  ;;  %v2444_v61 = vsel %vm8640_vm10, %v2138_v40, %v2216_v54  ;;  %vm8651_vm4 = vmmov %vm8639_vm0 }
 0x26f   :  { %v2561_v18 = vshrl.u32 %v2484_v39, 16  ;;  %v2564_v16 = vshll.u32 %v2484_v39, 16  ;;  %v2140_v41 = vshrl.u32 %v6912_v28, 16  ;;  %v756_v49 = vmul.bf16 %v6754_v51, %v699_v10  ;;  %v2332_v11 = vpop.permute.xlu0 %2331  ;;  %vm8652_vm8 = vmmov %vm8642_vm1 }
 0x270   :  { %v1329_v55 = vpack.c.bf16 %v1318_v9, %v6931_v27  ;;  %v2143_v23 = vshll.u32 %v6912_v28, 16  ;;  %v7004_v62 = vor.u32 %v706_v58, %v703_v19  ;;  %v2552_v48 = vor.u32 %v2551_v5, %v2548_v4  ;;  %vm8653_vm9 = vmmov %vm8640_vm10 }
 0x271   :  { %v2563_v34 = vrot.slane %v2561_v18, 3  ;;  %v2566_v52 = vrot.slane %v2564_v16, 4  ;;  %v2545_v37 = vor.u32 %v2544_v63, %v2541_v47  ;;  %v2379_v21 = vsel %vm8641_vm13, %v756_v49, %v2011_v26  ;;  %v2013_v47 = vpop.permute.xlu1 %2012  ;;  %v8645_v49 = vld [vmem:[#allocation91_spill] sm:$0xff]  ;;  %vm8654_vm0 = vmmov %vm8642_vm1 }
 0x272   :  { %v2468_v54 = vsel %vm2398_vm2, %v2444_v61, %v2243_v59  ;;  %v2560_v15 = vor.u32 %v2559_v43, %v2556_v20  ;;  %v2404_v51 = vsel %vm2398_vm2, %v2379_v21, %v6918_v2  ;;  %v1337_v10 = vmul.bf16 %v6920_v44, %v1329_v55  ;;  %vm8655_vm10 = vmmov %vm8654_vm0 }
 0x273   :  { %v2567_v40 = vor.u32 %v2566_v52, %v2563_v34  ;;  %v2486_v27 = vsel %vm2417_vm11, %v2468_v54, %v2332_v11  ;;  %v2423_v28 = vsel %vm2417_vm11, %v2404_v51, %v6938_v31  ;;  %v708_v59 = vsel %vm8642_vm1, %v6945_v36, %v7004_v62  ;;  %v7018_v46 = vpop.permute.xlu0 %2248  ;;  %v4387_v36 = vld [vmem:[%s7848_s2 + $0xa0] sm:$0xff]   ;;  %vm8659_vm1 = vmmov %vm8653_vm9 }
 0x274   :  { %v2594_v8 = vshrl.u32 %v2486_v27, 16  ;;  %v2597_v9 = vshll.u32 %v2486_v27, 16  ;;  %v2586_v19 = vshrl.u32 %v2423_v28, 16  ;;  %v2589_v58 = vshll.u32 %v2423_v28, 16  ;;  %v8647_v34 = vld [vmem:[#allocation92_spill] sm:$0xff] }
 0x275   :  { %v2568_v63 = vsel %vm8643_vm6, %v2560_v15, %v2567_v40  ;;  %v2553_v31 = vsel %vm8644_vm7, %v2545_v37, %v2552_v48  ;;  %v2142_v20 = vrot.slane %v2140_v41, 4  ;;  %v757_v43 = vmul.bf16 %v6834_v25, %v708_v59  ;;  %v2060_v18 = vpop.permute.xlu1 %2059  ;;  %v4388_v25 = vld [vmem:[%s7848_s2 + $0xa8] sm:$0xff]   ;;  %vm8661_vm6 = vmmov %vm8659_vm1 }
 0x276   :  { %v2596_v42 = vrot.slane %v2594_v8, 3  ;;  %v2599_v2 = vrot.slane %v2597_v9, 4  ;;  %2941 = vmatprep.mubr.bf16.mxu0 %v2568_v63  ;;  %v2588_v4 = vrot.slane %v2586_v19, 3  ;;  %v2591_v5 = vrot.slane %v2589_v58, 4  ;;  %v7048_v19 = vld [vmem:[#allocation2 + $0x30] sm:$0xff]  ;;  %vm8662_vm7 = vmmov %vm8651_vm4 }
 0x277   :  { %2942 = vmatmul.mubr.bf16.vlgmr.msra.gmra.mrb[16].mxu0 %v2553_v31  ;;  %v2145_v61 = vrot.slane %v2143_v23, 5  ;;  %v2149_v16 = vshrl.u32 %v1337_v10, 16  ;;  %vm8646_vm3 = vnez %v8645_v49  ;;  %vm8648_vm5 = vnez %v8647_v34  ;;  %v2247_v26 = vpop.permute.xlu0 %2246 }
 0x278   :  { %v7021_v39 = vor.u32 %v2599_v2, %v2596_v42  ;;  %4191 = vmatpush3.bf16.msra.mxu0 %v4387_v36  ;;  %v1319_v55 = vsel %vm8646_vm3, 1.0, %v8120_v7  ;;  %v1320_v41 = vsel %vm8648_vm5, 1.0, %v8120_v7  ;;  %v2382_v52 = vsel %vm8649_vm14, %v757_v43, %v2013_v47  ;;  %vm8663_vm3 = vmmov %vm8651_vm4 }
 0x279   :  { %4192 = vmatprep.subr.bf16.mxu0 %v4388_v25  ;;  %v2152_v37 = vshll.u32 %v1337_v10, 16  ;;  %v7039_v21 = vor.u32 %v2591_v5, %v2588_v4  ;;  %v2406_v54 = vsel %vm2398_vm2, %v2382_v52, %v6959_v13  ;;  %v2104_v11 = vpop.permute.xlu1 %2103  ;;  %v1330_v15 = vpack.c.bf16 %v1320_v41, %v1319_v55  ;;  %vm8664_vm5 = vmmov %vm8663_vm3 }
 0x27a   :  { %v2601_v23 = vsel %vm8650_vm12, %v2567_v40, %v7021_v39  ;;  %v2146_v51 = vor.u32 %v2145_v61, %v2142_v20  ;;  %v2151_v27 = vrot.slane %v2149_v16, 4  ;;  %v2425_v40 = vsel %vm2417_vm11, %v2406_v54, %v6971_v17  ;;  %vm8666_vm14 = vmmov %vm8654_vm0 }
 0x27b   :  { %2949 = vmatprep.mubr.bf16.mxu0 %v2601_v23  ;;  %v2154_v28 = vrot.slane %v2152_v37, 5  ;;  %v2220_v8 = vpop.permute.xlu0 %2219  ;;  %v2593_v9 = vsel %vm8651_vm4, %v2552_v48, %v7039_v21  ;;  %v1338_v13 = vmul.bf16 %v7048_v19, %v1330_v15  ;;  %v2611_v48 = vshrl.u32 %v2425_v40, 16  ;;  %vm8667_vm12 = vmmov %vm8659_vm1 }
 0x27c   :  { %4193 = vmatpush3.bf16.msra.mxu0 %v4388_v25  ;;  %v2147_v58 = vsel %vm8652_vm8, %v6926_v12, %v2146_v51  ;;  %v2614_v42 = vshll.u32 %v2425_v40, 16  ;;  %v717_v17 = vsel %vm8654_vm0, %v7004_v62, %v6791_v14  ;;  %v1321_v43 = vsel %vm5804_vm15, 1.0, %v8120_v7  ;;  %vm8660_vm15 = vmmov %vm8659_vm1 }
 0x27d   :  { %4266 = vmatprep.subr.bf16.mxu0 %v8120_v7  ;;  %v2062_v10 = vpop.permute.xlu1 %2061  ;;  %v7053_v59 = vor.u32 %v2154_v28, %v2151_v27  ;;  %v2447_v63 = vsel %vm8653_vm9, %v2147_v58, %v6997_v24  ;;  %v2158_v2 = vshrl.u32 %v1338_v13, 16  ;;  %v8657_v24 = vld [vmem:[#allocation96_spill] sm:$0xff]  ;;  %v2613_v61 = vrot.slane %v2611_v48, 3  ;;  %vm8668_vm4 = vmmov %vm8663_vm3 }
 0x27e   :  { %v2470_v12 = vsel %vm2398_vm2, %v2447_v63, %v6943_v33  ;;  %vm8658_vm13 = vnez %v8657_v24  ;;  %v2616_v16 = vrot.slane %v2614_v42, 4  ;;  %v758_v34 = vmul.bf16 %v6896_v35, %v717_v17  ;;  %v7082_v17 = vld [vmem:[#allocation2 + $0x38] sm:$0xff]  ;;  %vm8669_vm8 = vmmov %vm8663_vm3 }
 0x27f   :  { %2950 = vmatmul.mubr.bf16.gmra.mrb[20].mxu0 %v2593_v9  ;;  %v7055_v47 = vpop.permute.xlu0 %2221  ;;  %v2156_v4 = vsel %vm8655_vm10, %v2146_v51, %v7053_v59  ;;  %v1322_v36 = vsel %vm8658_vm13, 1.0, %v8120_v7  ;;  %v2160_v33 = vrot.slane %v2158_v2, 4  ;;  %v2161_v41 = vshll.u32 %v1338_v13, 16  ;;  %vm8670_vm9 = vmmov %vm8654_vm0 }
 0x280   :  { %v2450_v49 = vsel %vm8659_vm1, %v2156_v4, %v2220_v8  ;;  %v1331_v52 = vpack.c.bf16 %v1322_v36, %v1321_v43  ;;  %v759_v8 = vmul.bf16 %v6920_v44, %v6804_v0  ;;  %v2617_v9 = vor.u32 %v2616_v16, %v2613_v61  ;;  %vm8671_vm0 = vmmov %vm8659_vm1 }
 0x281   :  { %v2106_v31 = vpop.permute.xlu1 %2105  ;;  %v2472_v15 = vsel %vm2398_vm2, %v2450_v49, %v2247_v26  ;;  %v2163_v63 = vrot.slane %v2161_v41, 5  ;;  %vm8672_vm10 = vmmov %vm8671_vm0 }
 0x282   :  { %v1339_v26 = vmul.bf16 %v7082_v17, %v1331_v52  ;;  %v2618_v43 = vsel %vm8663_vm3, %v7039_v21, %v2617_v9  ;;  %v8665_v21 = vpack.c.bf16 %v6771_v60, %v6763_v57  ;;  %vm8673_vm13 = vmmov %vm8663_vm3 }
 0x283   :  { %v2334_v5 = vpop.permute.xlu0 %2333  ;;  %vm8674_vm1 = vmmov %vm8670_vm9 }
 0x284   :  { %v2488_v14 = vsel %vm2417_vm11, %v2470_v12, %v2334_v5 }
 0x285   :  { %v2619_v62 = vshrl.u32 %v2488_v14, 16  ;;  %v2622_v55 = vshll.u32 %v2488_v14, 16  ;;  %v2164_v14 = vor.u32 %v2163_v63, %v2160_v33 }
 0x287   :  { %v2621_v23 = vrot.slane %v2619_v62, 3  ;;  %v2624_v37 = vrot.slane %v2622_v55, 4  ;;  %v2167_v62 = vshrl.u32 %v1339_v26, 16  ;;  %v2170_v55 = vshll.u32 %v1339_v26, 16 }
 0x289   :  { %v2015_v25 = vpop.permute.xlu1 %2014  ;;  %v2625_v35 = vor.u32 %v2624_v37, %v2621_v23  ;;  %v2169_v33 = vrot.slane %v2167_v62, 4 }
 0x28a   :  { %v2385_v54 = vsel %vm8660_vm15, %v758_v34, %v2015_v25  ;;  %vm8675_vm15 = vmmov %vm8671_vm0 }
 0x28b   :  { %v2408_v27 = vsel %vm2398_vm2, %v2385_v54, %v2060_v18  ;;  %v2626_v0 = vsel %vm8662_vm7, %v7021_v39, %v2625_v35  ;;  %v2165_v54 = vsel %vm8666_vm14, %v7053_v59, %v2164_v14  ;;  %vm8677_vm7 = vmmov %vm8663_vm3 }
 0x28c   :  { %v2427_v40 = vsel %vm2417_vm11, %v2408_v27, %v2104_v11  ;;  %2957 = vmatprep.mubr.bf16.mxu0 %v2626_v0  ;;  %v2453_v27 = vsel %vm8667_vm12, %v2165_v54, %v7055_v47  ;;  %v760_v47 = vmul.bf16 %v7048_v19, %v6838_v29  ;;  %vm8679_vm14 = vmmov %vm8663_vm3 }
 0x28d   :  { %v2636_v48 = vshrl.u32 %v2427_v40, 16  ;;  %v2639_v42 = vshll.u32 %v2427_v40, 16  ;;  %2958 = vmatmul.mubr.bf16.gmra.mrb[24].mxu0 %v2618_v43  ;;  %vm8681_vm12 = vmmov %vm8671_vm0 }
 0x28f   :  { %v2336_v51 = vpop.permute.xlu0 %2335  ;;  %v2638_v44 = vrot.slane %v2636_v48, 3  ;;  %v2641_v11 = vrot.slane %v2639_v42, 4 }
 0x290   :  { %v2490_v28 = vsel %vm2417_vm11, %v2472_v15, %v2336_v51  ;;  %v2017_v2 = vpop.permute.xlu1 %2016  ;;  %v2172_v15 = vrot.slane %v2170_v55, 5 }
 0x291   :  { %v2644_v13 = vshrl.u32 %v2490_v28, 16  ;;  %v2647_v58 = vshll.u32 %v2490_v28, 16  ;;  %v2388_v12 = vsel %vm8661_vm6, %v759_v8, %v2017_v2  ;;  %v2642_v23 = vor.u32 %v2641_v11, %v2638_v44  ;;  %vm8676_vm6 = vmmov %vm8671_vm0 }
 0x292   :  { %v2410_v20 = vsel %vm2398_vm2, %v2388_v12, %v2062_v10  ;;  %v4391_v10 = vld [vmem:[#allocation2 + $0x40] sm:$0xff]  ;;  %v2173_v60 = vor.u32 %v2172_v15, %v2169_v33 }
 0x293   :  { %v2646_v18 = vrot.slane %v2644_v13, 3  ;;  %v2649_v4 = vrot.slane %v2647_v58, 4  ;;  %v2251_v5 = vpop.permute.xlu0 %2250  ;;  %v2429_v36 = vsel %vm2417_vm11, %v2410_v20, %v2106_v31  ;;  %v1340_v52 = vmul.bf16 %v4391_v10, %v8665_v21 }
 0x294   :  { %v2661_v61 = vshrl.u32 %v2429_v36, 16  ;;  %v2664_v16 = vshll.u32 %v2429_v36, 16  ;;  %v2064_v49 = vpop.permute.xlu1 %2063  ;;  %v2643_v8 = vsel %vm8668_vm4, %v2617_v9, %v2642_v23  ;;  %v2474_v13 = vsel %vm2398_vm2, %v2453_v27, %v7018_v46  ;;  %vm8682_vm4 = vmmov %vm8671_vm0 }
 0x295   :  { %v2650_v24 = vor.u32 %v2649_v4, %v2646_v18  ;;  %v2176_v28 = vshrl.u32 %v1340_v52, 16  ;;  %v2179_v40 = vshll.u32 %v1340_v52, 16  ;;  %v2174_v26 = vsel %vm8670_vm9, %v2164_v14, %v2173_v60  ;;  %vm8684_vm9 = vmmov %vm8663_vm3 }
 0x296   :  { %v2663_v41 = vrot.slane %v2661_v61, 3  ;;  %v2666_v25 = vrot.slane %v2664_v16, 4 }
 0x297   :  { %v2224_v34 = vpop.permute.xlu0 %2223  ;;  %v2651_v39 = vsel %vm8664_vm5, %v2625_v35, %v2650_v24  ;;  %v2178_v59 = vrot.slane %v2176_v28, 4  ;;  %v2181_v48 = vrot.slane %v2179_v40, 5  ;;  %vm8678_vm5 = vmmov %vm8663_vm3 }
 0x298   :  { %2965 = vmatprep.mubr.bf16.mxu0 %v2651_v39  ;;  %v2667_v37 = vor.u32 %v2666_v25, %v2663_v41  ;;  %v2456_v46 = vsel %vm8672_vm10, %v2174_v26, %v2224_v34  ;;  %v761_v25 = vmul.bf16 %v7082_v17, %v6871_v6  ;;  %v8680_v26 = vmul.bf16 %v6849_v45, %v6665_v53  ;;  %vm8687_vm10 = vmmov %vm8671_vm0 }
 0x299   :  { %v2108_v31 = vpop.permute.xlu1 %2107  ;;  %2966 = vmatmul.mubr.bf16.gmra.mrb[28].mxu0 %v2643_v8  ;;  %v2182_v11 = vor.u32 %v2181_v48, %v2178_v59  ;;  %v2476_v29 = vsel %vm2398_vm2, %v2456_v46, %v2251_v5 }
 0x29a   :  { %v2668_v35 = vsel %vm8669_vm8, %v2642_v23, %v2667_v37  ;;  %vm8683_vm8 = vmmov %vm8663_vm3 }
 0x29b   :  { %v2183_v34 = vsel %vm8674_vm1, %v2173_v60, %v2182_v11  ;;  %vm8689_vm1 = vmmov %vm8663_vm3 }
 0x29c   :  { %v2226_v51 = vpop.permute.xlu0 %2225 }
 0x29d   :  { %v2066_v57 = vpop.permute.xlu1 %2065  ;;  %v2459_v10 = vsel %vm8675_vm15, %v2183_v34, %v2226_v51  ;;  %v2710_v34 = vsel %vm8689_vm1, %v6982_v30, %v6458_v32  ;;  %vm8690_vm15 = vmmov %vm8671_vm0  ;;  %v4367_v32 = vld [vmem:[%s7848_s2 + $0xb8] sm:$0xff]  }
 0x2a0   :  { %v2338_v58 = vpop.permute.xlu0 %2337 }
 0x2a1   :  { %v2492_v63 = vsel %vm2417_vm11, %v2474_v13, %v2338_v58  ;;  %v2019_v9 = vpop.permute.xlu1 %2018 }
 0x2a2   :  { %v2669_v42 = vshrl.u32 %v2492_v63, 16  ;;  %v2672_v2 = vshll.u32 %v2492_v63, 16  ;;  %v2391_v12 = vsel %vm8671_vm0, %v760_v47, %v2019_v9 }
 0x2a3   :  { %v2412_v44 = vsel %vm2398_vm2, %v2391_v12, %v2064_v49 }
 0x2a4   :  { %v2671_v18 = vrot.slane %v2669_v42, 3  ;;  %v2674_v4 = vrot.slane %v2672_v2, 4  ;;  %v2253_v0 = vpop.permute.xlu0 %2252  ;;  %v2431_v43 = vsel %vm2417_vm11, %v2412_v44, %v2108_v31 }
 0x2a5   :  { %v2686_v36 = vshrl.u32 %v2431_v43, 16  ;;  %v2689_v61 = vshll.u32 %v2431_v43, 16  ;;  %v2110_v16 = vpop.permute.xlu1 %2109  ;;  %v2478_v52 = vsel %vm2398_vm2, %v2459_v10, %v2253_v0 }
 0x2a6   :  { %v2675_v20 = vor.u32 %v2674_v4, %v2671_v18 }
 0x2a7   :  { %v2688_v62 = vrot.slane %v2686_v36, 3  ;;  %v2691_v55 = vrot.slane %v2689_v61, 4 }
 0x2a8   :  { %v2340_v19 = vpop.permute.xlu0 %2339  ;;  %v2676_v14 = vsel %vm8673_vm13, %v2650_v24, %v2675_v20  ;;  %vm8688_vm13 = vmmov %vm8671_vm0 }
 0x2a9   :  { %v2494_v39 = vsel %vm2417_vm11, %v2476_v29, %v2340_v19  ;;  %2973 = vmatprep.mubr.bf16.mxu0 %v2676_v14  ;;  %v2021_v21 = vpop.permute.xlu1 %2020  ;;  %v2692_v5 = vor.u32 %v2691_v55, %v2688_v62 }
 0x2aa   :  { %v2694_v49 = vshrl.u32 %v2494_v39, 16  ;;  %v2697_v41 = vshll.u32 %v2494_v39, 16  ;;  %2974 = vmatmul.mubr.bf16.gmra.mrb[32].mxu0 %v2668_v35  ;;  %v2394_v31 = vsel %vm8676_vm6, %v761_v25, %v2021_v21  ;;  %vm8005_vm6 = vmmov 0  }
 0x2ab   :  { %v2414_v33 = vsel %vm2398_vm2, %v2394_v31, %v2066_v57  ;;  %v2693_v27 = vsel %vm8677_vm7, %v2667_v37, %v2692_v5  ;;  %4214 = vmatprep.mubr.msk.bf16.mxu1 %vm8005_vm6, %v8120_v7 }
 0x2ac   :  { %v2696_v24 = vrot.slane %v2694_v49, 3  ;;  %v2699_v23 = vrot.slane %v2697_v41, 4  ;;  %v2342_v54 = vpop.permute.xlu0 %2341  ;;  %v2433_v6 = vsel %vm2417_vm11, %v2414_v33, %v2110_v16 }
 0x2ad   :  { %v2496_v15 = vsel %vm2417_vm11, %v2478_v52, %v2342_v54  ;;  %v2711_v8 = vshrl.u32 %v2433_v6, 16  ;;  %v2714_v35 = vshll.u32 %v2433_v6, 16  ;;  %v2023_v40 = vpop.permute.xlu1 %2022 }
 0x2ae   :  { %v2700_v28 = vor.u32 %v2699_v23, %v2696_v24  ;;  %v2719_v17 = vshrl.u32 %v2496_v15, 16  ;;  %v2722_v51 = vshll.u32 %v2496_v15, 16  ;;  %v2397_v18 = vsel %vm8681_vm12, %v8680_v26, %v2023_v40 }
 0x2af   :  { %v2713_v63 = vrot.slane %v2711_v8, 3  ;;  %v2716_v48 = vrot.slane %v2714_v35, 4 }
 0x2b0   :  { %v2721_v60 = vrot.slane %v2719_v17, 3  ;;  %v2724_v13 = vrot.slane %v2722_v51, 4  ;;  %v2228_v58 = vpop.permute.xlu0 %2227  ;;  %v2701_v59 = vsel %vm8663_vm3, %v2675_v20, %v2700_v28 }
 0x2b1   :  { %2981 = vmatprep.mubr.bf16.mxu0 %v2701_v59  ;;  %v2068_v42 = vpop.permute.xlu1 %2067  ;;  %v2717_v37 = vor.u32 %v2716_v48, %v2713_v63  ;;  %v2462_v4 = vsel %vm8682_vm4, %v2182_v11, %v2228_v58 }
 0x2b2   :  { %v2725_v57 = vor.u32 %v2724_v13, %v2721_v60  ;;  %2982 = vmatmul.mubr.bf16.gmra.mrb[36].mxu0 %v2693_v27  ;;  %v2416_v12 = vsel %vm2398_vm2, %v2397_v18, %v2068_v42 }
 0x2b3   :  { %v2718_v9 = vsel %vm8679_vm14, %v2692_v5, %v2717_v37 }
 0x2b4   :  { %v2255_v2 = vpop.permute.xlu0 %2254  ;;  %v2726_v47 = vsel %vm8678_vm5, %v2700_v28, %v2725_v57 }
 0x2b5   :  { %2989 = vmatprep.mubr.bf16.mxu0 %v2726_v47  ;;  %v2112_v0 = vpop.permute.xlu1 %2111  ;;  %v2480_v46 = vsel %vm2398_vm2, %v2462_v4, %v2255_v2  ;;  %vm8685_vm2 = vmmov %vm8671_vm0  ;;  %v8691_v4 = vld [vmem:[#allocation6_spill] sm:$0xff] }
 0x2b6   :  { %v2435_v44 = vsel %vm2417_vm11, %v2416_v12, %v2112_v0  ;;  %v2537_v12 = vsub.s32 2, %v8691_v4 }
 0x2b7   :  { %v2736_v43 = vshrl.u32 %v2435_v44, 16  ;;  %v2739_v36 = vshll.u32 %v2435_v44, 16  ;;  %v7201_v44 = vld [vmem:[%s7850_s4] sm:$0xff] }
 0x2b8   :  { %v2344_v20 = vpop.permute.xlu0 %2343 }
 0x2b9   :  { %v2498_v61 = vsel %vm2417_vm11, %v2480_v46, %v2344_v20  ;;  %v2738_v53 = vrot.slane %v2736_v43, 3  ;;  %v2741_v45 = vrot.slane %v2739_v36, 4  ;;  %vm8686_vm11 = vmmov %vm8671_vm0  ;;  %v7204_v20 = vrot.slane %v7201_v44, %v2537_v12  ;;  %v8716_v12 = vld [vmem:[#allocation48_spill] sm:$0xff] }
 0x2ba   :  { %v2744_v16 = vshrl.u32 %v2498_v61, 16  ;;  %v2747_v29 = vshll.u32 %v2498_v61, 16  ;;  %2990 = vmatmul.mubr.bf16.gmra.mrb[40].mxu0 %v2718_v9 }
 0x2bb   :  { %v2742_v11 = vor.u32 %v2741_v45, %v2738_v53  ;;  %v8693_v53 = vld [vmem:[#allocation19_spill] sm:$0xff] }
 0x2bc   :  { %v2746_v19 = vrot.slane %v2744_v16, 3  ;;  %v2749_v14 = vrot.slane %v2747_v29, 4  ;;  %v8692_v16 = vld [vmem:[#allocation17_spill] sm:$0xff]  ;;  %v3153_v45 = vand.u32 1, %v8693_v53 }
 0x2bd   :  { %v2743_v55 = vsel %vm8683_vm8, %v2717_v37, %v2742_v11  ;;  %v3121_v29 = vand.u32 1, %v8692_v16  ;;  %v8694_v11 = vld [vmem:[#allocation16_spill] sm:$0xff] }
 0x2be   :  { %v2750_v62 = vor.u32 %v2749_v14, %v2746_v19  ;;  %vm7221_vm3 = vcmp.eq.s32.totalorder %v3153_v45, 0  ;;  %v8723_v45 = vld [vmem:[#allocation31_spill] sm:$0xff] }
 0x2bf   :  { %vm7217_vm7 = vcmp.eq.s32.totalorder %v3121_v29, 0  ;;  %v8722_v29 = vld [vmem:[#allocation29_spill] sm:$0xff] }
 0x2c0   :  { %v2751_v39 = vsel %vm8684_vm9, %v2725_v57, %v2750_v62  ;;  %v3119_v62 = vand.u32 1, %v8694_v11  ;;  %v3124_v53 = vand.u32 1, %v8722_v29  ;;  %vm8745_vm8 = vmand %vm7217_vm7, %vm7221_vm3 }
 0x2c1   :  { %2997 = vmatprep.mubr.bf16.mxu0 %v2751_v39 }
 0x2c2   :  { %2998 = vmatmul.mubr.bf16.gmra.mrb[44].mxu0 %v2743_v55  ;;  %v8695_v55 = vld [vmem:[#allocation22_spill] sm:$0xff]  ;;  %vm7230_vm5 = vcmp.eq.s32.totalorder %v3119_v62, 0 }
 0x2c3   :  { %4194 = vmatprep.mubr.msk.bf16.mxu0 %vm8685_vm2, %v6949_v50  ;;  %v3151_v39 = vand.u32 1, %v8695_v55  ;;  %v8726_v55 = vmov 0 }
 0x2c5   :  { %vm7236_vm14 = vcmp.eq.s32.totalorder %v3151_v39, 0  ;;  %v8728_v39 = vld [vmem:[#allocation85_spill] sm:$0xff] }
 0x2ca   :  { %4195 = vmatmul.mubr.msk.bf16.vlgmr.msra.gmra.mrb[48].mxu0 %vm8686_vm11, %v6962_v22 }
 0x2cb   :  { %4198 = vmatprep.mubr.msk.bf16.mxu0 %vm8671_vm0, %v6974_v56  ;;  %v4366_v56 = vld [vmem:[%s7848_s2 + $0xb0] sm:$0xff]  }
 0x2cc   :  { %4211 = vmatpush3.bf16.msra.mxu1 %v4366_v56 }
 0x2cd   :  { %4212 = vmatprep.subr.bf16.mxu1 %v8120_v7 }
 0x2d0   :  { %4213 = vmatpush3.bf16.msra.mxu1 %v4367_v32 }
 0x2d1   :  { %4218 = vmatprep.subr.bf16.mxu1 %v8120_v7 }
 0x2d2   :  { %4199 = vmatmul.mubr.msk.bf16.gmra.mrb[52].mxu0 %vm8687_vm10, %v6988_v38 }
 0x2d3   :  { %4202 = vmatprep.mubr.msk.bf16.mxu0 %vm8688_vm13, %v6994_v3 }
 0x2da   :  { %4203 = vmatmul.mubr.msk.bf16.gmra.mrb[56].mxu0 %vm8690_vm15, %v2710_v34  ;;  %v8696_v34 = vld [vmem:[#allocation18_spill] sm:$0xff] }
 0x2db   :  { %4272 = vmatprep.mubr.msk.bf16.mxu0 %vm8005_vm6, %v8120_v7  ;;  %v3122_v56 = vand.u32 1, %v8696_v34  ;;  %v3131_v34 = vand.u32 1, %v8728_v39 }
 0x2dd   :  { %vm7240_vm12 = vcmp.eq.s32.totalorder %v3122_v56, 0  ;;  %v8756_v56 = vld [vmem:[#allocation61_spill] sm:$0xff] }
 0x2e3   :  { %v7153_v49 = vpop.f32.mrb[16].mxu1 }
 0x2e4   :  { %v7155_v50 = vpop.f32.mrb[17].mxu1 }
 0x2e5   :  { %v7157_v22 = vpop.f32.mrb[18].mxu1 }
 0x2e6   :  { %v7159_v41 = vpop.f32.mrb[19].mxu1 }
 0x34a   :  { %v4062_v30 = vpop.f32.mrb[16].mxu0 }
 0x34b   :  { %v4063_v38 = vpop.f32.mrb[17].mxu0 }
 0x34c   :  { %v7173_v3 = vadd.f32 %v4063_v38, %v4062_v30  ;;  %v4065_v25 = vpop.f32.mrb[18].mxu0  ;;  %v8697_v38 = vld [vmem:[#allocation20_spill] sm:$0xff] }
 0x34d   :  { %v4066_v10 = vpop.f32.mrb[19].mxu0 }
 0x34e   :  { %v7175_v21 = vadd.f32 %v4066_v10, %v4065_v25  ;;  %v3154_v25 = vand.u32 1, %v8697_v38 }
 0x350   :  { %vm7246_vm4 = vcmp.eq.s32.totalorder %v3154_v25, 0 }
 0x352   :  { %v4068_v5 = vpop.f32.mrb[20].mxu0 }
 0x353   :  { %v4069_v52 = vpop.f32.mrb[21].mxu0 }
 0x354   :  { %v7177_v24 = vadd.f32 %v4069_v52, %v4068_v5  ;;  %v4071_v23 = vpop.f32.mrb[22].mxu0  ;;  %v8702_v52 = vld [vmem:[#allocation21_spill] sm:$0xff] }
 0x355   :  { %v4072_v31 = vpop.f32.mrb[23].mxu0 }
 0x356   :  { %v7179_v54 = vadd.f32 %v4072_v31, %v4071_v23  ;;  %v3120_v23 = vand.u32 1, %v8702_v52  ;;  %v8703_v31 = vld [vmem:[#allocation23_spill] sm:$0xff] }
 0x357   :  { %v8757_v52 = vld [vmem:[#allocation59_spill] sm:$0xff] }
 0x358   :  { %vm7256_vm9 = vcmp.eq.s32.totalorder %v3120_v23, 0  ;;  %v3159_v23 = vand.u32 1, %v8757_v52 }
 0x360   :  { %v4074_v33 = vpop.f32.mrb[24].mxu0 }
 0x361   :  { %v4075_v15 = vpop.f32.mrb[25].mxu0 }
 0x362   :  { %v7181_v27 = vadd.f32 %v4075_v15, %v4074_v33  ;;  %v4077_v28 = vpop.f32.mrb[26].mxu0  ;;  %v3152_v33 = vand.u32 1, %v8703_v31  ;;  %v8737_v31 = vld [vmem:[#allocation86_spill] sm:$0xff] }
 0x363   :  { %v4078_v6 = vpop.f32.mrb[27].mxu0 }
 0x364   :  { %v7183_v17 = vadd.f32 %v4078_v6, %v4077_v28  ;;  %v8706_v6 = vld [vmem:[#allocation47_spill] sm:$0xff]  ;;  %vm7260_vm2 = vcmp.eq.s32.totalorder %v3152_v33, 0  ;;  %v3163_v33 = vand.u32 1, %v8737_v31  ;;  %v8758_v31 = vld [vmem:[#allocation77_spill] sm:$0xff] }
 0x36c   :  { %v4080_v51 = vpop.f32.mrb[28].mxu0 }
 0x36d   :  { %v4081_v8 = vpop.f32.mrb[29].mxu0 }
 0x36e   :  { %v7185_v35 = vadd.f32 %v4081_v8, %v4080_v51  ;;  %v4083_v40 = vpop.f32.mrb[30].mxu0  ;;  %v3125_v51 = vand.u32 1, %v8706_v6  ;;  %v8707_v8 = vld [vmem:[#allocation45_spill] sm:$0xff] }
 0x36f   :  { %v4084_v60 = vpop.f32.mrb[31].mxu0 }
 0x370   :  { %v7187_v13 = vadd.f32 %v4084_v60, %v4083_v40  ;;  %v3157_v40 = vand.u32 1, %v8707_v8  ;;  %vm7271_vm0 = vcmp.eq.s32.totalorder %v3125_v51, 0  ;;  %v8742_v51 = vld [vmem:[#allocation89_spill] sm:$0xff] }
 0x371   :  { %v3132_v8 = vand.u32 1, %v8742_v51 }
 0x372   :  { %vm7275_vm10 = vcmp.eq.s32.totalorder %v3157_v40, 0  ;;  %v8743_v40 = vld [vmem:[#allocation87_spill] sm:$0xff] }
 0x373   :  { %v8727_v55 = vsel %vm7275_vm10, 4294967295, %v8726_v55 }
 0x37d   :  { %v4086_v58 = vpop.f32.mrb[32].mxu0 }
 0x37e   :  { %v4087_v59 = vpop.f32.mrb[33].mxu0 }
 0x37f   :  { %v7189_v63 = vadd.f32 %v4087_v59, %v4086_v58  ;;  %v4089_v48 = vpop.f32.mrb[34].mxu0 }
 0x380   :  { %v4090_v57 = vpop.f32.mrb[35].mxu0 }
 0x381   :  { %v7191_v42 = vadd.f32 %v4090_v57, %v4089_v48  ;;  %v8713_v57 = vld [vmem:[#allocation30_spill] sm:$0xff] }
 0x385   :  { %v4092_v37 = vpop.f32.mrb[36].mxu0 }
 0x386   :  { %v4093_v2 = vpop.f32.mrb[37].mxu0 }
 0x387   :  { %v7193_v47 = vadd.f32 %v4093_v2, %v4092_v37  ;;  %v4095_v9 = vpop.f32.mrb[38].mxu0  ;;  %v3155_v37 = vand.u32 1, %v8713_v57  ;;  %v3133_v57 = vand.u32 1, %v5943_v1 }
 0x388   :  { %v4096_v26 = vpop.f32.mrb[39].mxu0 }
 0x389   :  { %v7195_v18 = vadd.f32 %v4096_v26, %v4095_v9  ;;  %v8714_v26 = vmov 0  ;;  %vm7288_vm15 = vcmp.eq.s32.totalorder %v3155_v37, 0  ;;  %v8744_v37 = vld [vmem:[#allocation101_spill] sm:$0xff] }
 0x38a   :  { %v8715_v26 = vsel %vm7246_vm4, 4294967295, %v8714_v26  ;;  %vm7315_vm4 = vcmp.eq.s32.totalorder %v3124_v53, 0  ;;  %v8754_v53 = vld [vmem:[#allocation75_spill] sm:$0xff] }
 0x38b   :  { %vm8747_vm3 = vnez %v8715_v26 }
 0x38d   :  { %v4098_v0 = vpop.f32.mrb[40].mxu0 }
 0x38e   :  { %v4099_v46 = vpop.f32.mrb[41].mxu0 }
 0x38f   :  { %v4100_v43 = vadd.f32 %v4099_v46, %v4098_v0  ;;  %v4101_v36 = vpop.f32.mrb[42].mxu0  ;;  %v3126_v0 = vand.u32 1, %v8716_v12  ;;  %v8717_v46 = vld [vmem:[#allocation46_spill] sm:$0xff] }
 0x390   :  { %v4102_v61 = vpop.f32.mrb[43].mxu0 }
 0x391   :  { %v2992_v19 = vadd.f32 %v4100_v43, %v7204_v20  ;;  %v4103_v14 = vadd.f32 %v4102_v61, %v4101_v36  ;;  %v3158_v43 = vand.u32 1, %v8717_v46  ;;  %vm7300_vm11 = vcmp.eq.s32.totalorder %v3126_v0, 0 }
 0x393   :  { %v7213_v32 = vadd.f32 %v7155_v50, %v2992_v19  ;;  %v2995_v30 = vadd.f32 %v4103_v14, %v7204_v20  ;;  %v3156_v19 = vand.u32 1, %v8723_v45  ;;  %vm7304_vm13 = vcmp.eq.s32.totalorder %v3158_v43, 0 }
 0x394   :  { %vm3190_vm10 = vmand %vm7300_vm11, %vm7304_vm13  ;;  %v2947_v43 = vadd.f32 %v7175_v21, %v7204_v20  ;;  %v3129_v45 = vand.u32 1, %v8754_v53  ;;  %v2971_v53 = vadd.f32 %v7187_v13, %v7204_v20  ;;  %vm7455_vm11 = vcmp.eq.s32.totalorder %v3131_v34, 0 }
 0x395   :  { %v7228_v15 = vadd.f32 %v7159_v41, %v2995_v30  ;;  %v4104_v50 = vpop.f32.mrb[44].mxu0  ;;  %v8712_v41 = vld [vmem:[#allocation28_spill] sm:$0xff]  ;;  %v8731_v30 = vmov 0  ;;  %vm7319_vm6 = vcmp.eq.s32.totalorder %v3156_v19, 0  ;;  %v7412_v16 = vsel %vm3190_vm10, 0.0625, %v8120_v7 }
 0x396   :  { %v4105_v60 = vpop.f32.mrb[45].mxu0  ;;  %v3123_v48 = vand.u32 1, %v8712_v41  ;;  %v8732_v30 = vsel %vm7288_vm15, 4294967295, %v8731_v30  ;;  %vm8746_vm15 = vmand %vm7230_vm5, %vm7236_vm14  ;;  %v8755_v19 = vld [vmem:[#allocation76_spill] sm:$0xff]  ;;  %vm7465_vm10 = vcmp.eq.s32.totalorder %v3129_v45, 0 }
 0x397   :  { %v4106_v2 = vadd.f32 %v4105_v60, %v4104_v50  ;;  %v4107_v9 = vpop.f32.mrb[46].mxu0  ;;  %v3164_v60 = vand.u32 1, %v8743_v40  ;;  %vm3188_vm7 = vmand %vm7315_vm4, %vm7319_vm6  ;;  %vm8750_vm6 = vnez %v8727_v55  ;;  %v8759_v50 = vld [vmem:[#allocation78_spill] sm:$0xff] }
 0x398   :  { %v4108_v36 = vpop.f32.mrb[47].mxu0  ;;  %vm7284_vm1 = vcmp.eq.s32.totalorder %v3123_v48, 0  ;;  %v2944_v48 = vadd.f32 %v7173_v3, %v7204_v20  ;;  %v7350_v3 = vsel %vm8745_vm8, 0.0625, %v8120_v7  ;;  %vm8748_vm8 = vmand %vm7240_vm12, %vm8747_vm3  ;;  %vm8752_vm12 = vnez %v8732_v30 }
 0x399   :  { %v3000_v14 = vadd.f32 %v4106_v2, %v7204_v20  ;;  %v4109_v11 = vadd.f32 %v4108_v36, %v4107_v9  ;;  %v3165_v2 = vand.u32 1, %v8744_v37  ;;  %v7376_v5 = vsel %vm8748_vm8, 0.0625, %v8120_v7  ;;  %vm8749_vm5 = vmand %vm7256_vm9, %vm7260_vm2 }
 0x39a   :  { %v7384_v21 = vsel %vm8749_vm5, 0.0625, %v8120_v7  ;;  %vm8751_vm14 = vmand %vm7271_vm0, %vm8750_vm6  ;;  %v7415_v29 = vsel %vm3188_vm7, 0.0625, %v8120_v7  ;;  %v3127_v30 = vand.u32 1, %v8756_v56  ;;  %v3162_v6 = vand.u32 1, %v8759_v50  ;;  %v8761_v56 = vld [vmem:[#allocation60_spill] sm:$0xff] }
 0x39b   :  { %v7293_v38 = vadd.f32 %v7153_v49, %v3000_v14  ;;  %v3003_v25 = vadd.f32 %v4109_v11, %v7204_v20  ;;  %v2952_v49 = vadd.f32 %v7177_v24, %v7204_v20  ;;  %v7392_v58 = vsel %vm8751_vm14, 0.0625, %v8120_v7  ;;  %vm8753_vm4 = vmand %vm7284_vm1, %vm8752_vm12 }
 0x39c   :  { %v7404_v61 = vsel %vm8753_vm4, 0.0625, %v8120_v7  ;;  %v3161_v14 = vand.u32 1, %v8755_v19  ;;  %v2963_v19 = vadd.f32 %v7183_v17, %v7204_v20  ;;  %v3160_v52 = vand.u32 1, %v8761_v56 }
 0x39d   :  { %v7326_v41 = vadd.f32 %v7157_v22, %v3003_v25  ;;  %v4196_v24 = vpop.f32.mrb[48].mxu0  ;;  %v2955_v22 = vadd.f32 %v7179_v54, %v7204_v20  ;;  %v7360_v54 = vsel %vm8746_vm15, 0.0625, %v8120_v7  ;;  %v2968_v25 = vadd.f32 %v7185_v35, %v7204_v20 }
 0x39e   :  { %v7336_v9 = vadd.f32 %v4196_v24, %v2952_v49  ;;  %v3040_v12 = vpop.f32.mrb[49].mxu0  ;;  %v3130_v49 = vand.u32 1, %v8758_v31  ;;  %vm8762_vm9 = vcmask 261120   ;;  %vm7459_vm0 = vcmp.eq.s32.totalorder %v3163_v33, 0 }
 0x39f   :  { %v7352_v0 = vadd.f32 %v3040_v12, %v2944_v48  ;;  %v4197_v46 = vpop.f32.mrb[50].mxu0  ;;  %vm8763_vm2 = vmmov %vm8762_vm9  ;;  %vm7469_vm13 = vcmp.eq.s32.totalorder %v3161_v14, 0  ;;  %vm7480_vm15 = vcmp.eq.s32.totalorder %v3132_v8, 0  ;;  %vm7486_vm7 = vcmp.eq.s32.totalorder %v3164_v60, 0 }
 0x3a0   :  { %v7368_v10 = vadd.f32 %v4197_v46, %v2955_v22  ;;  %v3043_v28 = vpop.f32.mrb[51].mxu0  ;;  %v3105_v59 = vmax.f32 %v7336_v9, 0.0  ;;  %v2960_v22 = vadd.f32 %v7181_v27, %v7204_v20  ;;  %v8760_v46 = vld [vmem:[#allocation62_spill] sm:$0xff]  ;;  %vm8772_vm1 = vmmov %vm8763_vm2  ;;  %vm7490_vm3 = vcmp.eq.s32.totalorder %v3127_v30, 0 }
 0x3a1   :  { %v3103_v26 = vmax.f32 %v7352_v0, 0.0  ;;  %v7396_v36 = vadd.f32 %v3043_v28, %v2947_v43  ;;  %v3128_v35 = vand.u32 1, %v8760_v46  ;;  %vm7494_vm8 = vcmp.eq.s32.totalorder %v3159_v23, 0  ;;  %vm8783_vm6 = vmmov %vm8772_vm1  ;;  %v4373_v0 = vld [vmem:[%s7848_s2 + $0xe8] sm:$0xff]  }
 0x3a2   :  { %v8009_v62 = vmax.f32 %v7368_v10, 0.0  ;;  %v3217_v24 = vmul.f32 %v7350_v3, %v3105_v59  ;;  %vm7498_vm5 = vcmp.eq.s32.totalorder %v3130_v49, 0  ;;  %v2984_v23 = vadd.f32 %v7193_v47, %v7204_v20  ;;  %vm8788_vm4 = vmmov %vm8772_vm1 }
 0x3a3   :  { %v3215_v11 = vmul.f32 %v7360_v54, %v3103_v26  ;;  %v3104_v55 = vmax.f32 %v7396_v36, 0.0  ;;  %vm7510_vm14 = vcmp.eq.s32.totalorder %v3128_v35, 0  ;;  %vm7514_vm12 = vcmp.eq.s32.totalorder %v3160_v52, 0 }
 0x3a4   :  { %v3218_v50 = vmul.f32 %v7376_v5, %v8009_v62  ;;  %v3234_v39 = vsel %vm8772_vm1, %v3217_v24, 0.0  ;;  %v2976_v47 = vadd.f32 %v7189_v63, %v7204_v20  ;;  %vm7539_vm1 = vcmp.eq.s32.totalorder %v3162_v6, 0 }
 0x3a5   :  { %v3216_v48 = vmul.f32 %v7384_v21, %v3104_v55  ;;  %v4200_v12 = vpop.f32.mrb[52].mxu0  ;;  %v3231_v31 = vsel %vm8762_vm9, %v3215_v11, 0.0  ;;  %vm3191_vm9 = vmand %vm7490_vm3, %vm7494_vm8 }
 0x3a6   :  { %v7439_v43 = vadd.f32 %v4200_v12, %v2968_v25  ;;  %v3056_v28 = vpop.f32.mrb[53].mxu0  ;;  %v3236_v8 = vsel %vm8783_vm6, %v3218_v50, 0.0  ;;  %vm8791_vm3 = vmmov %vm8788_vm4 }
 0x3a7   :  { %v3232_v27 = vsel %vm8763_vm2, %v3216_v48, 0.0  ;;  %v7451_v46 = vadd.f32 %v3056_v28, %v2960_v22  ;;  %v4201_v25 = vpop.f32.mrb[54].mxu0  ;;  %vm3193_vm2 = vmand %vm7465_vm10, %vm7469_vm13  ;;  %vm7594_vm10 = vcmp.eq.s32.totalorder %v3133_v57, 0  ;;  %vm7600_vm13 = vcmp.eq.s32.totalorder %v3165_v2, 0 }
 0x3a8   :  { %v3233_v11 = vadd.f32 %v3232_v27, %v3231_v31  ;;  %v7463_v12 = vadd.f32 %v4201_v25, %v2971_v53  ;;  %v3059_v56 = vpop.f32.mrb[55].mxu0  ;;  %v3109_v34 = vmax.f32 %v7439_v43, 0.0  ;;  %vm3192_vm8 = vmand %vm7510_vm14, %vm7514_vm12  ;;  %v8794_v31 = vld [vmem:[#allocation103_spill] sm:$0xff]  ;;  %v8010_v28 = vmax.f32 %v7228_v15, 0.0 }
 0x3a9   :  { %v3107_v33 = vmax.f32 %v7451_v46, 0.0  ;;  %v7476_v22 = vadd.f32 %v3059_v56, %v2963_v19  ;;  %vm8793_vm6 = vmmov %vm8791_vm3  ;;  %v3166_v49 = vand.u32 1, %v8794_v31  ;;  %v8014_v31 = vmax.f32 %v7293_v38, 0.0 }
 0x3aa   :  { %v3235_v14 = vadd.f32 %v3234_v39, %v3233_v11  ;;  %v8017_v60 = vmax.f32 %v7463_v12, 0.0  ;;  %v3221_v50 = vmul.f32 %v7392_v58, %v3109_v34  ;;  %v2987_v39 = vadd.f32 %v7195_v18, %v7204_v20  ;;  %v8792_v18 = vld [vmem:[#allocation108_spill] sm:$0xff]  ;;  %vm3194_vm14 = vmand %vm7498_vm5, %vm7539_vm1 }
 0x3ab   :  { %v3219_v40 = vmul.f32 %v7404_v61, %v3107_v33  ;;  %v3108_v30 = vmax.f32 %v7476_v22, 0.0  ;;  %v3134_v6 = vand.u32 1, %v8792_v18  ;;  %vm3195_vm5 = vmand %vm7455_vm11, %vm7459_vm0 }
 0x3ac   :  { %v3237_v19 = vadd.f32 %v3236_v8, %v3235_v14  ;;  %v3222_v63 = vmul.f32 %v7412_v16, %v8017_v60  ;;  %vm8795_vm12 = vmmov %vm8791_vm3  ;;  %v7619_v37 = vsel %vm3195_vm5, 0.0625, %v8120_v7  ;;  %v8018_v14 = vmax.f32 %v7326_v41, 0.0 }
 0x3ad   :  { %v3238_v27 = vsel %vm8788_vm4, %v3219_v40, 0.0  ;;  %v3220_v25 = vmul.f32 %v7415_v29, %v3108_v30  ;;  %v4204_v11 = vpop.f32.mrb[56].mxu0  ;;  %v2979_v40 = vadd.f32 %v7191_v42, %v7204_v20  ;;  %vm3196_vm11 = vmand %vm7480_vm15, %vm7486_vm7  ;;  %vm7621_vm0 = vcmp.eq.s32.totalorder %v3134_v6, 0 }
 0x3ae   :  { %v3239_v35 = vadd.f32 %v3238_v27, %v3237_v19  ;;  %v7531_v52 = vadd.f32 %v4204_v11, %v2984_v23  ;;  %v3072_v56 = vpop.f32.mrb[57].mxu0  ;;  %v7557_v23 = vsel %vm3191_vm9, 0.0625, %v8120_v7  ;;  %v3242_v11 = vsel %vm8793_vm6, %v3221_v50, 0.0  ;;  %vm3197_vm15 = vmand %vm7594_vm10, %vm7600_vm13 }
 0x3af   :  { %v3240_v24 = vsel %vm8791_vm3, %v3220_v25, 0.0  ;;  %v7547_v53 = vadd.f32 %v3072_v56, %v2976_v47  ;;  %v4205_v8 = vpop.f32.mrb[58].mxu0  ;;  %v7577_v50 = vsel %vm3193_vm2, 0.0625, %v8120_v7  ;;  %v7580_v56 = vsel %vm3192_vm8, 0.0625, %v8120_v7  ;;  %vm8804_vm7 = vmmov %vm8791_vm3 }
 0x3b0   :  { %v3241_v19 = vadd.f32 %v3240_v24, %v3239_v35  ;;  %v7559_v27 = vadd.f32 %v4205_v8, %v2987_v39  ;;  %v3075_v25 = vpop.f32.mrb[59].mxu0  ;;  %v8013_v47 = vmax.f32 %v7531_v52, 0.0  ;;  %v3244_v51 = vsel %vm8795_vm12, %v3222_v63, 0.0  ;;  %vm8805_vm9 = vmmov %vm8791_vm3 }
 0x3b1   :  { %v8016_v42 = vmax.f32 %v7547_v53, 0.0  ;;  %v7568_v20 = vadd.f32 %v3075_v25, %v2979_v40  ;;  %v7605_v63 = vsel %vm3194_vm14, 0.0625, %v8120_v7  ;;  %v8011_v24 = vmax.f32 %v7213_v32, 0.0  ;;  %vm8806_vm1 = vmmov %vm8791_vm3 }
 0x3b2   :  { %v3243_v35 = vadd.f32 %v3242_v11, %v3241_v19  ;;  %v8012_v62 = vmax.f32 %v7559_v27, 0.0  ;;  %v3225_v1 = vmul.f32 %v7577_v50, %v8013_v47  ;;  %vm7625_vm4 = vcmp.eq.s32.totalorder %v3166_v49, 0  ;;  %vm8807_vm3 = vmmov %vm8806_vm1 }
 0x3b3   :  { %v3223_v39 = vmul.f32 %v7557_v23, %v8016_v42  ;;  %v8015_v48 = vmax.f32 %v7568_v20, 0.0  ;;  %v7640_v6 = vsel %vm3196_vm11, 0.0625, %v8120_v7  ;;  %v3227_v11 = vmul.f32 %v7619_v37, %v8011_v24  ;;  %vm3198_vm2 = vmand %vm7621_vm0, %vm7625_vm4 }
 0x3b4   :  { %v3245_v17 = vadd.f32 %v3244_v51, %v3243_v35  ;;  %v3226_v40 = vmul.f32 %v7605_v63, %v8012_v62  ;;  %v3255_v49 = vsel %vm8806_vm1, %v3225_v1, 0.0  ;;  %v7652_v35 = vsel %vm3197_vm15, 0.0625, %v8120_v7  ;;  %vm8808_vm8 = vmmov %vm8806_vm1 }
 0x3b5   :  { %v3224_v57 = vmul.f32 %v7580_v56, %v8015_v48  ;;  %v3252_v8 = vsel %vm8804_vm7, %v3223_v39, 0.0  ;;  %v3228_v39 = vmul.f32 %v7640_v6, %v8010_v28  ;;  %v3229_v1 = vmul.f32 %v7652_v35, %v8014_v31  ;;  %vm8809_vm6 = vmmov %vm8806_vm1 }
 0x3b6   :  { %v3246_v19 = vrot.slane %v3245_v17, 4  ;;  %v3257_v13 = vsel %vm8807_vm3, %v3226_v40, 0.0  ;;  %vm8810_vm14 = vmmov %vm8806_vm1  ;;  %vm3287_vm12 = vcmask 1041409   ;;  %vm8813_vm13 = vmmov 0  }
 0x3b7   :  { %v3253_v18 = vsel %vm8805_vm9, %v3224_v57, 0.0  ;;  %v7660_v57 = vsel %vm3198_vm2, 0.0625, %v8120_v7  ;;  %v3263_v24 = vsel %vm8810_vm14, %v3229_v1, 0.0  ;;  %vm8811_vm5 = vmmov %vm8806_vm1  ;;  %v8825_v43 = vmax.f32 %v7531_v52, 0.0 }
 0x3b8   :  { %v3254_v25 = vadd.f32 %v3253_v18, %v3252_v8  ;;  %v3247_v45 = vadd.f32 %v3246_v19, %v3245_v17  ;;  %v3259_v8 = vsel %vm8808_vm8, %v3227_v11, 0.0  ;;  %vm8812_vm10 = vmmov %vm8806_vm1  ;;  %v8832_v52 = vmax.f32 %v7326_v41, 0.0  ;;  %v8844_v41 = vld [vmem:[#allocation12_spill] sm:$0xff] }
 0x3b9   :  { %vm8814_vm11 = vmmov %vm8806_vm1 }
 0x3ba   :  { %v3256_v51 = vadd.f32 %v3255_v49, %v3254_v25  ;;  %v3261_v25 = vsel %vm8809_vm6, %v3228_v39, 0.0  ;;  %v3230_v49 = vmul.f32 %v7660_v57, %v8018_v14  ;;  %v3248_v28 = vrot.slane %v3247_v45, 2  ;;  %vm8817_vm0 = vmmov %vm8806_vm1 }
 0x3bb   :  { %vm8818_vm4 = vmmov %vm8817_vm0 }
 0x3bc   :  { %v3258_v2 = vadd.f32 %v3257_v13, %v3256_v51  ;;  %v3265_v17 = vsel %vm8811_vm5, %v3230_v49, 0.0  ;;  %v3249_v19 = vadd.f32 %v3248_v28, %v3247_v45  ;;  %vm8819_vm15 = vmmov %vm8817_vm0 }
 0x3bd   :  { %vm8823_vm7 = vmmov %vm8817_vm0 }
 0x3be   :  { %v3260_v18 = vadd.f32 %v3259_v8, %v3258_v2  ;;  %v3250_v13 = vrot.slane %v3249_v19, 1  ;;  %vm8824_vm9 = vmmov %vm8817_vm0 }
 0x3bf   :  { %vm8829_vm2 = vmmov %vm8817_vm0 }
 0x3c0   :  { %v3262_v40 = vadd.f32 %v3261_v25, %v3260_v18  ;;  %v3251_v2 = vadd.f32 %v3250_v13, %v3249_v19  ;;  %v4372_v19 = vld [vmem:[%s7848_s2 + $0xe0] sm:$0xff]   ;;  %vm8830_vm1 = vmmov %vm8817_vm0 }
 0x3c1   :  { %vm8833_vm3 = vmmov %vm8817_vm0 }
 0x3c2   :  { %v3264_v62 = vadd.f32 %v3263_v24, %v3262_v40  ;;  %v3277_v48 = vpack.c.bf16 %v3251_v2, %v3251_v2  ;;  %v4368_v24 = vld [vmem:[%s7848_s2 + $0xc0] sm:$0xff]   ;;  %v4370_v40 = vld [vmem:[%s7848_s2 + $0xd0] sm:$0xff]   ;;  %vm8835_vm8 = vmmov %vm8817_vm0 }
 0x3c3   :  { %vm8837_vm6 = vmmov %vm8817_vm0 }
 0x3c4   :  { %v3266_v11 = vadd.f32 %v3265_v17, %v3264_v62  ;;  %v3285_v14 = vunpack.c.l.b16 %v3277_v48  ;;  %v4371_v17 = vld [vmem:[%s7848_s2 + $0xd8] sm:$0xff]   ;;  %vm8839_vm14 = vmmov %vm8817_vm0 }
 0x3c5   :  { %vm8841_vm5 = vmmov %vm8817_vm0 }
 0x3c6   :  { %v3267_v51 = vrot.slane %v3266_v11, 4 }
 0x3c8   :  { %v3268_v47 = vadd.f32 %v3267_v51, %v3266_v11  ;;  %v4423_v11 = vmov 1966171168  }
 0x3c9   :  { %v3418_v51 = vunpack.c.l.s4 %v4423_v11 }
 0x3ca   :  { %v3269_v31 = vrot.slane %v3268_v47, 2 }
 0x3cb   :  { %v3419_v13 = vunpack.c.0.s8 %v3418_v51 }
 0x3cc   :  { %v3270_v8 = vadd.f32 %v3269_v31, %v3268_v47  ;;  %v4369_v47 = vld [vmem:[%s7848_s2 + $0xc8] sm:$0xff]  }
 0x3cd   :  { %v3422_v2 = vsub.s32 %v3419_v13, %v8691_v4 }
 0x3ce   :  { %v3271_v39 = vrot.slane %v3270_v8, 1 }
 0x3d0   :  { %v3272_v42 = vadd.f32 %v3271_v39, %v3270_v8  ;;  %v4020_v8 = vld.sshfl [vmem:[%s7847_s1] sm:$0x1 pattern:$0x75316420] }
 0x3d1   :  { %v3844_v39 = vrot.slane %v4020_v8, %v3422_v2 }
 0x3d2   :  { %v3278_v60 = vpack.c.bf16 %v3272_v42, %v3272_v42 }
 0x3d3   :  { %3845 = vrot.lane.b32.xlu0 %v3844_v39, %s4420_s7  ;;  %v8816_v39 = vmax.f32 %v7368_v10, 0.0 }
 0x3d4   :  { %v3286_v18 = vunpack.c.l.b16 %v3278_v60  ;;  %v3281_v60 = vsub.s32 3, %v8691_v4 }
 0x3d6   :  { %v3288_v1 = vsel %vm3287_vm12, %v3286_v18, %v3285_v14  ;;  %v3282_v42 = vrot.slane %v7201_v44, %v3281_v60  ;;  %v3353_v18 = vsub.s32 4, %v8691_v4 }
 0x3d7   :  { %v3289_v62 = vpack.c.b16 %v3288_v1, %v3288_v1 }
 0x3d8   :  { %v3354_v1 = vrot.slane %v7201_v44, %v3353_v18 }
 0x3d9   :  { %4215 = vmatmul.mubr.msk.bf16.vlgmr.msra.gmra.mrb[20].mxu1 %vm8812_vm10, %v3289_v62  ;;  %vm8843_vm10 = vmmov %vm8817_vm0 }
 0x3da   :  { %4219 = vmatpush3.bf16.msra.mxu1 %v4368_v24  ;;  %4222 = vmatprep.mubr.msk.bf16.mxu1 %vm8813_vm13, %v8120_v7  ;;  %vm8845_vm13 = vmmov %vm8817_vm0 }
 0x3db   :  { %4220 = vmatprep.subr.bf16.mxu1 %v8120_v7 }
 0x3de   :  { %4221 = vmatpush3.bf16.msra.mxu1 %v4369_v47 }
 0x3df   :  { %4226 = vmatprep.subr.bf16.mxu1 %v4370_v40 }
 0x4ac   :  { %v3339_v48 = vpop.f32.mrb[20].mxu1 }
 0x4ad   :  { %v3340_v28 = vadd.f32 %v3339_v48, %v3282_v42  ;;  %v4216_v31 = vpop.f32.mrb[21].mxu1 }
 0x4ae   :  { %v3342_v14 = vpop.f32.mrb[22].mxu1 }
 0x4af   :  { %v3345_v45 = vmax.f32 %v3340_v28, 0.0  ;;  %v4217_v25 = vpop.f32.mrb[23].mxu1 }
 0x4b1   :  { %v3350_v49 = vpack.c.bf16 %v3345_v45, %v3345_v45 }
 0x4b3   :  { %4223 = vmatmul.mubr.msk.bf16.vlgmr.msra.gmra.mrb[24].mxu1 %vm8814_vm11, %v3350_v49  ;;  %vm8847_vm11 = vmmov %vm8817_vm0 }
 0x4b4   :  { %4227 = vmatpush3.bf16.msra.mxu1 %v4370_v40 }
 0x4b5   :  { %4228 = vmatprep.subr.bf16.mxu1 %v4371_v17 }
 0x4b8   :  { %4229 = vmatpush3.bf16.msra.mxu1 %v4371_v17  ;;  %v8815_v17 = vld [vmem:[#allocation7_spill] sm:$0xff] }
 0x4b9   :  { %4246 = vmatprep.subr.bf16.mxu1 %v4372_v19 }
 0x586   :  { %v3404_v24 = vpop.f32.mrb[24].mxu1 }
 0x587   :  { %v3405_v62 = vadd.f32 %v3404_v24, %v3354_v1  ;;  %v4224_v47 = vpop.f32.mrb[25].mxu1 }
 0x588   :  { %v3407_v60 = vpop.f32.mrb[26].mxu1 }
 0x589   :  { %v3999_v42 = vmul.f32 -1.442695, %v3405_v62  ;;  %v4225_v48 = vpop.f32.mrb[27].mxu1  ;;  %v8827_v60 = vmax.f32 %v7213_v32, 0.0  ;;  %v8834_v32 = vld [vmem:[#allocation9_spill] sm:$0xff] }
 0x58b   :  { %4377 = vpow2.f32 %v3999_v42  ;;  %v8828_v42 = vmax.f32 %v7228_v15, 0.0  ;;  %v8836_v15 = vld [vmem:[#allocation8_spill] sm:$0xff] }
 0x595   :  { %v4378_v28 = vpop.eup %4377 }
 0x596   :  { %v3413_v31 = vadd.f32 1.0, %v4378_v28 }
 0x598   :  { %4379 = vrcp.f32 %v3413_v31  ;;  %v8831_v31 = vmax.f32 %v7293_v38, 0.0  ;;  %v8842_v38 = vld [vmem:[#allocation13_spill] sm:$0xff] }
 0x5a2   :  { %v4380_v14 = vpop.eup %4379 }
 0x5a3   :  { %v3423_v45 = vrot.slane %v4380_v14, %v3422_v2 }
 0x5a5   :  { %v3424_v25 = vcombine.high %v3423_v45, %v3423_v45  ;;  %v3431_v49 = vrot.slane %v3423_v45, %v3422_v2 }
 0x5a7   :  { %v3438_v40 = vrot.slane %v3424_v25, %v3422_v2  ;;  %v3442_v11 = vrot.slane %v3431_v49, %v8815_v17  ;;  %v8838_v25 = vld [vmem:[#allocation11_spill] sm:$0xff]  ;;  %v8840_v49 = vld [vmem:[#allocation10_spill] sm:$0xff] }
 0x5a9   :  { %v3449_v51 = vmul.f32 %v3442_v11, %v3103_v26  ;;  %v3450_v13 = vmul.f32 %v3442_v11, %v3104_v55  ;;  %v3451_v8 = vmul.f32 %v3442_v11, %v3105_v59  ;;  %v3452_v18 = vmul.f32 %v3442_v11, %v8816_v39 }
 0x5aa   :  { %v3453_v1 = vmul.f32 %v3442_v11, %v3107_v33  ;;  %v3454_v2 = vmul.f32 %v3442_v11, %v3108_v30  ;;  %v3446_v26 = vrot.slane %v3438_v40, %v8815_v17  ;;  %v3455_v10 = vmul.f32 %v3442_v11, %v3109_v34  ;;  %v8846_v40 = vld [vmem:[#allocation15_spill] sm:$0xff]  ;;  %v8848_v17 = vld [vmem:[#allocation14_spill] sm:$0xff] }
 0x5ab   :  { %v3469_v24 = vpack.c.bf16 %v3450_v13, %v3449_v51  ;;  %v3470_v62 = vpack.c.bf16 %v3452_v18, %v3451_v8  ;;  %v8820_v59 = vmax.f32 %v7463_v12, 0.0  ;;  %v8821_v55 = vmax.f32 %v7547_v53, 0.0  ;;  %v4375_v51 = vld [vmem:[%s7849_s3 + $0x8] sm:$0xff]   ;;  %v4376_v13 = vld [vmem:[%s7849_s3 + $0x10] ss:$0 sps:$4 sm:$0xff]  }
 0x5ac   :  { %v3471_v9 = vpack.c.bf16 %v3454_v2, %v3453_v1  ;;  %v8822_v33 = vmax.f32 %v7568_v20, 0.0  ;;  %v3459_v34 = vmul.f32 %v3446_v26, %v8825_v43  ;;  %v8826_v12 = vmax.f32 %v7559_v27, 0.0 }
 0x5ad   :  { %4230 = vmatprep.mubr.msk.bf16.mxu1 %vm8817_vm0, %v3469_v24  ;;  %v3456_v36 = vmul.f32 %v3442_v11, %v8820_v59  ;;  %v3457_v46 = vmul.f32 %v3446_v26, %v8821_v55  ;;  %v3461_v53 = vmul.f32 %v3446_v26, %v8827_v60  ;;  %v3462_v20 = vmul.f32 %v3446_v26, %v8828_v42  ;;  %v4374_v11 = vld [vmem:[%s7849_s3] sm:$0xff]  }
 0x5ae   :  { %4231 = vmatmul.mubr.msk.bf16.vlgmr.msra.gmra.mrb[28].mxu1 %vm8818_vm4, %v3470_v62  ;;  %v3458_v22 = vmul.f32 %v3446_v26, %v8822_v33  ;;  %v3463_v14 = vmul.f32 %v3446_v26, %v8831_v31  ;;  %v3464_v45 = vmul.f32 %v3446_v26, %v8832_v52  ;;  %4267 = vmatpush3.bf16.msra.mxu0 %v4374_v11  ;;  %vm8849_vm4 = vcmask 1043456  }
 0x5af   :  { %4247 = vmatpush3.bf16.msra.mxu1 %v4372_v19  ;;  %4234 = vmatprep.mubr.msk.bf16.mxu1 %vm8819_vm15, %v3471_v9  ;;  %v3472_v30 = vpack.c.bf16 %v3456_v36, %v3455_v10  ;;  %v3460_v19 = vmul.f32 %v3446_v26, %v8826_v12  ;;  %v3475_v28 = vpack.c.bf16 %v3462_v20, %v3461_v53  ;;  %v3882_v8 = vsel %vm8849_vm4, %v4376_v13, 0  ;;  %vm8850_vm15 = vmmov %vm8817_vm0 }
 0x5b0   :  { %4248 = vmatprep.subr.bf16.mxu1 %v4373_v0  ;;  %v3473_v47 = vpack.c.bf16 %v3458_v22, %v3457_v46  ;;  %v3476_v27 = vpack.c.bf16 %v3464_v45, %v3463_v14  ;;  %4268 = vmatprep.subr.bf16.mxu0 %v8120_v7  ;;  %v3479_v39 = vsub.s32 5, %v8691_v4  ;;  %v3620_v18 = vsub.s32 6, %v8691_v4  ;;  %vm8863_vm4 = vmmov %vm8817_vm0 }
 0x5b1   :  { %v3474_v48 = vpack.c.bf16 %v3460_v19, %v3459_v34 }
 0x5b2   :  { %4269 = vmatpush3.bf16.msra.mxu0 %v4375_v51  ;;  %v3480_v1 = vrot.slane %v7201_v44, %v3479_v39  ;;  %v3621_v2 = vrot.slane %v7201_v44, %v3620_v18 }
 0x5b3   :  { %4249 = vmatpush3.bf16.msra.mxu1 %v4373_v0  ;;  %4270 = vmatprep.subr.bf16.mxu0 %v8120_v7 }
 0x5b4   :  { %v7779_v24 = vadd.f32 %v3621_v2, %v3480_v1 }
 0x5b6   :  { %4235 = vmatmul.mubr.msk.bf16.gmra.mrb[32].mxu1 %vm8823_vm7, %v3472_v30  ;;  %4271 = vmatpush3.bf16.msra.mxu0 %v3882_v8  ;;  %vm8851_vm7 = vmmov %vm8817_vm0 }
 0x5b7   :  { %4238 = vmatprep.mubr.msk.bf16.mxu1 %vm8824_vm9, %v3473_v47  ;;  %vm8852_vm9 = vmmov %vm8817_vm0 }
 0x5be   :  { %4239 = vmatmul.mubr.msk.bf16.gmra.mrb[36].mxu1 %vm8829_vm2, %v3474_v48  ;;  %vm8853_vm2 = vmmov %vm8817_vm0 }
 0x5bf   :  { %4242 = vmatprep.mubr.msk.bf16.mxu1 %vm8830_vm1, %v3475_v28  ;;  %vm8854_vm1 = vmmov %vm8817_vm0 }
 0x5c6   :  { %4243 = vmatmul.mubr.msk.bf16.gmra.mrb[40].mxu1 %vm8833_vm3, %v3476_v27  ;;  %vm8855_vm3 = vmmov %vm8817_vm0 }
 0x5c7   :  { %4250 = vmatprep.mubr.msk.bf16.mxu1 %vm8835_vm8, %v8834_v32  ;;  %vm8856_vm8 = vmmov %vm8817_vm0 }
 0x5ce   :  { %4251 = vmatmul.mubr.msk.bf16.vlgmr.msra.gmra.mrb[28].mxu1 %vm8837_vm6, %v8836_v15  ;;  %vm8857_vm6 = vmmov %vm8817_vm0 }
 0x5cf   :  { %4254 = vmatprep.mubr.msk.bf16.mxu1 %vm8839_vm14, %v8838_v25  ;;  %vm8858_vm14 = vmmov %vm8817_vm0 }
 0x5d6   :  { %4255 = vmatmul.mubr.msk.bf16.gmra.mrb[32].mxu1 %vm8841_vm5, %v8840_v49  ;;  %vm8859_vm5 = vmmov %vm8817_vm0 }
 0x5d7   :  { %4258 = vmatprep.mubr.msk.bf16.mxu1 %vm8843_vm10, %v8842_v38  ;;  %vm8860_vm10 = vmmov %vm8817_vm0 }
 0x5de   :  { %4259 = vmatmul.mubr.msk.bf16.gmra.mrb[36].mxu1 %vm8845_vm13, %v8844_v41  ;;  %vm8861_vm13 = vmmov %vm8817_vm0 }
 0x5df   :  { %4262 = vmatprep.mubr.msk.bf16.mxu1 %vm8847_vm11, %v8846_v40  ;;  %vm8862_vm11 = vmmov %vm8817_vm0 }
 0x5e6   :  { %4263 = vmatmul.mubr.msk.bf16.gmra.mrb[40].mxu1 %vm8817_vm0, %v8848_v17 }
 0x6a1   :  { %v4252_v62 = vpop.f32.mrb[28].mxu1 }
 0x6a2   :  { %v4281_v0 = vadd.f32 %v7779_v24, %v4252_v62  ;;  %v3668_v26 = vpop.f32.mrb[29].mxu1 }
 0x6a3   :  { %v4283_v9 = vadd.f32 %v7779_v24, %v3668_v26  ;;  %v4253_v7 = vpop.f32.mrb[30].mxu1 }
 0x6a4   :  { %v4285_v10 = vadd.f32 %v7779_v24, %v4253_v7  ;;  %v3671_v59 = vpop.f32.mrb[31].mxu1  ;;  %v3749_v36 = vmax.f32 %v4281_v0, 0.0 }
 0x6a5   :  { %v3747_v55 = vmax.f32 %v4283_v9, 0.0  ;;  %v4287_v4 = vadd.f32 %v7779_v24, %v3671_v59 }
 0x6a6   :  { %v3750_v33 = vmax.f32 %v4285_v10, 0.0  ;;  %v3765_v22 = vmul.f32 %v3749_v36, %v7350_v3 }
 0x6a7   :  { %v3763_v46 = vmul.f32 %v3747_v55, %v7360_v54  ;;  %v3748_v44 = vmax.f32 %v4287_v4, 0.0 }
 0x6a8   :  { %v3766_v19 = vmul.f32 %v3750_v33, %v7376_v5  ;;  %v3782_v3 = vsel %vm8852_vm9, %v3765_v22, 0.0  ;;  %vm8865_vm9 = vmmov %vm8817_vm0 }
 0x6a9   :  { %v3764_v30 = vmul.f32 %v3748_v44, %v7384_v21  ;;  %v4256_v47 = vpop.f32.mrb[32].mxu1  ;;  %v3779_v12 = vsel %vm8850_vm15, %v3763_v46, 0.0  ;;  %vm8864_vm15 = vmmov %vm8817_vm0 }
 0x6aa   :  { %v4289_v43 = vadd.f32 %v7779_v24, %v4256_v47  ;;  %v3684_v34 = vpop.f32.mrb[33].mxu1  ;;  %v3784_v52 = vsel %vm8853_vm2, %v3766_v19, 0.0 }
 0x6ab   :  { %v3780_v60 = vsel %vm8851_vm7, %v3764_v30, 0.0  ;;  %v4291_v53 = vadd.f32 %v7779_v24, %v3684_v34  ;;  %v4257_v42 = vpop.f32.mrb[34].mxu1  ;;  %vm3877_vm7 = vcmask 326656  }
 0x6ac   :  { %v3781_v54 = vadd.f32 %v3780_v60, %v3779_v12  ;;  %v4293_v20 = vadd.f32 %v7779_v24, %v4257_v42  ;;  %v3687_v48 = vpop.f32.mrb[35].mxu1  ;;  %v3753_v21 = vmax.f32 %v4289_v43, 0.0 }
 0x6ad   :  { %v3751_v28 = vmax.f32 %v4291_v53, 0.0  ;;  %v4295_v31 = vadd.f32 %v7779_v24, %v3687_v48 }
 0x6ae   :  { %v3783_v14 = vadd.f32 %v3782_v3, %v3781_v54  ;;  %v3754_v45 = vmax.f32 %v4293_v20, 0.0  ;;  %v3769_v15 = vmul.f32 %v3753_v21, %v7392_v58 }
 0x6af   :  { %v3767_v5 = vmul.f32 %v3751_v28, %v7404_v61  ;;  %v3752_v27 = vmax.f32 %v4295_v31, 0.0 }
 0x6b0   :  { %v3785_v32 = vadd.f32 %v3784_v52, %v3783_v14  ;;  %v3770_v11 = vmul.f32 %v3754_v45, %v7412_v16  ;;  %v3790_v18 = vsel %vm8856_vm8, %v3769_v15, 0.0 }
 0x6b1   :  { %v3786_v25 = vsel %vm8854_vm1, %v3767_v5, 0.0  ;;  %v3768_v49 = vmul.f32 %v3752_v27, %v7415_v29  ;;  %v4260_v38 = vpop.f32.mrb[36].mxu1 }
 0x6b2   :  { %v3787_v41 = vadd.f32 %v3786_v25, %v3785_v32  ;;  %v4297_v40 = vadd.f32 %v7779_v24, %v4260_v38  ;;  %v3700_v17 = vpop.f32.mrb[37].mxu1  ;;  %v3792_v0 = vsel %vm8857_vm6, %v3770_v11, 0.0 }
 0x6b3   :  { %v3788_v51 = vsel %vm8855_vm3, %v3768_v49, 0.0  ;;  %v4299_v61 = vadd.f32 %v7779_v24, %v3700_v17  ;;  %v4261_v13 = vpop.f32.mrb[38].mxu1 }
 0x6b4   :  { %v3789_v8 = vadd.f32 %v3788_v51, %v3787_v41  ;;  %v4301_v39 = vadd.f32 %v7779_v24, %v4261_v13  ;;  %v3703_v58 = vpop.f32.mrb[39].mxu1  ;;  %v3757_v1 = vmax.f32 %v4297_v40, 0.0  ;;  %v3846_v13 = vpop.permute.xlu0 %3845 }
 0x6b5   :  { %v3755_v29 = vmax.f32 %v4299_v61, 0.0  ;;  %v4303_v2 = vadd.f32 %v7779_v24, %v3703_v58 }
 0x6b6   :  { %v3791_v62 = vadd.f32 %v3790_v18, %v3789_v8  ;;  %v3758_v26 = vmax.f32 %v4301_v39, 0.0  ;;  %v3773_v10 = vmul.f32 %v3757_v1, %v7577_v50  ;;  %v4021_v18 = vld [vmem:[%s7851_s5] ss:$0 sm:$0xff] }
 0x6b7   :  { %v3771_v16 = vmul.f32 %v3755_v29, %v7557_v23  ;;  %v3756_v9 = vmax.f32 %v4303_v2, 0.0 }
 0x6b8   :  { %v3793_v7 = vadd.f32 %v3792_v0, %v3791_v62  ;;  %v3774_v33 = vmul.f32 %v3758_v26, %v7605_v63 }
 0x6b9   :  { %v3772_v59 = vmul.f32 %v3756_v9, %v7580_v56  ;;  %v4264_v36 = vpop.f32.mrb[40].mxu1  ;;  %v3800_v46 = vsel %vm8858_vm14, %v3771_v16, 0.0  ;;  %v3803_v56 = vsel %vm8860_vm10, %v3773_v10, 0.0 }
 0x6ba   :  { %v4305_v55 = vadd.f32 %v7779_v24, %v4264_v36  ;;  %v3716_v4 = vpop.f32.mrb[41].mxu1  ;;  %v3794_v30 = vrot.slane %v3793_v7, 4  ;;  %v3805_v53 = vsel %vm8861_vm13, %v3774_v33, 0.0 }
 0x6bb   :  { %v3801_v44 = vsel %vm8859_vm5, %v3772_v59, 0.0  ;;  %v4307_v22 = vadd.f32 %v7779_v24, %v3716_v4  ;;  %v4265_v23 = vpop.f32.mrb[42].mxu1 }
 0x6bc   :  { %v3802_v47 = vadd.f32 %v3801_v44, %v3800_v46  ;;  %v4309_v43 = vadd.f32 %v7779_v24, %v4265_v23  ;;  %v3719_v50 = vpop.f32.mrb[43].mxu1  ;;  %v3761_v34 = vmax.f32 %v4305_v55, 0.0  ;;  %v3795_v20 = vadd.f32 %v3794_v30, %v3793_v7 }
 0x6bd   :  { %v3759_v12 = vmax.f32 %v4307_v22, 0.0  ;;  %v4311_v19 = vadd.f32 %v7779_v24, %v3719_v50 }
 0x6be   :  { %v3804_v60 = vadd.f32 %v3803_v56, %v3802_v47  ;;  %v3762_v42 = vmax.f32 %v4309_v43, 0.0  ;;  %v3777_v3 = vmul.f32 %v3761_v34, %v7652_v35  ;;  %v3796_v52 = vrot.slane %v3795_v20, 2 }
 0x6bf   :  { %v3775_v63 = vmul.f32 %v3759_v12, %v7619_v37  ;;  %v3760_v54 = vmax.f32 %v4311_v19, 0.0 }
 0x6c0   :  { %v3806_v48 = vadd.f32 %v3805_v53, %v3804_v60  ;;  %v3778_v14 = vmul.f32 %v3762_v42, %v7660_v57  ;;  %v3811_v45 = vsel %vm8863_vm4, %v3777_v3, 0.0  ;;  %v3797_v15 = vadd.f32 %v3796_v52, %v3795_v20 }
 0x6c1   :  { %v3807_v21 = vsel %vm8862_vm11, %v3775_v63, 0.0  ;;  %v3776_v28 = vmul.f32 %v3760_v54, %v7640_v6 }
 0x6c2   :  { %v3808_v31 = vadd.f32 %v3807_v21, %v3806_v48  ;;  %v3813_v27 = vsel %vm8864_vm15, %v3778_v14, 0.0  ;;  %v3798_v49 = vrot.slane %v3797_v15, 1 }
 0x6c3   :  { %v3809_v24 = vsel %vm8817_vm0, %v3776_v28, 0.0 }
 0x6c4   :  { %v3810_v5 = vadd.f32 %v3809_v24, %v3808_v31  ;;  %v3799_v41 = vadd.f32 %v3798_v49, %v3797_v15 }
 0x6c6   :  { %v3812_v37 = vadd.f32 %v3811_v45, %v3810_v5  ;;  %v3821_v57 = vpack.c.bf16 %v3799_v41, %v3799_v41 }
 0x6c8   :  { %v3814_v32 = vadd.f32 %v3813_v27, %v3812_v37  ;;  %v3826_v51 = vunpack.c.l.b16 %v3821_v57 }
 0x6ca   :  { %v3815_v25 = vrot.slane %v3814_v32, 4 }
 0x6cc   :  { %v3816_v35 = vadd.f32 %v3815_v25, %v3814_v32 }
 0x6ce   :  { %v3817_v38 = vrot.slane %v3816_v35, 2 }
 0x6d0   :  { %v3818_v6 = vadd.f32 %v3817_v38, %v3816_v35 }
 0x6d2   :  { %v3819_v40 = vrot.slane %v3818_v6, 1 }
 0x6d4   :  { %v3820_v17 = vadd.f32 %v3819_v40, %v3818_v6 }
 0x6d6   :  { %v3822_v11 = vpack.c.bf16 %v3820_v17, %v3820_v17 }
 0x6d8   :  { %v3827_v61 = vunpack.c.l.b16 %v3822_v11 }
 0x6da   :  { %v3828_v8 = vsel %vm3287_vm12, %v3827_v61, %v3826_v51 }
 0x6db   :  { %v3829_v39 = vpack.c.b16 %v3828_v8, %v3828_v8 }
 0x6dd   :  { %v3849_v58 = vsel %vm8865_vm9, %v3829_v39, %v3846_v13 }
 0x6de   :  { %4273 = vmatmul.mubr.msk.bf16.vlgmr.msra.gmra.mrb[60].mxu0 %vm3877_vm7, %v3849_v58 }
 0x7b1   :  { %v3918_v1 = vpop.f32.mrb[60].mxu0 }
 0x7b2   :  { %v3919_v29 = vadd.f32 %v4021_v18, %v3918_v1  ;;  %v4274_v2 = vpop.f32.mrb[61].mxu0 }
 0x7b3   :  { %v3921_v62 = vpop.f32.mrb[62].mxu0 }
 0x7b4   :  { %3924 = vst [vmem:[#allocation3] sm:$0x3] %v3919_v29  ;;  %v4275_v0 = vpop.f32.mrb[63].mxu0 }
 0x7b5   :  { %4404 = shalt.err (!%p4401_p4)
}
 0x7b6   :  { %s4405_s5 = scalar_lea.hbm %s7852_s6, 32 }
 0x7b7   :  { %p4406_p5 = scmp.ne.s32.totalorder %s7852_s6, %s4405_s5  ;;  %p4409_p6 = scmp.lt.u32.totalorder %s4405_s5, %s7852_s6 }
 0x7b9   :  { %p4411_p7 = pnand %p4409_p6, %p4406_p5 }
 0x7bb   :  { %4414 = shalt.err (!%p4411_p7)
}
 0x7bc   :  { %3934 = dma.vmem_to_hbm [thread:$0]  %s3932_s19, 32, %s7852_s6, [#allocation4]  }
 0x7bd   :  { %4415 = dma.done.wait [#allocation4], 32  }
 0x7be   :  { %4416 = vsyncadd [#allocation4], 4294967264 }
 0x7bf   :  { %3938 = vsyncpa [#allocation4], 1 }

</bundles_post_ra>
